<compile_context>
chip_gen: v7x
topology: tpu7x:2x2x1
jax: 0.10.0
libtpu: 0.0.40
codegen_flags: <defaults>
</compile_context>

<pallas_src>
import math

import numpy as np

import jax
import jax.numpy as jnp
from jax.experimental import pallas as pl
from jax.experimental.pallas import tpu as pltpu


# ------------------------- compile-time constants --------------------------- #

def _round_up(x, m):
    return -(-x // m) * m


def _hann_window_np(win_length):
    # torch.hann_window default: periodic=True
    n = np.arange(win_length, dtype=np.float64)
    return 0.5 - 0.5 * np.cos(2.0 * np.pi * n / win_length)


def _hamming_window_np(win_length):
    # torch.hamming_window default: periodic=True, alpha=0.54, beta=0.46
    n = np.arange(win_length, dtype=np.float64)
    return 0.54 - 0.46 * np.cos(2.0 * np.pi * n / win_length)


def _center_window_np(window, n_fft):
    # torch.stft centers a shorter window inside n_fft with zero padding.
    wl = window.shape[0]
    left = (n_fft - wl) // 2
    return np.pad(window, (left, n_fft - wl - left))


def _dft_basis_np(n_fft, freq, window, normalized):
    """(n_fft, ncol_pad) real-DFT basis [cos | -sin] with the analysis window
    (and optional 1/sqrt(n_fft)) folded in.  Columns padded to a multiple of
    128 so the kernel's output store is lane-dense.  Built in float64; the
    twiddle exponent is reduced mod n_fft exactly in integer arithmetic."""
    n = np.arange(n_fft, dtype=np.int64)
    k = np.arange(freq, dtype=np.int64)
    m = (n[:, None] * k[None, :]) % n_fft            # exact integer reduction
    ang = 2.0 * np.pi * m.astype(np.float64) / float(n_fft)
    basis = np.concatenate([np.cos(ang), -np.sin(ang)], axis=1)  # (n_fft, 2f)
    basis = window[:, None] * basis
    if normalized:
        basis = basis / math.sqrt(n_fft)
    ncol = 2 * freq
    ncol_pad = _round_up(ncol, 128)
    basis = np.pad(basis, ((0, 0), (0, ncol_pad - ncol)))
    return basis.astype(np.float32)


def _make_plan(Lx, Ly):
    """Static plan for the four torch.stft calls in the reference Model."""
    def cfg(sig, L, n_fft, hop, window, normalized, onesided, center, pad_mode):
        Lp = L + n_fft if center else L
        T = 1 + (Lp - n_fft) // hop
        freq = n_fft // 2 + 1 if onesided else n_fft
        basis = _dft_basis_np(n_fft, freq, window, normalized)
        return dict(sig=sig, n_fft=n_fft, hop=hop, T=T, freq=freq,
                    ncol_pad=basis.shape[1], center=center, pad_mode=pad_mode,
                    window=window, normalized=normalized, onesided=onesided,
                    basis=jnp.asarray(basis))

    ones = lambda n: np.ones((n,), dtype=np.float64)
    return [
        # out0: n_fft=64, hann(44), win_length=44, center=True, normalized=True
        cfg("x", Lx, 64, 16, _center_window_np(_hann_window_np(44), 64),
            True, True, True, "reflect"),
        # out1: n_fft=128 (rectangular window), hop=n_fft//4, center=False
        cfg("x", Lx, 128, 32, ones(128), False, True, False, None),
        # out2: n_fft=512, hamming(256), hop=128, center=True, pad 'constant'
        cfg("y", Ly, 512, 128, _center_window_np(_hamming_window_np(256), 512),
            False, True, True, "constant"),
        # out3: n_fft=512, rectangular, hop=128, center=True, onesided=False
        cfg("y", Ly, 512, 128, ones(512), False, False, True, "reflect"),
    ]


# ------------------------------ Pallas kernel ------------------------------- #

def _make_fused_kernel(cfgs, B):
    n = len(cfgs)

    def kernel(*refs):
        x_refs = refs[:n]
        basis_refs = refs[n:2 * n]
        out_refs = refs[2 * n:3 * n]
        frame_refs = refs[3 * n:4 * n]
        for x_ref, b_ref, o_ref, f_ref, c in zip(
                x_refs, basis_refs, out_refs, frame_refs, cfgs):
            n_fft, hop, T = c["n_fft"], c["hop"], c["T"]
            # Fused framing: static slices of the VMEM-resident padded signal,
            # stored row-by-row into the frames scratch (tiny: <= 37 KB).
            for b in range(B):
                for t in range(T):
                    f_ref[pl.ds(b * T + t, 1), :] = (
                        x_ref[pl.ds(b, 1), pl.ds(t * hop, n_fft)])
            # One MXU matmul per STFT: frames @ (windowed DFT basis).
            o_ref[...] = jnp.dot(f_ref[...], b_ref[...],
                                 preferred_element_type=jnp.float32)

    return kernel


def _fused_stft(signals, cfgs, B):
    """signals: list of (B, Lpad_i) f32 arrays (already center-padded)."""
    bases = [c["basis"] for c in cfgs]
    in_specs = [pl.BlockSpec(s.shape, lambda i: (0, 0)) for s in signals]
    in_specs += [pl.BlockSpec(bm.shape, lambda i: (0, 0)) for bm in bases]
    out_shapes, out_specs, scratch = [], [], []
    for c in cfgs:
        M = B * c["T"]
        out_shapes.append(jax.ShapeDtypeStruct((M, c["ncol_pad"]), jnp.float32))
        out_specs.append(pl.BlockSpec((M, c["ncol_pad"]), lambda i: (0, 0)))
        scratch.append(pltpu.VMEM((M, c["n_fft"]), jnp.float32))
    return pl.pallas_call(
        _make_fused_kernel(cfgs, B),
        out_shape=tuple(out_shapes),
        grid=(1,),
        in_specs=in_specs,
        out_specs=tuple(out_specs),
        scratch_shapes=scratch,
        compiler_params=pltpu.CompilerParams(
            dimension_semantics=("arbitrary",),
            vmem_limit_bytes=64 * 1024 * 1024),
    )(*signals, *bases)


# ------------------------------ model wrapper -------------------------------- #

def _center_pad(sig, n_fft, pad_mode):
    pad = n_fft // 2
    mode = "reflect" if pad_mode == "reflect" else "constant"
    return jnp.pad(sig, ((0, 0), (pad, pad)), mode=mode)


def _finalize(out, B, T, freq):
    re = out[:, :freq].reshape(B, T, freq)
    im = out[:, freq:2 * freq].reshape(B, T, freq)
    return jnp.transpose(jax.lax.complex(re, im), (0, 2, 1))    # (B, freq, T)


def make_model_forward(B, Lx, Ly):
    cfgs = _make_plan(Lx, Ly)

    @jax.jit
    def forward(x, y):
        x = x.astype(jnp.float32)
        y = y.astype(jnp.float32)
        sig_map = {"x": x, "y": y}
        signals = []
        for c in cfgs:
            s = sig_map[c["sig"]]
            if c["center"]:
                s = _center_pad(s, c["n_fft"], c["pad_mode"])
            signals.append(s)
        outs = _fused_stft(signals, cfgs, B)
        return tuple(_finalize(o, B, c["T"], c["freq"])
                     for o, c in zip(outs, cfgs))

    return forward


# ------------------------- independent numpy reference ----------------------- #

def _stft_ref_np(sig, c):
    """Pure-numpy torch.stft reference (no shared code with the kernel basis)."""
    sig = np.asarray(sig, dtype=np.float64)
    n_fft, hop, T, freq = c["n_fft"], c["hop"], c["T"], c["freq"]
    if c["center"]:
        pad = n_fft // 2
        mode = "reflect" if c["pad_mode"] == "reflect" else "constant"
        sig = np.pad(sig, ((0, 0), (pad, pad)), mode=mode)
    B = sig.shape[0]
    w = np.asarray(c["window"], dtype=np.float64)
    out = np.empty((B, freq, T), dtype=np.complex128)
    for b in range(B):
        for t in range(T):
            frame = sig[b, t * hop:t * hop + n_fft] * w
            spec = np.fft.fft(frame)
            out[b, :, t] = spec[:freq]
    if c["normalized"]:
        out = out / math.sqrt(n_fft)
    return out.astype(np.complex64)


# ---------------------------------- main ------------------------------------ #

if __name__ == "__main__":
    key = jax.random.PRNGKey(0)
    kx, ky = jax.random.split(key)
    B, LX, LY = 2, 256, 1024
    x = jax.random.uniform(kx, (B, LX), dtype=jnp.float32)
    y = jax.random.uniform(ky, (B, LY), dtype=jnp.float32)

    forward = make_model_forward(B, LX, LY)
    outs = jax.block_until_ready(forward(x, y))

    expected = [(B, 33, 17), (B, 65, 5), (B, 257, 9), (B, 512, 9)]
    for o, shp in zip(outs, expected):
        assert o.shape == shp, (o.shape, shp)
        assert o.dtype == jnp.complex64, o.dtype

    # Numerical self-check against an independent numpy FFT reference that
    # follows torch.stft semantics directly.
    cfgs = _make_plan(LX, LY)
    sig_map = {"x": np.asarray(x), "y": np.asarray(y)}
    for o, c in zip(outs, cfgs):
        ref = _stft_ref_np(sig_map[c["sig"]], c)
        np.testing.assert_allclose(np.asarray(o), ref, rtol=2e-2, atol=5e-2)

    print("KERNEL_OK")
</pallas_src>

<mosaic_0001>
module attributes {stable_mosaic.version = 11 : i64} {
  func.func @kernel(%arg0: i32, %arg1: memref<2x320xf32, #tpu.memory_space<vmem>>, %arg2: memref<2x256xf32, #tpu.memory_space<vmem>>, %arg3: memref<2x1536xf32, #tpu.memory_space<vmem>>, %arg4: memref<2x1536xf32, #tpu.memory_space<vmem>>, %arg5: memref<64x128xf32, #tpu.memory_space<vmem>>, %arg6: memref<128x256xf32, #tpu.memory_space<vmem>>, %arg7: memref<512x640xf32, #tpu.memory_space<vmem>>, %arg8: memref<512x1024xf32, #tpu.memory_space<vmem>>, %arg9: memref<34x128xf32, #tpu.memory_space<vmem>>, %arg10: memref<10x256xf32, #tpu.memory_space<vmem>>, %arg11: memref<18x640xf32, #tpu.memory_space<vmem>>, %arg12: memref<18x1024xf32, #tpu.memory_space<vmem>>, %arg13: memref<34x64xf32, #tpu.memory_space<vmem>>, %arg14: memref<10x128xf32, #tpu.memory_space<vmem>>, %arg15: memref<18x512xf32, #tpu.memory_space<vmem>>, %arg16: memref<18x512xf32, #tpu.memory_space<vmem>>) attributes {dimension_semantics = [#tpu.dimension_semantics<arbitrary>], iteration_bounds = array<i64: 1>, scalar_prefetch = 0 : i64, scratch_operands = 4 : i64, tpu.core_type = #tpu.core_type<tc>, window_params = [{pipeline_mode = #tpu.pipeline_mode<synchronous>, transform_indices = @transform_0, window_bounds = array<i64: 2, 320>}, {pipeline_mode = #tpu.pipeline_mode<synchronous>, transform_indices = @transform_1, window_bounds = array<i64: 2, 256>}, {pipeline_mode = #tpu.pipeline_mode<synchronous>, transform_indices = @transform_2, window_bounds = array<i64: 2, 1536>}, {pipeline_mode = #tpu.pipeline_mode<synchronous>, transform_indices = @transform_3, window_bounds = array<i64: 2, 1536>}, {pipeline_mode = #tpu.pipeline_mode<synchronous>, transform_indices = @transform_4, window_bounds = array<i64: 64, 128>}, {pipeline_mode = #tpu.pipeline_mode<synchronous>, transform_indices = @transform_5, window_bounds = array<i64: 128, 256>}, {pipeline_mode = #tpu.pipeline_mode<synchronous>, transform_indices = @transform_6, window_bounds = array<i64: 512, 640>}, {pipeline_mode = #tpu.pipeline_mode<synchronous>, transform_indices = @transform_7, window_bounds = array<i64: 512, 1024>}, {pipeline_mode = #tpu.pipeline_mode<synchronous>, transform_indices = @transform_8, window_bounds = array<i64: 34, 128>}, {pipeline_mode = #tpu.pipeline_mode<synchronous>, transform_indices = @transform_9, window_bounds = array<i64: 10, 256>}, {pipeline_mode = #tpu.pipeline_mode<synchronous>, transform_indices = @transform_10, window_bounds = array<i64: 18, 640>}, {pipeline_mode = #tpu.pipeline_mode<synchronous>, transform_indices = @transform_11, window_bounds = array<i64: 18, 1024>}]} {
    %c0 = arith.constant 0 : index
    %c0_0 = arith.constant 0 : index
    %0 = vector.load %arg1[%c0, %c0_0] : memref<2x320xf32, #tpu.memory_space<vmem>>, vector<1x64xf32>
    %c0_1 = arith.constant 0 : index
    %c0_2 = arith.constant 0 : index
    %1 = vector.load %arg13[%c0_1, %c0_2] : memref<34x64xf32, #tpu.memory_space<vmem>>, vector<1x64xf32>
    tpu.vector_store %arg13[%c0_1, %c0_2], %0 {strides = array<i32>} : memref<34x64xf32, #tpu.memory_space<vmem>>, vector<1x64xf32>,
    %c0_3 = arith.constant 0 : index
    %c16 = arith.constant 16 : index
    %2 = vector.load %arg1[%c0_3, %c16] : memref<2x320xf32, #tpu.memory_space<vmem>>, vector<1x64xf32>
    %c1 = arith.constant 1 : index
    %c0_4 = arith.constant 0 : index
    %3 = vector.load %arg13[%c1, %c0_4] : memref<34x64xf32, #tpu.memory_space<vmem>>, vector<1x64xf32>
    tpu.vector_store %arg13[%c1, %c0_4], %2 {strides = array<i32>} : memref<34x64xf32, #tpu.memory_space<vmem>>, vector<1x64xf32>,
    %c0_5 = arith.constant 0 : index
    %c32 = arith.constant 32 : index
    %4 = vector.load %arg1[%c0_5, %c32] : memref<2x320xf32, #tpu.memory_space<vmem>>, vector<1x64xf32>
    %c2 = arith.constant 2 : index
    %c0_6 = arith.constant 0 : index
    %5 = vector.load %arg13[%c2, %c0_6] : memref<34x64xf32, #tpu.memory_space<vmem>>, vector<1x64xf32>
    tpu.vector_store %arg13[%c2, %c0_6], %4 {strides = array<i32>} : memref<34x64xf32, #tpu.memory_space<vmem>>, vector<1x64xf32>,
    %c0_7 = arith.constant 0 : index
    %c48 = arith.constant 48 : index
    %6 = vector.load %arg1[%c0_7, %c48] : memref<2x320xf32, #tpu.memory_space<vmem>>, vector<1x64xf32>
    %c3 = arith.constant 3 : index
    %c0_8 = arith.constant 0 : index
    %7 = vector.load %arg13[%c3, %c0_8] : memref<34x64xf32, #tpu.memory_space<vmem>>, vector<1x64xf32>
    tpu.vector_store %arg13[%c3, %c0_8], %6 {strides = array<i32>} : memref<34x64xf32, #tpu.memory_space<vmem>>, vector<1x64xf32>,
    %c0_9 = arith.constant 0 : index
    %c64 = arith.constant 64 : index
    %8 = vector.load %arg1[%c0_9, %c64] : memref<2x320xf32, #tpu.memory_space<vmem>>, vector<1x64xf32>
    %c4 = arith.constant 4 : index
    %c0_10 = arith.constant 0 : index
    %9 = vector.load %arg13[%c4, %c0_10] : memref<34x64xf32, #tpu.memory_space<vmem>>, vector<1x64xf32>
    tpu.vector_store %arg13[%c4, %c0_10], %8 {strides = array<i32>} : memref<34x64xf32, #tpu.memory_space<vmem>>, vector<1x64xf32>,
    %c0_11 = arith.constant 0 : index
    %c80 = arith.constant 80 : index
    %10 = vector.load %arg1[%c0_11, %c80] : memref<2x320xf32, #tpu.memory_space<vmem>>, vector<1x64xf32>
    %c5 = arith.constant 5 : index
    %c0_12 = arith.constant 0 : index
    %11 = vector.load %arg13[%c5, %c0_12] : memref<34x64xf32, #tpu.memory_space<vmem>>, vector<1x64xf32>
    tpu.vector_store %arg13[%c5, %c0_12], %10 {strides = array<i32>} : memref<34x64xf32, #tpu.memory_space<vmem>>, vector<1x64xf32>,
    %c0_13 = arith.constant 0 : index
    %c96 = arith.constant 96 : index
    %12 = vector.load %arg1[%c0_13, %c96] : memref<2x320xf32, #tpu.memory_space<vmem>>, vector<1x64xf32>
    %c6 = arith.constant 6 : index
    %c0_14 = arith.constant 0 : index
    %13 = vector.load %arg13[%c6, %c0_14] : memref<34x64xf32, #tpu.memory_space<vmem>>, vector<1x64xf32>
    tpu.vector_store %arg13[%c6, %c0_14], %12 {strides = array<i32>} : memref<34x64xf32, #tpu.memory_space<vmem>>, vector<1x64xf32>,
    %c0_15 = arith.constant 0 : index
    %c112 = arith.constant 112 : index
    %14 = vector.load %arg1[%c0_15, %c112] : memref<2x320xf32, #tpu.memory_space<vmem>>, vector<1x64xf32>
    %c7 = arith.constant 7 : index
    %c0_16 = arith.constant 0 : index
    %15 = vector.load %arg13[%c7, %c0_16] : memref<34x64xf32, #tpu.memory_space<vmem>>, vector<1x64xf32>
    tpu.vector_store %arg13[%c7, %c0_16], %14 {strides = array<i32>} : memref<34x64xf32, #tpu.memory_space<vmem>>, vector<1x64xf32>,
    %c0_17 = arith.constant 0 : index
    %c128 = arith.constant 128 : index
    %16 = vector.load %arg1[%c0_17, %c128] : memref<2x320xf32, #tpu.memory_space<vmem>>, vector<1x64xf32>
    %c8 = arith.constant 8 : index
    %c0_18 = arith.constant 0 : index
    %17 = vector.load %arg13[%c8, %c0_18] : memref<34x64xf32, #tpu.memory_space<vmem>>, vector<1x64xf32>
    tpu.vector_store %arg13[%c8, %c0_18], %16 {strides = array<i32>} : memref<34x64xf32, #tpu.memory_space<vmem>>, vector<1x64xf32>,
    %c0_19 = arith.constant 0 : index
    %c144 = arith.constant 144 : index
    %18 = vector.load %arg1[%c0_19, %c144] : memref<2x320xf32, #tpu.memory_space<vmem>>, vector<1x64xf32>
    %c9 = arith.constant 9 : index
    %c0_20 = arith.constant 0 : index
    %19 = vector.load %arg13[%c9, %c0_20] : memref<34x64xf32, #tpu.memory_space<vmem>>, vector<1x64xf32>
    tpu.vector_store %arg13[%c9, %c0_20], %18 {strides = array<i32>} : memref<34x64xf32, #tpu.memory_space<vmem>>, vector<1x64xf32>,
    %c0_21 = arith.constant 0 : index
    %c160 = arith.constant 160 : index
    %20 = vector.load %arg1[%c0_21, %c160] : memref<2x320xf32, #tpu.memory_space<vmem>>, vector<1x64xf32>
    %c10 = arith.constant 10 : index
    %c0_22 = arith.constant 0 : index
    %21 = vector.load %arg13[%c10, %c0_22] : memref<34x64xf32, #tpu.memory_space<vmem>>, vector<1x64xf32>
    tpu.vector_store %arg13[%c10, %c0_22], %20 {strides = array<i32>} : memref<34x64xf32, #tpu.memory_space<vmem>>, vector<1x64xf32>,
    %c0_23 = arith.constant 0 : index
    %c176 = arith.constant 176 : index
    %22 = vector.load %arg1[%c0_23, %c176] : memref<2x320xf32, #tpu.memory_space<vmem>>, vector<1x64xf32>
    %c11 = arith.constant 11 : index
    %c0_24 = arith.constant 0 : index
    %23 = vector.load %arg13[%c11, %c0_24] : memref<34x64xf32, #tpu.memory_space<vmem>>, vector<1x64xf32>
    tpu.vector_store %arg13[%c11, %c0_24], %22 {strides = array<i32>} : memref<34x64xf32, #tpu.memory_space<vmem>>, vector<1x64xf32>,
    %c0_25 = arith.constant 0 : index
    %c192 = arith.constant 192 : index
    %24 = vector.load %arg1[%c0_25, %c192] : memref<2x320xf32, #tpu.memory_space<vmem>>, vector<1x64xf32>
    %c12 = arith.constant 12 : index
    %c0_26 = arith.constant 0 : index
    %25 = vector.load %arg13[%c12, %c0_26] : memref<34x64xf32, #tpu.memory_space<vmem>>, vector<1x64xf32>
    tpu.vector_store %arg13[%c12, %c0_26], %24 {strides = array<i32>} : memref<34x64xf32, #tpu.memory_space<vmem>>, vector<1x64xf32>,
    %c0_27 = arith.constant 0 : index
    %c208 = arith.constant 208 : index
    %26 = vector.load %arg1[%c0_27, %c208] : memref<2x320xf32, #tpu.memory_space<vmem>>, vector<1x64xf32>
    %c13 = arith.constant 13 : index
    %c0_28 = arith.constant 0 : index
    %27 = vector.load %arg13[%c13, %c0_28] : memref<34x64xf32, #tpu.memory_space<vmem>>, vector<1x64xf32>
    tpu.vector_store %arg13[%c13, %c0_28], %26 {strides = array<i32>} : memref<34x64xf32, #tpu.memory_space<vmem>>, vector<1x64xf32>,
    %c0_29 = arith.constant 0 : index
    %c224 = arith.constant 224 : index
    %28 = vector.load %arg1[%c0_29, %c224] : memref<2x320xf32, #tpu.memory_space<vmem>>, vector<1x64xf32>
    %c14 = arith.constant 14 : index
    %c0_30 = arith.constant 0 : index
    %29 = vector.load %arg13[%c14, %c0_30] : memref<34x64xf32, #tpu.memory_space<vmem>>, vector<1x64xf32>
    tpu.vector_store %arg13[%c14, %c0_30], %28 {strides = array<i32>} : memref<34x64xf32, #tpu.memory_space<vmem>>, vector<1x64xf32>,
    %c0_31 = arith.constant 0 : index
    %c240 = arith.constant 240 : index
    %30 = vector.load %arg1[%c0_31, %c240] : memref<2x320xf32, #tpu.memory_space<vmem>>, vector<1x64xf32>
    %c15 = arith.constant 15 : index
    %c0_32 = arith.constant 0 : index
    %31 = vector.load %arg13[%c15, %c0_32] : memref<34x64xf32, #tpu.memory_space<vmem>>, vector<1x64xf32>
    tpu.vector_store %arg13[%c15, %c0_32], %30 {strides = array<i32>} : memref<34x64xf32, #tpu.memory_space<vmem>>, vector<1x64xf32>,
    %c0_33 = arith.constant 0 : index
    %c256 = arith.constant 256 : index
    %32 = vector.load %arg1[%c0_33, %c256] : memref<2x320xf32, #tpu.memory_space<vmem>>, vector<1x64xf32>
    %c16_34 = arith.constant 16 : index
    %c0_35 = arith.constant 0 : index
    %33 = vector.load %arg13[%c16_34, %c0_35] : memref<34x64xf32, #tpu.memory_space<vmem>>, vector<1x64xf32>
    tpu.vector_store %arg13[%c16_34, %c0_35], %32 {strides = array<i32>} : memref<34x64xf32, #tpu.memory_space<vmem>>, vector<1x64xf32>,
    %c1_36 = arith.constant 1 : index
    %c0_37 = arith.constant 0 : index
    %34 = vector.load %arg1[%c1_36, %c0_37] : memref<2x320xf32, #tpu.memory_space<vmem>>, vector<1x64xf32>
    %c17 = arith.constant 17 : index
    %c0_38 = arith.constant 0 : index
    %35 = vector.load %arg13[%c17, %c0_38] : memref<34x64xf32, #tpu.memory_space<vmem>>, vector<1x64xf32>
    tpu.vector_store %arg13[%c17, %c0_38], %34 {strides = array<i32>} : memref<34x64xf32, #tpu.memory_space<vmem>>, vector<1x64xf32>,
    %c1_39 = arith.constant 1 : index
    %c16_40 = arith.constant 16 : index
    %36 = vector.load %arg1[%c1_39, %c16_40] : memref<2x320xf32, #tpu.memory_space<vmem>>, vector<1x64xf32>
    %c18 = arith.constant 18 : index
    %c0_41 = arith.constant 0 : index
    %37 = vector.load %arg13[%c18, %c0_41] : memref<34x64xf32, #tpu.memory_space<vmem>>, vector<1x64xf32>
    tpu.vector_store %arg13[%c18, %c0_41], %36 {strides = array<i32>} : memref<34x64xf32, #tpu.memory_space<vmem>>, vector<1x64xf32>,
    %c1_42 = arith.constant 1 : index
    %c32_43 = arith.constant 32 : index
    %38 = vector.load %arg1[%c1_42, %c32_43] : memref<2x320xf32, #tpu.memory_space<vmem>>, vector<1x64xf32>
    %c19 = arith.constant 19 : index
    %c0_44 = arith.constant 0 : index
    %39 = vector.load %arg13[%c19, %c0_44] : memref<34x64xf32, #tpu.memory_space<vmem>>, vector<1x64xf32>
    tpu.vector_store %arg13[%c19, %c0_44], %38 {strides = array<i32>} : memref<34x64xf32, #tpu.memory_space<vmem>>, vector<1x64xf32>,
    %c1_45 = arith.constant 1 : index
    %c48_46 = arith.constant 48 : index
    %40 = vector.load %arg1[%c1_45, %c48_46] : memref<2x320xf32, #tpu.memory_space<vmem>>, vector<1x64xf32>
    %c20 = arith.constant 20 : index
    %c0_47 = arith.constant 0 : index
    %41 = vector.load %arg13[%c20, %c0_47] : memref<34x64xf32, #tpu.memory_space<vmem>>, vector<1x64xf32>
    tpu.vector_store %arg13[%c20, %c0_47], %40 {strides = array<i32>} : memref<34x64xf32, #tpu.memory_space<vmem>>, vector<1x64xf32>,
    %c1_48 = arith.constant 1 : index
    %c64_49 = arith.constant 64 : index
    %42 = vector.load %arg1[%c1_48, %c64_49] : memref<2x320xf32, #tpu.memory_space<vmem>>, vector<1x64xf32>
    %c21 = arith.constant 21 : index
    %c0_50 = arith.constant 0 : index
    %43 = vector.load %arg13[%c21, %c0_50] : memref<34x64xf32, #tpu.memory_space<vmem>>, vector<1x64xf32>
    tpu.vector_store %arg13[%c21, %c0_50], %42 {strides = array<i32>} : memref<34x64xf32, #tpu.memory_space<vmem>>, vector<1x64xf32>,
    %c1_51 = arith.constant 1 : index
    %c80_52 = arith.constant 80 : index
    %44 = vector.load %arg1[%c1_51, %c80_52] : memref<2x320xf32, #tpu.memory_space<vmem>>, vector<1x64xf32>
    %c22 = arith.constant 22 : index
    %c0_53 = arith.constant 0 : index
    %45 = vector.load %arg13[%c22, %c0_53] : memref<34x64xf32, #tpu.memory_space<vmem>>, vector<1x64xf32>
    tpu.vector_store %arg13[%c22, %c0_53], %44 {strides = array<i32>} : memref<34x64xf32, #tpu.memory_space<vmem>>, vector<1x64xf32>,
    %c1_54 = arith.constant 1 : index
    %c96_55 = arith.constant 96 : index
    %46 = vector.load %arg1[%c1_54, %c96_55] : memref<2x320xf32, #tpu.memory_space<vmem>>, vector<1x64xf32>
    %c23 = arith.constant 23 : index
    %c0_56 = arith.constant 0 : index
    %47 = vector.load %arg13[%c23, %c0_56] : memref<34x64xf32, #tpu.memory_space<vmem>>, vector<1x64xf32>
    tpu.vector_store %arg13[%c23, %c0_56], %46 {strides = array<i32>} : memref<34x64xf32, #tpu.memory_space<vmem>>, vector<1x64xf32>,
    %c1_57 = arith.constant 1 : index
    %c112_58 = arith.constant 112 : index
    %48 = vector.load %arg1[%c1_57, %c112_58] : memref<2x320xf32, #tpu.memory_space<vmem>>, vector<1x64xf32>
    %c24 = arith.constant 24 : index
    %c0_59 = arith.constant 0 : index
    %49 = vector.load %arg13[%c24, %c0_59] : memref<34x64xf32, #tpu.memory_space<vmem>>, vector<1x64xf32>
    tpu.vector_store %arg13[%c24, %c0_59], %48 {strides = array<i32>} : memref<34x64xf32, #tpu.memory_space<vmem>>, vector<1x64xf32>,
    %c1_60 = arith.constant 1 : index
    %c128_61 = arith.constant 128 : index
    %50 = vector.load %arg1[%c1_60, %c128_61] : memref<2x320xf32, #tpu.memory_space<vmem>>, vector<1x64xf32>
    %c25 = arith.constant 25 : index
    %c0_62 = arith.constant 0 : index
    %51 = vector.load %arg13[%c25, %c0_62] : memref<34x64xf32, #tpu.memory_space<vmem>>, vector<1x64xf32>
    tpu.vector_store %arg13[%c25, %c0_62], %50 {strides = array<i32>} : memref<34x64xf32, #tpu.memory_space<vmem>>, vector<1x64xf32>,
    %c1_63 = arith.constant 1 : index
    %c144_64 = arith.constant 144 : index
    %52 = vector.load %arg1[%c1_63, %c144_64] : memref<2x320xf32, #tpu.memory_space<vmem>>, vector<1x64xf32>
    %c26 = arith.constant 26 : index
    %c0_65 = arith.constant 0 : index
    %53 = vector.load %arg13[%c26, %c0_65] : memref<34x64xf32, #tpu.memory_space<vmem>>, vector<1x64xf32>
    tpu.vector_store %arg13[%c26, %c0_65], %52 {strides = array<i32>} : memref<34x64xf32, #tpu.memory_space<vmem>>, vector<1x64xf32>,
    %c1_66 = arith.constant 1 : index
    %c160_67 = arith.constant 160 : index
    %54 = vector.load %arg1[%c1_66, %c160_67] : memref<2x320xf32, #tpu.memory_space<vmem>>, vector<1x64xf32>
    %c27 = arith.constant 27 : index
    %c0_68 = arith.constant 0 : index
    %55 = vector.load %arg13[%c27, %c0_68] : memref<34x64xf32, #tpu.memory_space<vmem>>, vector<1x64xf32>
    tpu.vector_store %arg13[%c27, %c0_68], %54 {strides = array<i32>} : memref<34x64xf32, #tpu.memory_space<vmem>>, vector<1x64xf32>,
    %c1_69 = arith.constant 1 : index
    %c176_70 = arith.constant 176 : index
    %56 = vector.load %arg1[%c1_69, %c176_70] : memref<2x320xf32, #tpu.memory_space<vmem>>, vector<1x64xf32>
    %c28 = arith.constant 28 : index
    %c0_71 = arith.constant 0 : index
    %57 = vector.load %arg13[%c28, %c0_71] : memref<34x64xf32, #tpu.memory_space<vmem>>, vector<1x64xf32>
    tpu.vector_store %arg13[%c28, %c0_71], %56 {strides = array<i32>} : memref<34x64xf32, #tpu.memory_space<vmem>>, vector<1x64xf32>,
    %c1_72 = arith.constant 1 : index
    %c192_73 = arith.constant 192 : index
    %58 = vector.load %arg1[%c1_72, %c192_73] : memref<2x320xf32, #tpu.memory_space<vmem>>, vector<1x64xf32>
    %c29 = arith.constant 29 : index
    %c0_74 = arith.constant 0 : index
    %59 = vector.load %arg13[%c29, %c0_74] : memref<34x64xf32, #tpu.memory_space<vmem>>, vector<1x64xf32>
    tpu.vector_store %arg13[%c29, %c0_74], %58 {strides = array<i32>} : memref<34x64xf32, #tpu.memory_space<vmem>>, vector<1x64xf32>,
    %c1_75 = arith.constant 1 : index
    %c208_76 = arith.constant 208 : index
    %60 = vector.load %arg1[%c1_75, %c208_76] : memref<2x320xf32, #tpu.memory_space<vmem>>, vector<1x64xf32>
    %c30 = arith.constant 30 : index
    %c0_77 = arith.constant 0 : index
    %61 = vector.load %arg13[%c30, %c0_77] : memref<34x64xf32, #tpu.memory_space<vmem>>, vector<1x64xf32>
    tpu.vector_store %arg13[%c30, %c0_77], %60 {strides = array<i32>} : memref<34x64xf32, #tpu.memory_space<vmem>>, vector<1x64xf32>,
    %c1_78 = arith.constant 1 : index
    %c224_79 = arith.constant 224 : index
    %62 = vector.load %arg1[%c1_78, %c224_79] : memref<2x320xf32, #tpu.memory_space<vmem>>, vector<1x64xf32>
    %c31 = arith.constant 31 : index
    %c0_80 = arith.constant 0 : index
    %63 = vector.load %arg13[%c31, %c0_80] : memref<34x64xf32, #tpu.memory_space<vmem>>, vector<1x64xf32>
    tpu.vector_store %arg13[%c31, %c0_80], %62 {strides = array<i32>} : memref<34x64xf32, #tpu.memory_space<vmem>>, vector<1x64xf32>,
    %c1_81 = arith.constant 1 : index
    %c240_82 = arith.constant 240 : index
    %64 = vector.load %arg1[%c1_81, %c240_82] : memref<2x320xf32, #tpu.memory_space<vmem>>, vector<1x64xf32>
    %c32_83 = arith.constant 32 : index
    %c0_84 = arith.constant 0 : index
    %65 = vector.load %arg13[%c32_83, %c0_84] : memref<34x64xf32, #tpu.memory_space<vmem>>, vector<1x64xf32>
    tpu.vector_store %arg13[%c32_83, %c0_84], %64 {strides = array<i32>} : memref<34x64xf32, #tpu.memory_space<vmem>>, vector<1x64xf32>,
    %c1_85 = arith.constant 1 : index
    %c256_86 = arith.constant 256 : index
    %66 = vector.load %arg1[%c1_85, %c256_86] : memref<2x320xf32, #tpu.memory_space<vmem>>, vector<1x64xf32>
    %c33 = arith.constant 33 : index
    %c0_87 = arith.constant 0 : index
    %67 = vector.load %arg13[%c33, %c0_87] : memref<34x64xf32, #tpu.memory_space<vmem>>, vector<1x64xf32>
    tpu.vector_store %arg13[%c33, %c0_87], %66 {strides = array<i32>} : memref<34x64xf32, #tpu.memory_space<vmem>>, vector<1x64xf32>,
    %c0_88 = arith.constant 0 : index
    %c0_89 = arith.constant 0 : index
    %68 = vector.load %arg13[%c0_88, %c0_89] : memref<34x64xf32, #tpu.memory_space<vmem>>, vector<34x64xf32>
    %c0_90 = arith.constant 0 : index
    %c0_91 = arith.constant 0 : index
    %69 = vector.load %arg5[%c0_90, %c0_91] : memref<64x128xf32, #tpu.memory_space<vmem>>, vector<64x128xf32>
    %cst = arith.constant dense<0.000000e+00> : vector<34x128xf32>
    %70 = tpu.matmul %68, %69, %cst {dimension_numbers = #tpu.dot_dimension_numbers<[1], [0], [0], [1], [0, 0, 1, 1], [], []>} : vector<34x64xf32>, vector<64x128xf32>, vector<34x128xf32> -> vector<34x128xf32>
    %c0_92 = arith.constant 0 : index
    %c0_93 = arith.constant 0 : index
    %71 = vector.load %arg9[%c0_92, %c0_93] : memref<34x128xf32, #tpu.memory_space<vmem>>, vector<34x128xf32>
    tpu.vector_store %arg9[%c0_92, %c0_93], %70 {strides = array<i32>} : memref<34x128xf32, #tpu.memory_space<vmem>>, vector<34x128xf32>,
    %c0_94 = arith.constant 0 : index
    %c0_95 = arith.constant 0 : index
    %72 = vector.load %arg2[%c0_94, %c0_95] : memref<2x256xf32, #tpu.memory_space<vmem>>, vector<1x128xf32>
    %c0_96 = arith.constant 0 : index
    %c0_97 = arith.constant 0 : index
    %73 = vector.load %arg14[%c0_96, %c0_97] : memref<10x128xf32, #tpu.memory_space<vmem>>, vector<1x128xf32>
    tpu.vector_store %arg14[%c0_96, %c0_97], %72 {strides = array<i32>} : memref<10x128xf32, #tpu.memory_space<vmem>>, vector<1x128xf32>,
    %c0_98 = arith.constant 0 : index
    %c32_99 = arith.constant 32 : index
    %74 = vector.load %arg2[%c0_98, %c32_99] : memref<2x256xf32, #tpu.memory_space<vmem>>, vector<1x128xf32>
    %c1_100 = arith.constant 1 : index
    %c0_101 = arith.constant 0 : index
    %75 = vector.load %arg14[%c1_100, %c0_101] : memref<10x128xf32, #tpu.memory_space<vmem>>, vector<1x128xf32>
    tpu.vector_store %arg14[%c1_100, %c0_101], %74 {strides = array<i32>} : memref<10x128xf32, #tpu.memory_space<vmem>>, vector<1x128xf32>,
    %c0_102 = arith.constant 0 : index
    %c64_103 = arith.constant 64 : index
    %76 = vector.load %arg2[%c0_102, %c64_103] : memref<2x256xf32, #tpu.memory_space<vmem>>, vector<1x128xf32>
    %c2_104 = arith.constant 2 : index
    %c0_105 = arith.constant 0 : index
    %77 = vector.load %arg14[%c2_104, %c0_105] : memref<10x128xf32, #tpu.memory_space<vmem>>, vector<1x128xf32>
    tpu.vector_store %arg14[%c2_104, %c0_105], %76 {strides = array<i32>} : memref<10x128xf32, #tpu.memory_space<vmem>>, vector<1x128xf32>,
    %c0_106 = arith.constant 0 : index
    %c96_107 = arith.constant 96 : index
    %78 = vector.load %arg2[%c0_106, %c96_107] : memref<2x256xf32, #tpu.memory_space<vmem>>, vector<1x128xf32>
    %c3_108 = arith.constant 3 : index
    %c0_109 = arith.constant 0 : index
    %79 = vector.load %arg14[%c3_108, %c0_109] : memref<10x128xf32, #tpu.memory_space<vmem>>, vector<1x128xf32>
    tpu.vector_store %arg14[%c3_108, %c0_109], %78 {strides = array<i32>} : memref<10x128xf32, #tpu.memory_space<vmem>>, vector<1x128xf32>,
    %c0_110 = arith.constant 0 : index
    %c128_111 = arith.constant 128 : index
    %80 = vector.load %arg2[%c0_110, %c128_111] : memref<2x256xf32, #tpu.memory_space<vmem>>, vector<1x128xf32>
    %c4_112 = arith.constant 4 : index
    %c0_113 = arith.constant 0 : index
    %81 = vector.load %arg14[%c4_112, %c0_113] : memref<10x128xf32, #tpu.memory_space<vmem>>, vector<1x128xf32>
    tpu.vector_store %arg14[%c4_112, %c0_113], %80 {strides = array<i32>} : memref<10x128xf32, #tpu.memory_space<vmem>>, vector<1x128xf32>,
    %c1_114 = arith.constant 1 : index
    %c0_115 = arith.constant 0 : index
    %82 = vector.load %arg2[%c1_114, %c0_115] : memref<2x256xf32, #tpu.memory_space<vmem>>, vector<1x128xf32>
    %c5_116 = arith.constant 5 : index
    %c0_117 = arith.constant 0 : index
    %83 = vector.load %arg14[%c5_116, %c0_117] : memref<10x128xf32, #tpu.memory_space<vmem>>, vector<1x128xf32>
    tpu.vector_store %arg14[%c5_116, %c0_117], %82 {strides = array<i32>} : memref<10x128xf32, #tpu.memory_space<vmem>>, vector<1x128xf32>,
    %c1_118 = arith.constant 1 : index
    %c32_119 = arith.constant 32 : index
    %84 = vector.load %arg2[%c1_118, %c32_119] : memref<2x256xf32, #tpu.memory_space<vmem>>, vector<1x128xf32>
    %c6_120 = arith.constant 6 : index
    %c0_121 = arith.constant 0 : index
    %85 = vector.load %arg14[%c6_120, %c0_121] : memref<10x128xf32, #tpu.memory_space<vmem>>, vector<1x128xf32>
    tpu.vector_store %arg14[%c6_120, %c0_121], %84 {strides = array<i32>} : memref<10x128xf32, #tpu.memory_space<vmem>>, vector<1x128xf32>,
    %c1_122 = arith.constant 1 : index
    %c64_123 = arith.constant 64 : index
    %86 = vector.load %arg2[%c1_122, %c64_123] : memref<2x256xf32, #tpu.memory_space<vmem>>, vector<1x128xf32>
    %c7_124 = arith.constant 7 : index
    %c0_125 = arith.constant 0 : index
    %87 = vector.load %arg14[%c7_124, %c0_125] : memref<10x128xf32, #tpu.memory_space<vmem>>, vector<1x128xf32>
    tpu.vector_store %arg14[%c7_124, %c0_125], %86 {strides = array<i32>} : memref<10x128xf32, #tpu.memory_space<vmem>>, vector<1x128xf32>,
    %c1_126 = arith.constant 1 : index
    %c96_127 = arith.constant 96 : index
    %88 = vector.load %arg2[%c1_126, %c96_127] : memref<2x256xf32, #tpu.memory_space<vmem>>, vector<1x128xf32>
    %c8_128 = arith.constant 8 : index
    %c0_129 = arith.constant 0 : index
    %89 = vector.load %arg14[%c8_128, %c0_129] : memref<10x128xf32, #tpu.memory_space<vmem>>, vector<1x128xf32>
    tpu.vector_store %arg14[%c8_128, %c0_129], %88 {strides = array<i32>} : memref<10x128xf32, #tpu.memory_space<vmem>>, vector<1x128xf32>,
    %c1_130 = arith.constant 1 : index
    %c128_131 = arith.constant 128 : index
    %90 = vector.load %arg2[%c1_130, %c128_131] : memref<2x256xf32, #tpu.memory_space<vmem>>, vector<1x128xf32>
    %c9_132 = arith.constant 9 : index
    %c0_133 = arith.constant 0 : index
    %91 = vector.load %arg14[%c9_132, %c0_133] : memref<10x128xf32, #tpu.memory_space<vmem>>, vector<1x128xf32>
    tpu.vector_store %arg14[%c9_132, %c0_133], %90 {strides = array<i32>} : memref<10x128xf32, #tpu.memory_space<vmem>>, vector<1x128xf32>,
    %c0_134 = arith.constant 0 : index
    %c0_135 = arith.constant 0 : index
    %92 = vector.load %arg14[%c0_134, %c0_135] : memref<10x128xf32, #tpu.memory_space<vmem>>, vector<10x128xf32>
    %c0_136 = arith.constant 0 : index
    %c0_137 = arith.constant 0 : index
    %93 = vector.load %arg6[%c0_136, %c0_137] : memref<128x256xf32, #tpu.memory_space<vmem>>, vector<128x256xf32>
    %cst_138 = arith.constant dense<0.000000e+00> : vector<10x256xf32>
    %94 = tpu.matmul %92, %93, %cst_138 {dimension_numbers = #tpu.dot_dimension_numbers<[1], [0], [0], [1], [0, 0, 1, 1], [], []>} : vector<10x128xf32>, vector<128x256xf32>, vector<10x256xf32> -> vector<10x256xf32>
    %c0_139 = arith.constant 0 : index
    %c0_140 = arith.constant 0 : index
    %95 = vector.load %arg10[%c0_139, %c0_140] : memref<10x256xf32, #tpu.memory_space<vmem>>, vector<10x256xf32>
    tpu.vector_store %arg10[%c0_139, %c0_140], %94 {strides = array<i32>} : memref<10x256xf32, #tpu.memory_space<vmem>>, vector<10x256xf32>,
    %c0_141 = arith.constant 0 : index
    %c0_142 = arith.constant 0 : index
    %96 = vector.load %arg3[%c0_141, %c0_142] : memref<2x1536xf32, #tpu.memory_space<vmem>>, vector<1x512xf32>
    %c0_143 = arith.constant 0 : index
    %c0_144 = arith.constant 0 : index
    %97 = vector.load %arg15[%c0_143, %c0_144] : memref<18x512xf32, #tpu.memory_space<vmem>>, vector<1x512xf32>
    tpu.vector_store %arg15[%c0_143, %c0_144], %96 {strides = array<i32>} : memref<18x512xf32, #tpu.memory_space<vmem>>, vector<1x512xf32>,
    %c0_145 = arith.constant 0 : index
    %c128_146 = arith.constant 128 : index
    %98 = vector.load %arg3[%c0_145, %c128_146] : memref<2x1536xf32, #tpu.memory_space<vmem>>, vector<1x512xf32>
    %c1_147 = arith.constant 1 : index
    %c0_148 = arith.constant 0 : index
    %99 = vector.load %arg15[%c1_147, %c0_148] : memref<18x512xf32, #tpu.memory_space<vmem>>, vector<1x512xf32>
    tpu.vector_store %arg15[%c1_147, %c0_148], %98 {strides = array<i32>} : memref<18x512xf32, #tpu.memory_space<vmem>>, vector<1x512xf32>,
    %c0_149 = arith.constant 0 : index
    %c256_150 = arith.constant 256 : index
    %100 = vector.load %arg3[%c0_149, %c256_150] : memref<2x1536xf32, #tpu.memory_space<vmem>>, vector<1x512xf32>
    %c2_151 = arith.constant 2 : index
    %c0_152 = arith.constant 0 : index
    %101 = vector.load %arg15[%c2_151, %c0_152] : memref<18x512xf32, #tpu.memory_space<vmem>>, vector<1x512xf32>
    tpu.vector_store %arg15[%c2_151, %c0_152], %100 {strides = array<i32>} : memref<18x512xf32, #tpu.memory_space<vmem>>, vector<1x512xf32>,
    %c0_153 = arith.constant 0 : index
    %c384 = arith.constant 384 : index
    %102 = vector.load %arg3[%c0_153, %c384] : memref<2x1536xf32, #tpu.memory_space<vmem>>, vector<1x512xf32>
    %c3_154 = arith.constant 3 : index
    %c0_155 = arith.constant 0 : index
    %103 = vector.load %arg15[%c3_154, %c0_155] : memref<18x512xf32, #tpu.memory_space<vmem>>, vector<1x512xf32>
    tpu.vector_store %arg15[%c3_154, %c0_155], %102 {strides = array<i32>} : memref<18x512xf32, #tpu.memory_space<vmem>>, vector<1x512xf32>,
    %c0_156 = arith.constant 0 : index
    %c512 = arith.constant 512 : index
    %104 = vector.load %arg3[%c0_156, %c512] : memref<2x1536xf32, #tpu.memory_space<vmem>>, vector<1x512xf32>
    %c4_157 = arith.constant 4 : index
    %c0_158 = arith.constant 0 : index
    %105 = vector.load %arg15[%c4_157, %c0_158] : memref<18x512xf32, #tpu.memory_space<vmem>>, vector<1x512xf32>
    tpu.vector_store %arg15[%c4_157, %c0_158], %104 {strides = array<i32>} : memref<18x512xf32, #tpu.memory_space<vmem>>, vector<1x512xf32>,
    %c0_159 = arith.constant 0 : index
    %c640 = arith.constant 640 : index
    %106 = vector.load %arg3[%c0_159, %c640] : memref<2x1536xf32, #tpu.memory_space<vmem>>, vector<1x512xf32>
    %c5_160 = arith.constant 5 : index
    %c0_161 = arith.constant 0 : index
    %107 = vector.load %arg15[%c5_160, %c0_161] : memref<18x512xf32, #tpu.memory_space<vmem>>, vector<1x512xf32>
    tpu.vector_store %arg15[%c5_160, %c0_161], %106 {strides = array<i32>} : memref<18x512xf32, #tpu.memory_space<vmem>>, vector<1x512xf32>,
    %c0_162 = arith.constant 0 : index
    %c768 = arith.constant 768 : index
    %108 = vector.load %arg3[%c0_162, %c768] : memref<2x1536xf32, #tpu.memory_space<vmem>>, vector<1x512xf32>
    %c6_163 = arith.constant 6 : index
    %c0_164 = arith.constant 0 : index
    %109 = vector.load %arg15[%c6_163, %c0_164] : memref<18x512xf32, #tpu.memory_space<vmem>>, vector<1x512xf32>
    tpu.vector_store %arg15[%c6_163, %c0_164], %108 {strides = array<i32>} : memref<18x512xf32, #tpu.memory_space<vmem>>, vector<1x512xf32>,
    %c0_165 = arith.constant 0 : index
    %c896 = arith.constant 896 : index
    %110 = vector.load %arg3[%c0_165, %c896] : memref<2x1536xf32, #tpu.memory_space<vmem>>, vector<1x512xf32>
    %c7_166 = arith.constant 7 : index
    %c0_167 = arith.constant 0 : index
    %111 = vector.load %arg15[%c7_166, %c0_167] : memref<18x512xf32, #tpu.memory_space<vmem>>, vector<1x512xf32>
    tpu.vector_store %arg15[%c7_166, %c0_167], %110 {strides = array<i32>} : memref<18x512xf32, #tpu.memory_space<vmem>>, vector<1x512xf32>,
    %c0_168 = arith.constant 0 : index
    %c1024 = arith.constant 1024 : index
    %112 = vector.load %arg3[%c0_168, %c1024] : memref<2x1536xf32, #tpu.memory_space<vmem>>, vector<1x512xf32>
    %c8_169 = arith.constant 8 : index
    %c0_170 = arith.constant 0 : index
    %113 = vector.load %arg15[%c8_169, %c0_170] : memref<18x512xf32, #tpu.memory_space<vmem>>, vector<1x512xf32>
    tpu.vector_store %arg15[%c8_169, %c0_170], %112 {strides = array<i32>} : memref<18x512xf32, #tpu.memory_space<vmem>>, vector<1x512xf32>,
    %c1_171 = arith.constant 1 : index
    %c0_172 = arith.constant 0 : index
    %114 = vector.load %arg3[%c1_171, %c0_172] : memref<2x1536xf32, #tpu.memory_space<vmem>>, vector<1x512xf32>
    %c9_173 = arith.constant 9 : index
    %c0_174 = arith.constant 0 : index
    %115 = vector.load %arg15[%c9_173, %c0_174] : memref<18x512xf32, #tpu.memory_space<vmem>>, vector<1x512xf32>
    tpu.vector_store %arg15[%c9_173, %c0_174], %114 {strides = array<i32>} : memref<18x512xf32, #tpu.memory_space<vmem>>, vector<1x512xf32>,
    %c1_175 = arith.constant 1 : index
    %c128_176 = arith.constant 128 : index
    %116 = vector.load %arg3[%c1_175, %c128_176] : memref<2x1536xf32, #tpu.memory_space<vmem>>, vector<1x512xf32>
    %c10_177 = arith.constant 10 : index
    %c0_178 = arith.constant 0 : index
    %117 = vector.load %arg15[%c10_177, %c0_178] : memref<18x512xf32, #tpu.memory_space<vmem>>, vector<1x512xf32>
    tpu.vector_store %arg15[%c10_177, %c0_178], %116 {strides = array<i32>} : memref<18x512xf32, #tpu.memory_space<vmem>>, vector<1x512xf32>,
    %c1_179 = arith.constant 1 : index
    %c256_180 = arith.constant 256 : index
    %118 = vector.load %arg3[%c1_179, %c256_180] : memref<2x1536xf32, #tpu.memory_space<vmem>>, vector<1x512xf32>
    %c11_181 = arith.constant 11 : index
    %c0_182 = arith.constant 0 : index
    %119 = vector.load %arg15[%c11_181, %c0_182] : memref<18x512xf32, #tpu.memory_space<vmem>>, vector<1x512xf32>
    tpu.vector_store %arg15[%c11_181, %c0_182], %118 {strides = array<i32>} : memref<18x512xf32, #tpu.memory_space<vmem>>, vector<1x512xf32>,
    %c1_183 = arith.constant 1 : index
    %c384_184 = arith.constant 384 : index
    %120 = vector.load %arg3[%c1_183, %c384_184] : memref<2x1536xf32, #tpu.memory_space<vmem>>, vector<1x512xf32>
    %c12_185 = arith.constant 12 : index
    %c0_186 = arith.constant 0 : index
    %121 = vector.load %arg15[%c12_185, %c0_186] : memref<18x512xf32, #tpu.memory_space<vmem>>, vector<1x512xf32>
    tpu.vector_store %arg15[%c12_185, %c0_186], %120 {strides = array<i32>} : memref<18x512xf32, #tpu.memory_space<vmem>>, vector<1x512xf32>,
    %c1_187 = arith.constant 1 : index
    %c512_188 = arith.constant 512 : index
    %122 = vector.load %arg3[%c1_187, %c512_188] : memref<2x1536xf32, #tpu.memory_space<vmem>>, vector<1x512xf32>
    %c13_189 = arith.constant 13 : index
    %c0_190 = arith.constant 0 : index
    %123 = vector.load %arg15[%c13_189, %c0_190] : memref<18x512xf32, #tpu.memory_space<vmem>>, vector<1x512xf32>
    tpu.vector_store %arg15[%c13_189, %c0_190], %122 {strides = array<i32>} : memref<18x512xf32, #tpu.memory_space<vmem>>, vector<1x512xf32>,
    %c1_191 = arith.constant 1 : index
    %c640_192 = arith.constant 640 : index
    %124 = vector.load %arg3[%c1_191, %c640_192] : memref<2x1536xf32, #tpu.memory_space<vmem>>, vector<1x512xf32>
    %c14_193 = arith.constant 14 : index
    %c0_194 = arith.constant 0 : index
    %125 = vector.load %arg15[%c14_193, %c0_194] : memref<18x512xf32, #tpu.memory_space<vmem>>, vector<1x512xf32>
    tpu.vector_store %arg15[%c14_193, %c0_194], %124 {strides = array<i32>} : memref<18x512xf32, #tpu.memory_space<vmem>>, vector<1x512xf32>,
    %c1_195 = arith.constant 1 : index
    %c768_196 = arith.constant 768 : index
    %126 = vector.load %arg3[%c1_195, %c768_196] : memref<2x1536xf32, #tpu.memory_space<vmem>>, vector<1x512xf32>
    %c15_197 = arith.constant 15 : index
    %c0_198 = arith.constant 0 : index
    %127 = vector.load %arg15[%c15_197, %c0_198] : memref<18x512xf32, #tpu.memory_space<vmem>>, vector<1x512xf32>
    tpu.vector_store %arg15[%c15_197, %c0_198], %126 {strides = array<i32>} : memref<18x512xf32, #tpu.memory_space<vmem>>, vector<1x512xf32>,
    %c1_199 = arith.constant 1 : index
    %c896_200 = arith.constant 896 : index
    %128 = vector.load %arg3[%c1_199, %c896_200] : memref<2x1536xf32, #tpu.memory_space<vmem>>, vector<1x512xf32>
    %c16_201 = arith.constant 16 : index
    %c0_202 = arith.constant 0 : index
    %129 = vector.load %arg15[%c16_201, %c0_202] : memref<18x512xf32, #tpu.memory_space<vmem>>, vector<1x512xf32>
    tpu.vector_store %arg15[%c16_201, %c0_202], %128 {strides = array<i32>} : memref<18x512xf32, #tpu.memory_space<vmem>>, vector<1x512xf32>,
    %c1_203 = arith.constant 1 : index
    %c1024_204 = arith.constant 1024 : index
    %130 = vector.load %arg3[%c1_203, %c1024_204] : memref<2x1536xf32, #tpu.memory_space<vmem>>, vector<1x512xf32>
    %c17_205 = arith.constant 17 : index
    %c0_206 = arith.constant 0 : index
    %131 = vector.load %arg15[%c17_205, %c0_206] : memref<18x512xf32, #tpu.memory_space<vmem>>, vector<1x512xf32>
    tpu.vector_store %arg15[%c17_205, %c0_206], %130 {strides = array<i32>} : memref<18x512xf32, #tpu.memory_space<vmem>>, vector<1x512xf32>,
    %c0_207 = arith.constant 0 : index
    %c0_208 = arith.constant 0 : index
    %132 = vector.load %arg15[%c0_207, %c0_208] : memref<18x512xf32, #tpu.memory_space<vmem>>, vector<18x512xf32>
    %c0_209 = arith.constant 0 : index
    %c0_210 = arith.constant 0 : index
    %133 = vector.load %arg7[%c0_209, %c0_210] : memref<512x640xf32, #tpu.memory_space<vmem>>, vector<512x640xf32>
    %cst_211 = arith.constant dense<0.000000e+00> : vector<18x640xf32>
    %134 = tpu.matmul %132, %133, %cst_211 {dimension_numbers = #tpu.dot_dimension_numbers<[1], [0], [0], [1], [0, 0, 1, 1], [], []>} : vector<18x512xf32>, vector<512x640xf32>, vector<18x640xf32> -> vector<18x640xf32>
    %c0_212 = arith.constant 0 : index
    %c0_213 = arith.constant 0 : index
    %135 = vector.load %arg11[%c0_212, %c0_213] : memref<18x640xf32, #tpu.memory_space<vmem>>, vector<18x640xf32>
    tpu.vector_store %arg11[%c0_212, %c0_213], %134 {strides = array<i32>} : memref<18x640xf32, #tpu.memory_space<vmem>>, vector<18x640xf32>,
    %c0_214 = arith.constant 0 : index
    %c0_215 = arith.constant 0 : index
    %136 = vector.load %arg4[%c0_214, %c0_215] : memref<2x1536xf32, #tpu.memory_space<vmem>>, vector<1x512xf32>
    %c0_216 = arith.constant 0 : index
    %c0_217 = arith.constant 0 : index
    %137 = vector.load %arg16[%c0_216, %c0_217] : memref<18x512xf32, #tpu.memory_space<vmem>>, vector<1x512xf32>
    tpu.vector_store %arg16[%c0_216, %c0_217], %136 {strides = array<i32>} : memref<18x512xf32, #tpu.memory_space<vmem>>, vector<1x512xf32>,
    %c0_218 = arith.constant 0 : index
    %c128_219 = arith.constant 128 : index
    %138 = vector.load %arg4[%c0_218, %c128_219] : memref<2x1536xf32, #tpu.memory_space<vmem>>, vector<1x512xf32>
    %c1_220 = arith.constant 1 : index
    %c0_221 = arith.constant 0 : index
    %139 = vector.load %arg16[%c1_220, %c0_221] : memref<18x512xf32, #tpu.memory_space<vmem>>, vector<1x512xf32>
    tpu.vector_store %arg16[%c1_220, %c0_221], %138 {strides = array<i32>} : memref<18x512xf32, #tpu.memory_space<vmem>>, vector<1x512xf32>,
    %c0_222 = arith.constant 0 : index
    %c256_223 = arith.constant 256 : index
    %140 = vector.load %arg4[%c0_222, %c256_223] : memref<2x1536xf32, #tpu.memory_space<vmem>>, vector<1x512xf32>
    %c2_224 = arith.constant 2 : index
    %c0_225 = arith.constant 0 : index
    %141 = vector.load %arg16[%c2_224, %c0_225] : memref<18x512xf32, #tpu.memory_space<vmem>>, vector<1x512xf32>
    tpu.vector_store %arg16[%c2_224, %c0_225], %140 {strides = array<i32>} : memref<18x512xf32, #tpu.memory_space<vmem>>, vector<1x512xf32>,
    %c0_226 = arith.constant 0 : index
    %c384_227 = arith.constant 384 : index
    %142 = vector.load %arg4[%c0_226, %c384_227] : memref<2x1536xf32, #tpu.memory_space<vmem>>, vector<1x512xf32>
    %c3_228 = arith.constant 3 : index
    %c0_229 = arith.constant 0 : index
    %143 = vector.load %arg16[%c3_228, %c0_229] : memref<18x512xf32, #tpu.memory_space<vmem>>, vector<1x512xf32>
    tpu.vector_store %arg16[%c3_228, %c0_229], %142 {strides = array<i32>} : memref<18x512xf32, #tpu.memory_space<vmem>>, vector<1x512xf32>,
    %c0_230 = arith.constant 0 : index
    %c512_231 = arith.constant 512 : index
    %144 = vector.load %arg4[%c0_230, %c512_231] : memref<2x1536xf32, #tpu.memory_space<vmem>>, vector<1x512xf32>
    %c4_232 = arith.constant 4 : index
    %c0_233 = arith.constant 0 : index
    %145 = vector.load %arg16[%c4_232, %c0_233] : memref<18x512xf32, #tpu.memory_space<vmem>>, vector<1x512xf32>
    tpu.vector_store %arg16[%c4_232, %c0_233], %144 {strides = array<i32>} : memref<18x512xf32, #tpu.memory_space<vmem>>, vector<1x512xf32>,
    %c0_234 = arith.constant 0 : index
    %c640_235 = arith.constant 640 : index
    %146 = vector.load %arg4[%c0_234, %c640_235] : memref<2x1536xf32, #tpu.memory_space<vmem>>, vector<1x512xf32>
    %c5_236 = arith.constant 5 : index
    %c0_237 = arith.constant 0 : index
    %147 = vector.load %arg16[%c5_236, %c0_237] : memref<18x512xf32, #tpu.memory_space<vmem>>, vector<1x512xf32>
    tpu.vector_store %arg16[%c5_236, %c0_237], %146 {strides = array<i32>} : memref<18x512xf32, #tpu.memory_space<vmem>>, vector<1x512xf32>,
    %c0_238 = arith.constant 0 : index
    %c768_239 = arith.constant 768 : index
    %148 = vector.load %arg4[%c0_238, %c768_239] : memref<2x1536xf32, #tpu.memory_space<vmem>>, vector<1x512xf32>
    %c6_240 = arith.constant 6 : index
    %c0_241 = arith.constant 0 : index
    %149 = vector.load %arg16[%c6_240, %c0_241] : memref<18x512xf32, #tpu.memory_space<vmem>>, vector<1x512xf32>
    tpu.vector_store %arg16[%c6_240, %c0_241], %148 {strides = array<i32>} : memref<18x512xf32, #tpu.memory_space<vmem>>, vector<1x512xf32>,
    %c0_242 = arith.constant 0 : index
    %c896_243 = arith.constant 896 : index
    %150 = vector.load %arg4[%c0_242, %c896_243] : memref<2x1536xf32, #tpu.memory_space<vmem>>, vector<1x512xf32>
    %c7_244 = arith.constant 7 : index
    %c0_245 = arith.constant 0 : index
    %151 = vector.load %arg16[%c7_244, %c0_245] : memref<18x512xf32, #tpu.memory_space<vmem>>, vector<1x512xf32>
    tpu.vector_store %arg16[%c7_244, %c0_245], %150 {strides = array<i32>} : memref<18x512xf32, #tpu.memory_space<vmem>>, vector<1x512xf32>,
    %c0_246 = arith.constant 0 : index
    %c1024_247 = arith.constant 1024 : index
    %152 = vector.load %arg4[%c0_246, %c1024_247] : memref<2x1536xf32, #tpu.memory_space<vmem>>, vector<1x512xf32>
    %c8_248 = arith.constant 8 : index
    %c0_249 = arith.constant 0 : index
    %153 = vector.load %arg16[%c8_248, %c0_249] : memref<18x512xf32, #tpu.memory_space<vmem>>, vector<1x512xf32>
    tpu.vector_store %arg16[%c8_248, %c0_249], %152 {strides = array<i32>} : memref<18x512xf32, #tpu.memory_space<vmem>>, vector<1x512xf32>,
    %c1_250 = arith.constant 1 : index
    %c0_251 = arith.constant 0 : index
    %154 = vector.load %arg4[%c1_250, %c0_251] : memref<2x1536xf32, #tpu.memory_space<vmem>>, vector<1x512xf32>
    %c9_252 = arith.constant 9 : index
    %c0_253 = arith.constant 0 : index
    %155 = vector.load %arg16[%c9_252, %c0_253] : memref<18x512xf32, #tpu.memory_space<vmem>>, vector<1x512xf32>
    tpu.vector_store %arg16[%c9_252, %c0_253], %154 {strides = array<i32>} : memref<18x512xf32, #tpu.memory_space<vmem>>, vector<1x512xf32>,
    %c1_254 = arith.constant 1 : index
    %c128_255 = arith.constant 128 : index
    %156 = vector.load %arg4[%c1_254, %c128_255] : memref<2x1536xf32, #tpu.memory_space<vmem>>, vector<1x512xf32>
    %c10_256 = arith.constant 10 : index
    %c0_257 = arith.constant 0 : index
    %157 = vector.load %arg16[%c10_256, %c0_257] : memref<18x512xf32, #tpu.memory_space<vmem>>, vector<1x512xf32>
    tpu.vector_store %arg16[%c10_256, %c0_257], %156 {strides = array<i32>} : memref<18x512xf32, #tpu.memory_space<vmem>>, vector<1x512xf32>,
    %c1_258 = arith.constant 1 : index
    %c256_259 = arith.constant 256 : index
    %158 = vector.load %arg4[%c1_258, %c256_259] : memref<2x1536xf32, #tpu.memory_space<vmem>>, vector<1x512xf32>
    %c11_260 = arith.constant 11 : index
    %c0_261 = arith.constant 0 : index
    %159 = vector.load %arg16[%c11_260, %c0_261] : memref<18x512xf32, #tpu.memory_space<vmem>>, vector<1x512xf32>
    tpu.vector_store %arg16[%c11_260, %c0_261], %158 {strides = array<i32>} : memref<18x512xf32, #tpu.memory_space<vmem>>, vector<1x512xf32>,
    %c1_262 = arith.constant 1 : index
    %c384_263 = arith.constant 384 : index
    %160 = vector.load %arg4[%c1_262, %c384_263] : memref<2x1536xf32, #tpu.memory_space<vmem>>, vector<1x512xf32>
    %c12_264 = arith.constant 12 : index
    %c0_265 = arith.constant 0 : index
    %161 = vector.load %arg16[%c12_264, %c0_265] : memref<18x512xf32, #tpu.memory_space<vmem>>, vector<1x512xf32>
    tpu.vector_store %arg16[%c12_264, %c0_265], %160 {strides = array<i32>} : memref<18x512xf32, #tpu.memory_space<vmem>>, vector<1x512xf32>,
    %c1_266 = arith.constant 1 : index
    %c512_267 = arith.constant 512 : index
    %162 = vector.load %arg4[%c1_266, %c512_267] : memref<2x1536xf32, #tpu.memory_space<vmem>>, vector<1x512xf32>
    %c13_268 = arith.constant 13 : index
    %c0_269 = arith.constant 0 : index
    %163 = vector.load %arg16[%c13_268, %c0_269] : memref<18x512xf32, #tpu.memory_space<vmem>>, vector<1x512xf32>
    tpu.vector_store %arg16[%c13_268, %c0_269], %162 {strides = array<i32>} : memref<18x512xf32, #tpu.memory_space<vmem>>, vector<1x512xf32>,
    %c1_270 = arith.constant 1 : index
    %c640_271 = arith.constant 640 : index
    %164 = vector.load %arg4[%c1_270, %c640_271] : memref<2x1536xf32, #tpu.memory_space<vmem>>, vector<1x512xf32>
    %c14_272 = arith.constant 14 : index
    %c0_273 = arith.constant 0 : index
    %165 = vector.load %arg16[%c14_272, %c0_273] : memref<18x512xf32, #tpu.memory_space<vmem>>, vector<1x512xf32>
    tpu.vector_store %arg16[%c14_272, %c0_273], %164 {strides = array<i32>} : memref<18x512xf32, #tpu.memory_space<vmem>>, vector<1x512xf32>,
    %c1_274 = arith.constant 1 : index
    %c768_275 = arith.constant 768 : index
    %166 = vector.load %arg4[%c1_274, %c768_275] : memref<2x1536xf32, #tpu.memory_space<vmem>>, vector<1x512xf32>
    %c15_276 = arith.constant 15 : index
    %c0_277 = arith.constant 0 : index
    %167 = vector.load %arg16[%c15_276, %c0_277] : memref<18x512xf32, #tpu.memory_space<vmem>>, vector<1x512xf32>
    tpu.vector_store %arg16[%c15_276, %c0_277], %166 {strides = array<i32>} : memref<18x512xf32, #tpu.memory_space<vmem>>, vector<1x512xf32>,
    %c1_278 = arith.constant 1 : index
    %c896_279 = arith.constant 896 : index
    %168 = vector.load %arg4[%c1_278, %c896_279] : memref<2x1536xf32, #tpu.memory_space<vmem>>, vector<1x512xf32>
    %c16_280 = arith.constant 16 : index
    %c0_281 = arith.constant 0 : index
    %169 = vector.load %arg16[%c16_280, %c0_281] : memref<18x512xf32, #tpu.memory_space<vmem>>, vector<1x512xf32>
    tpu.vector_store %arg16[%c16_280, %c0_281], %168 {strides = array<i32>} : memref<18x512xf32, #tpu.memory_space<vmem>>, vector<1x512xf32>,
    %c1_282 = arith.constant 1 : index
    %c1024_283 = arith.constant 1024 : index
    %170 = vector.load %arg4[%c1_282, %c1024_283] : memref<2x1536xf32, #tpu.memory_space<vmem>>, vector<1x512xf32>
    %c17_284 = arith.constant 17 : index
    %c0_285 = arith.constant 0 : index
    %171 = vector.load %arg16[%c17_284, %c0_285] : memref<18x512xf32, #tpu.memory_space<vmem>>, vector<1x512xf32>
    tpu.vector_store %arg16[%c17_284, %c0_285], %170 {strides = array<i32>} : memref<18x512xf32, #tpu.memory_space<vmem>>, vector<1x512xf32>,
    %c0_286 = arith.constant 0 : index
    %c0_287 = arith.constant 0 : index
    %172 = vector.load %arg16[%c0_286, %c0_287] : memref<18x512xf32, #tpu.memory_space<vmem>>, vector<18x512xf32>
    %c0_288 = arith.constant 0 : index
    %c0_289 = arith.constant 0 : index
    %173 = vector.load %arg8[%c0_288, %c0_289] : memref<512x1024xf32, #tpu.memory_space<vmem>>, vector<512x1024xf32>
    %cst_290 = arith.constant dense<0.000000e+00> : vector<18x1024xf32>
    %174 = tpu.matmul %172, %173, %cst_290 {dimension_numbers = #tpu.dot_dimension_numbers<[1], [0], [0], [1], [0, 0, 1, 1], [], []>} : vector<18x512xf32>, vector<512x1024xf32>, vector<18x1024xf32> -> vector<18x1024xf32>
    %c0_291 = arith.constant 0 : index
    %c0_292 = arith.constant 0 : index
    %175 = vector.load %arg12[%c0_291, %c0_292] : memref<18x1024xf32, #tpu.memory_space<vmem>>, vector<18x1024xf32>
    tpu.vector_store %arg12[%c0_291, %c0_292], %174 {strides = array<i32>} : memref<18x1024xf32, #tpu.memory_space<vmem>>, vector<18x1024xf32>,
    return
  }
  func.func @transform_0(%arg0: i32) -> (i32, i32) {
    %c0_i32 = arith.constant 0 : i32
    %c0_i32_0 = arith.constant 0 : i32
    %c0_i32_1 = arith.constant 0 : i32
    return %c0_i32, %c0_i32_0 : i32, i32
  }
  func.func @transform_1(%arg0: i32) -> (i32, i32) {
    %c0_i32 = arith.constant 0 : i32
    %c0_i32_0 = arith.constant 0 : i32
    %c0_i32_1 = arith.constant 0 : i32
    return %c0_i32, %c0_i32_0 : i32, i32
  }
  func.func @transform_2(%arg0: i32) -> (i32, i32) {
    %c0_i32 = arith.constant 0 : i32
    %c0_i32_0 = arith.constant 0 : i32
    %c0_i32_1 = arith.constant 0 : i32
    return %c0_i32, %c0_i32_0 : i32, i32
  }
  func.func @transform_3(%arg0: i32) -> (i32, i32) {
    %c0_i32 = arith.constant 0 : i32
    %c0_i32_0 = arith.constant 0 : i32
    %c0_i32_1 = arith.constant 0 : i32
    return %c0_i32, %c0_i32_0 : i32, i32
  }
  func.func @transform_4(%arg0: i32) -> (i32, i32) {
    %c0_i32 = arith.constant 0 : i32
    %c0_i32_0 = arith.constant 0 : i32
    %c0_i32_1 = arith.constant 0 : i32
    return %c0_i32, %c0_i32_0 : i32, i32
  }
  func.func @transform_5(%arg0: i32) -> (i32, i32) {
    %c0_i32 = arith.constant 0 : i32
    %c0_i32_0 = arith.constant 0 : i32
    %c0_i32_1 = arith.constant 0 : i32
    return %c0_i32, %c0_i32_0 : i32, i32
  }
  func.func @transform_6(%arg0: i32) -> (i32, i32) {
    %c0_i32 = arith.constant 0 : i32
    %c0_i32_0 = arith.constant 0 : i32
    %c0_i32_1 = arith.constant 0 : i32
    return %c0_i32, %c0_i32_0 : i32, i32
  }
  func.func @transform_7(%arg0: i32) -> (i32, i32) {
    %c0_i32 = arith.constant 0 : i32
    %c0_i32_0 = arith.constant 0 : i32
    %c0_i32_1 = arith.constant 0 : i32
    return %c0_i32, %c0_i32_0 : i32, i32
  }
  func.func @transform_8(%arg0: i32) -> (i32, i32) {
    %c0_i32 = arith.constant 0 : i32
    %c0_i32_0 = arith.constant 0 : i32
    %c0_i32_1 = arith.constant 0 : i32
    return %c0_i32, %c0_i32_0 : i32, i32
  }
  func.func @transform_9(%arg0: i32) -> (i32, i32) {
    %c0_i32 = arith.constant 0 : i32
    %c0_i32_0 = arith.constant 0 : i32
    %c0_i32_1 = arith.constant 0 : i32
    return %c0_i32, %c0_i32_0 : i32, i32
  }
  func.func @transform_10(%arg0: i32) -> (i32, i32) {
    %c0_i32 = arith.constant 0 : i32
    %c0_i32_0 = arith.constant 0 : i32
    %c0_i32_1 = arith.constant 0 : i32
    return %c0_i32, %c0_i32_0 : i32, i32
  }
  func.func @transform_11(%arg0: i32) -> (i32, i32) {
    %c0_i32 = arith.constant 0 : i32
    %c0_i32_0 = arith.constant 0 : i32
    %c0_i32_1 = arith.constant 0 : i32
    return %c0_i32, %c0_i32_0 : i32, i32
  }
}

</mosaic_0001>

<bundles_post_ra>
// kernel: custom-call.3
= control target key start
LH: loop header
LB: loop body
LE: loop exit
PB: predicated region body
PF: predicated region fallthrough
CT: control target
= control target key end

     0   :  { %s412_s0 = inlined_call_operand.vmem [shape: f32[2,512,9], index: 0, kind: input, shape index: {}]   ;;  %s413_s2 = inlined_call_operand.vmem [shape: c64[2,512,9], index: 2, kind: output, shape index: {}]   ;;  %s414_s1 = inlined_call_operand.vmem [shape: f32[2,512,9], index: 1, kind: input, shape index: {}]  }
   0x1   :  { %v5_v0 = vld [vmem:[%s412_s0] sm:$0xff]  ;;  %v144_v1 = vld [vmem:[%s412_s0 + $0x8] sm:$0xff]  ;;  %v146_v2 = vld [vmem:[%s412_s0 + $0x10] sm:$0xff] }
   0x2   :  { %6 = vst [vmem:[%s413_s2] sm:$0xff] %v5_v0  ;;  %145 = vst [vmem:[%s413_s2 + $0x8] sm:$0xff] %v144_v1  ;;  %v148_v3 = vld [vmem:[%s412_s0 + $0x18] sm:$0xff]  ;;  %v150_v4 = vld [vmem:[%s412_s0 + $0x20] sm:$0xff] }
   0x3   :  { %147 = vst [vmem:[%s413_s2 + $0x10] sm:$0xff] %v146_v2  ;;  %v152_v5 = vld [vmem:[%s412_s0 + $0x28] sm:$0xff]  ;;  %149 = vst [vmem:[%s413_s2 + $0x18] sm:$0xff] %v148_v3  ;;  %v154_v6 = vld [vmem:[%s412_s0 + $0x30] sm:$0xff] }
   0x4   :  { %151 = vst [vmem:[%s413_s2 + $0x20] sm:$0xff] %v150_v4  ;;  %153 = vst [vmem:[%s413_s2 + $0x28] sm:$0xff] %v152_v5  ;;  %v156_v7 = vld [vmem:[%s412_s0 + $0x38] sm:$0xff]  ;;  %v158_v8 = vld [vmem:[%s412_s0 + $0x40] sm:$0xff] }
   0x5   :  { %155 = vst [vmem:[%s413_s2 + $0x30] sm:$0xff] %v154_v6  ;;  %157 = vst [vmem:[%s413_s2 + $0x38] sm:$0xff] %v156_v7  ;;  %v160_v9 = vld [vmem:[%s412_s0 + $0x48] sm:$0xff]  ;;  %v162_v10 = vld [vmem:[%s412_s0 + $0x50] sm:$0xff] }
   0x6   :  { %159 = vst [vmem:[%s413_s2 + $0x40] sm:$0xff] %v158_v8  ;;  %v164_v11 = vld [vmem:[%s412_s0 + $0x58] sm:$0xff]  ;;  %161 = vst [vmem:[%s413_s2 + $0x48] sm:$0xff] %v160_v9  ;;  %v166_v12 = vld [vmem:[%s412_s0 + $0x60] sm:$0xff] }
   0x7   :  { %163 = vst [vmem:[%s413_s2 + $0x50] sm:$0xff] %v162_v10  ;;  %165 = vst [vmem:[%s413_s2 + $0x58] sm:$0xff] %v164_v11  ;;  %v168_v13 = vld [vmem:[%s412_s0 + $0x68] sm:$0xff]  ;;  %v170_v14 = vld [vmem:[%s412_s0 + $0x70] sm:$0xff] }
   0x8   :  { %167 = vst [vmem:[%s413_s2 + $0x60] sm:$0xff] %v166_v12  ;;  %169 = vst [vmem:[%s413_s2 + $0x68] sm:$0xff] %v168_v13  ;;  %v172_v15 = vld [vmem:[%s412_s0 + $0x78] sm:$0xff]  ;;  %v67_v16 = vld [vmem:[%s414_s1] sm:$0xff] }
   0x9   :  { %171 = vst [vmem:[%s413_s2 + $0x70] sm:$0xff] %v170_v14  ;;  %v175_v17 = vld [vmem:[%s414_s1 + $0x8] sm:$0xff]  ;;  %173 = vst [vmem:[%s413_s2 + $0x78] sm:$0xff] %v172_v15  ;;  %v177_v18 = vld [vmem:[%s414_s1 + $0x10] sm:$0xff] }
   0xa   :  { %174 = vst [vmem:[%s413_s2 + $0x80] sm:$0xff] %v67_v16  ;;  %176 = vst [vmem:[%s413_s2 + $0x88] sm:$0xff] %v175_v17  ;;  %v179_v19 = vld [vmem:[%s414_s1 + $0x18] sm:$0xff]  ;;  %v181_v20 = vld [vmem:[%s414_s1 + $0x20] sm:$0xff] }
   0xb   :  { %178 = vst [vmem:[%s413_s2 + $0x90] sm:$0xff] %v177_v18  ;;  %180 = vst [vmem:[%s413_s2 + $0x98] sm:$0xff] %v179_v19  ;;  %v183_v21 = vld [vmem:[%s414_s1 + $0x28] sm:$0xff]  ;;  %v185_v22 = vld [vmem:[%s414_s1 + $0x30] sm:$0xff] }
   0xc   :  { %182 = vst [vmem:[%s413_s2 + $0xa0] sm:$0xff] %v181_v20  ;;  %v187_v23 = vld [vmem:[%s414_s1 + $0x38] sm:$0xff]  ;;  %184 = vst [vmem:[%s413_s2 + $0xa8] sm:$0xff] %v183_v21  ;;  %v189_v24 = vld [vmem:[%s414_s1 + $0x40] sm:$0xff] }
   0xd   :  { %186 = vst [vmem:[%s413_s2 + $0xb0] sm:$0xff] %v185_v22  ;;  %188 = vst [vmem:[%s413_s2 + $0xb8] sm:$0xff] %v187_v23  ;;  %v191_v25 = vld [vmem:[%s414_s1 + $0x48] sm:$0xff]  ;;  %v193_v26 = vld [vmem:[%s414_s1 + $0x50] sm:$0xff] }
   0xe   :  { %190 = vst [vmem:[%s413_s2 + $0xc0] sm:$0xff] %v189_v24  ;;  %192 = vst [vmem:[%s413_s2 + $0xc8] sm:$0xff] %v191_v25  ;;  %v195_v27 = vld [vmem:[%s414_s1 + $0x58] sm:$0xff]  ;;  %v197_v28 = vld [vmem:[%s414_s1 + $0x60] sm:$0xff] }
   0xf   :  { %194 = vst [vmem:[%s413_s2 + $0xd0] sm:$0xff] %v193_v26  ;;  %v199_v29 = vld [vmem:[%s414_s1 + $0x68] sm:$0xff]  ;;  %196 = vst [vmem:[%s413_s2 + $0xd8] sm:$0xff] %v195_v27  ;;  %v201_v30 = vld [vmem:[%s414_s1 + $0x70] sm:$0xff] }
  0x10   :  { %198 = vst [vmem:[%s413_s2 + $0xe0] sm:$0xff] %v197_v28  ;;  %200 = vst [vmem:[%s413_s2 + $0xe8] sm:$0xff] %v199_v29  ;;  %v203_v31 = vld [vmem:[%s414_s1 + $0x78] sm:$0xff] }
  0x11   :  { %202 = vst [vmem:[%s413_s2 + $0xf0] sm:$0xff] %v201_v30  ;;  %204 = vst [vmem:[%s413_s2 + $0xf8] sm:$0xff] %v203_v31 }

// kernel: custom-call.2
= control target key start
LH: loop header
LB: loop body
LE: loop exit
PB: predicated region body
PF: predicated region fallthrough
CT: control target
= control target key end

     0   :  { %s312_s0 = inlined_call_operand.vmem [shape: f32[2,257,9], index: 0, kind: input, shape index: {}]   ;;  %s313_s2 = inlined_call_operand.vmem [shape: c64[2,257,9], index: 2, kind: output, shape index: {}]   ;;  %s314_s1 = inlined_call_operand.vmem [shape: f32[2,257,9], index: 1, kind: input, shape index: {}]  }
   0x1   :  { %v5_v0 = vld [vmem:[%s312_s0] sm:$0xff]  ;;  %v108_v1 = vld [vmem:[%s312_s0 + $0x8] sm:$0xff]  ;;  %v110_v2 = vld [vmem:[%s312_s0 + $0x10] sm:$0xff] }
   0x2   :  { %6 = vst [vmem:[%s313_s2] sm:$0xff] %v5_v0  ;;  %109 = vst [vmem:[%s313_s2 + $0x8] sm:$0xff] %v108_v1  ;;  %v112_v3 = vld [vmem:[%s312_s0 + $0x18] sm:$0xff]  ;;  %v114_v4 = vld [vmem:[%s312_s0 + $0x20] sm:$0xff] }
   0x3   :  { %111 = vst [vmem:[%s313_s2 + $0x10] sm:$0xff] %v110_v2  ;;  %v116_v5 = vld [vmem:[%s312_s0 + $0x28] sm:$0xff]  ;;  %113 = vst [vmem:[%s313_s2 + $0x18] sm:$0xff] %v112_v3  ;;  %v118_v6 = vld [vmem:[%s312_s0 + $0x30] sm:$0xff] }
   0x4   :  { %115 = vst [vmem:[%s313_s2 + $0x20] sm:$0xff] %v114_v4  ;;  %117 = vst [vmem:[%s313_s2 + $0x28] sm:$0xff] %v116_v5  ;;  %v120_v7 = vld [vmem:[%s312_s0 + $0x38] sm:$0xff]  ;;  %v122_v8 = vld [vmem:[%s312_s0 + $0x40] sm:$0xff] }
   0x5   :  { %119 = vst [vmem:[%s313_s2 + $0x30] sm:$0xff] %v118_v6  ;;  %121 = vst [vmem:[%s313_s2 + $0x38] sm:$0xff] %v120_v7  ;;  %v124_v9 = vld [vmem:[%s312_s0 + $0x48] sm:$0xff]  ;;  %v126_v10 = vld [vmem:[%s312_s0 + $0x50] sm:$0xff] }
   0x6   :  { %123 = vst [vmem:[%s313_s2 + $0x40] sm:$0xff] %v122_v8  ;;  %v128_v11 = vld [vmem:[%s312_s0 + $0x58] sm:$0xff]  ;;  %125 = vst [vmem:[%s313_s2 + $0x48] sm:$0xff] %v124_v9  ;;  %v51_v12 = vld [vmem:[%s314_s1] sm:$0xff] }
   0x7   :  { %127 = vst [vmem:[%s313_s2 + $0x50] sm:$0xff] %v126_v10  ;;  %129 = vst [vmem:[%s313_s2 + $0x58] sm:$0xff] %v128_v11  ;;  %v131_v13 = vld [vmem:[%s314_s1 + $0x8] sm:$0xff]  ;;  %v133_v14 = vld [vmem:[%s314_s1 + $0x10] sm:$0xff] }
   0x8   :  { %130 = vst [vmem:[%s313_s2 + $0x60] sm:$0xff] %v51_v12  ;;  %132 = vst [vmem:[%s313_s2 + $0x68] sm:$0xff] %v131_v13  ;;  %v135_v15 = vld [vmem:[%s314_s1 + $0x18] sm:$0xff]  ;;  %v137_v16 = vld [vmem:[%s314_s1 + $0x20] sm:$0xff] }
   0x9   :  { %134 = vst [vmem:[%s313_s2 + $0x70] sm:$0xff] %v133_v14  ;;  %v139_v17 = vld [vmem:[%s314_s1 + $0x28] sm:$0xff]  ;;  %136 = vst [vmem:[%s313_s2 + $0x78] sm:$0xff] %v135_v15  ;;  %v141_v18 = vld [vmem:[%s314_s1 + $0x30] sm:$0xff] }
   0xa   :  { %138 = vst [vmem:[%s313_s2 + $0x80] sm:$0xff] %v137_v16  ;;  %140 = vst [vmem:[%s313_s2 + $0x88] sm:$0xff] %v139_v17  ;;  %v143_v19 = vld [vmem:[%s314_s1 + $0x38] sm:$0xff]  ;;  %v145_v20 = vld [vmem:[%s314_s1 + $0x40] sm:$0xff] }
   0xb   :  { %142 = vst [vmem:[%s313_s2 + $0x90] sm:$0xff] %v141_v18  ;;  %144 = vst [vmem:[%s313_s2 + $0x98] sm:$0xff] %v143_v19  ;;  %v147_v21 = vld [vmem:[%s314_s1 + $0x48] sm:$0xff]  ;;  %v149_v22 = vld [vmem:[%s314_s1 + $0x50] sm:$0xff] }
   0xc   :  { %146 = vst [vmem:[%s313_s2 + $0xa0] sm:$0xff] %v145_v20  ;;  %v151_v23 = vld [vmem:[%s314_s1 + $0x58] sm:$0xff]  ;;  %148 = vst [vmem:[%s313_s2 + $0xa8] sm:$0xff] %v147_v21 }
   0xd   :  { %150 = vst [vmem:[%s313_s2 + $0xb0] sm:$0xff] %v149_v22  ;;  %152 = vst [vmem:[%s313_s2 + $0xb8] sm:$0xff] %v151_v23 }

// kernel: custom-call.1
= control target key start
LH: loop header
LB: loop body
LE: loop exit
PB: predicated region body
PF: predicated region fallthrough
CT: control target
= control target key end

     0   :  { %s62_s0 = inlined_call_operand.vmem [shape: f32[2,65,5], index: 0, kind: input, shape index: {}]   ;;  %s63_s1 = inlined_call_operand.vmem [shape: f32[2,65,5], index: 1, kind: input, shape index: {}]   ;;  %s64_s2 = inlined_call_operand.vmem [shape: c64[2,65,5], index: 2, kind: output, shape index: {}]  }
   0x1   :  { %v5_v0 = vld [vmem:[%s62_s0] sm:$0xff]  ;;  %v18_v1 = vld [vmem:[%s62_s0 + $0x8] sm:$0xff] }
   0x2   :  { %v11_v2 = vld [vmem:[%s63_s1] sm:$0xff]  ;;  %6 = vst [vmem:[%s64_s2] sm:$0xff] %v5_v0  ;;  %19 = vst [vmem:[%s64_s2 + $0x8] sm:$0xff] %v18_v1  ;;  %v21_v3 = vld [vmem:[%s63_s1 + $0x8] sm:$0xff] }
   0x3   :  { %20 = vst [vmem:[%s64_s2 + $0x10] sm:$0xff] %v11_v2  ;;  %22 = vst [vmem:[%s64_s2 + $0x18] sm:$0xff] %v21_v3 }

// kernel: custom-call
= control target key start
LH: loop header
LB: loop body
LE: loop exit
PB: predicated region body
PF: predicated region fallthrough
CT: control target
= control target key end

     0   :  { %s162_s0 = inlined_call_operand.vmem [shape: f32[2,33,17], index: 0, kind: input, shape index: {}]   ;;  %s163_s1 = inlined_call_operand.vmem [shape: f32[2,33,17], index: 1, kind: input, shape index: {}]   ;;  %s164_s2 = inlined_call_operand.vmem [shape: c64[2,33,17], index: 2, kind: output, shape index: {}]  }
   0x1   :  { %v5_v0 = vld [vmem:[%s162_s0] sm:$0xff]  ;;  %v54_v1 = vld [vmem:[%s162_s0 + $0x8] sm:$0xff]  ;;  %v56_v2 = vld [vmem:[%s162_s0 + $0x10] sm:$0xff] }
   0x2   :  { %6 = vst [vmem:[%s164_s2] sm:$0xff] %v5_v0  ;;  %55 = vst [vmem:[%s164_s2 + $0x8] sm:$0xff] %v54_v1  ;;  %v58_v3 = vld [vmem:[%s162_s0 + $0x18] sm:$0xff]  ;;  %v60_v4 = vld [vmem:[%s162_s0 + $0x20] sm:$0xff] }
   0x3   :  { %57 = vst [vmem:[%s164_s2 + $0x10] sm:$0xff] %v56_v2  ;;  %v62_v5 = vld [vmem:[%s162_s0 + $0x28] sm:$0xff]  ;;  %59 = vst [vmem:[%s164_s2 + $0x18] sm:$0xff] %v58_v3  ;;  %v27_v6 = vld [vmem:[%s163_s1] sm:$0xff] }
   0x4   :  { %61 = vst [vmem:[%s164_s2 + $0x20] sm:$0xff] %v60_v4  ;;  %63 = vst [vmem:[%s164_s2 + $0x28] sm:$0xff] %v62_v5  ;;  %v65_v7 = vld [vmem:[%s163_s1 + $0x8] sm:$0xff]  ;;  %v67_v8 = vld [vmem:[%s163_s1 + $0x10] sm:$0xff] }
   0x5   :  { %64 = vst [vmem:[%s164_s2 + $0x30] sm:$0xff] %v27_v6  ;;  %66 = vst [vmem:[%s164_s2 + $0x38] sm:$0xff] %v65_v7  ;;  %v69_v9 = vld [vmem:[%s163_s1 + $0x18] sm:$0xff]  ;;  %v71_v10 = vld [vmem:[%s163_s1 + $0x20] sm:$0xff] }
   0x6   :  { %68 = vst [vmem:[%s164_s2 + $0x40] sm:$0xff] %v67_v8  ;;  %v73_v11 = vld [vmem:[%s163_s1 + $0x28] sm:$0xff]  ;;  %70 = vst [vmem:[%s164_s2 + $0x48] sm:$0xff] %v69_v9 }
   0x7   :  { %72 = vst [vmem:[%s164_s2 + $0x50] sm:$0xff] %v71_v10  ;;  %74 = vst [vmem:[%s164_s2 + $0x58] sm:$0xff] %v73_v11 }

// kernel: forward.1
= control target key start
LH: loop header
LB: loop body
LE: loop exit
PB: predicated region body
PF: predicated region fallthrough
CT: control target
= control target key end

     0   :  { %17 = vsyncpa [#allocation7], 0  ;;  %s5100_s0 = inlined_call_operand.hbm [shape: f32[2,320], index: 0, kind: input, shape index: {}]   ;;  %s5101_s1 = inlined_call_operand.hbm [shape: f32[2,256], index: 1, kind: input, shape index: {}]   ;;  %s5102_s2 = inlined_call_operand.hbm [shape: f32[2,1536], index: 2, kind: input, shape index: {}]   ;;  %s5103_s3 = inlined_call_operand.hbm [shape: f32[2,1536], index: 3, kind: input, shape index: {}]   ;;  %s5104_s4 = inlined_call_operand.hbm [shape: f32[64,128], index: 4, kind: input, shape index: {}]   ;;  %s5105_s5 = inlined_call_operand.hbm [shape: f32[128,256], index: 5, kind: input, shape index: {}]   ;;  %s5106_s6 = inlined_call_operand.hbm [shape: f32[512,640], index: 6, kind: input, shape index: {}]   ;;  %s5107_s7 = inlined_call_operand.hbm [shape: f32[512,1024], index: 7, kind: input, shape index: {}]   ;;  %s5108_s8 = inlined_call_operand.hbm [shape: f32[34,128], index: 8, kind: output, shape index: {0}]   ;;  %s5109_s9 = inlined_call_operand.hbm [shape: f32[10,256], index: 9, kind: output, shape index: {1}]   ;;  %s5110_s10 = inlined_call_operand.hbm [shape: f32[18,640], index: 10, kind: output, shape index: {2}]   ;;  %s5111_s11 = inlined_call_operand.hbm [shape: f32[18,1024], index: 11, kind: output, shape index: {3}]  }
   0x1   :  { %18 = vsyncpa [#allocation10], 0 }
   0x2   :  { %19 = vsyncpa [#allocation13], 0 }
   0x3   :  { %20 = vsyncpa [#allocation16], 0 }
   0x4   :  { %21 = vsyncpa [#allocation19], 0 }
   0x5   :  { %22 = vsyncpa [#allocation8], 0 }
   0x6   :  { %23 = vsyncpa [#allocation22], 0 }
   0x7   :  { %24 = vsyncpa [#allocation25], 0  ;;  %s4545_s17 = smov [#allocation9]   ;;  %s4546_s19 = smov [#allocation12]  }
   0x8   :  { %s41_s18 = sshll.u32 %s4545_s17, 4  ;;  %s61_s20 = sshll.u32 %s4546_s19, 4  ;;  %s42_s18 = int_to_ptr.vmem [resolvable:$true] %s41_s18  ;;  %s62_s20 = int_to_ptr.vmem [resolvable:$true] %s61_s20 }
   0x9   :  { %s4265_s23 = scalar_lea.hbm %s5101_s1, 64 }
   0xa   :  { %p4266_p0 = scmp.ne.s32.totalorder %s5101_s1, %s4265_s23  ;;  %p4269_p1 = scmp.lt.u32.totalorder %s4265_s23, %s5101_s1 }
   0xc   :  { %p4271_p2 = pnand %p4269_p1, %p4266_p0 }
   0xe   :  { %4274 = shalt.err (!%p4271_p2)
}
   0xf   :  { %s4275_s28 = scalar_lea.vmem %s42_s18, 64  ;;  %p4280_p4 = scmp.lt.s32.totalorder %s42_s18, %s42_s18 }
  0x10   :  { %p4276_p3 = scmp.ne.s32.totalorder %s42_s18, %s4275_s28  ;;  %p4281_p5 = scmp.lt.s32.totalorder %s4275_s28, %s4275_s28 }
  0x12   :  { %p4282_p6 = por %p4281_p5, %p4280_p4 }
  0x14   :  { %p4283_p7 = pnand %p4282_p6, %p4276_p3 }
  0x16   :  { %4286 = shalt.err (!%p4283_p7)
}
  0x17   :  { %44 = dma.hbm_to_vmem [thread:$0]  %s5101_s1, 64, %s42_s18, [#allocation10]  }
  0x18   :  { %s4287_s14 = scalar_lea.hbm %s5103_s3, 384 }
  0x19   :  { %p4288_p8 = scmp.ne.s32.totalorder %s5103_s3, %s4287_s14  ;;  %p4291_p9 = scmp.lt.u32.totalorder %s4287_s14, %s5103_s3 }
  0x1b   :  { %p4293_p10 = pnand %p4291_p9, %p4288_p8 }
  0x1d   :  { %4296 = shalt.err (!%p4293_p10)
}
  0x1e   :  { %s4297_s21 = scalar_lea.vmem %s62_s20, 384  ;;  %p4302_p12 = scmp.lt.s32.totalorder %s62_s20, %s62_s20 }
  0x1f   :  { %p4298_p11 = scmp.ne.s32.totalorder %s62_s20, %s4297_s21  ;;  %p4303_p13 = scmp.lt.s32.totalorder %s4297_s21, %s4297_s21 }
  0x21   :  { %p4304_p0 = por %p4303_p13, %p4302_p12 }
  0x23   :  { %p4305_p1 = pnand %p4304_p0, %p4298_p11 }
  0x25   :  { %4308 = shalt.err (!%p4305_p1)
}
  0x26   :  { %64 = dma.hbm_to_vmem [thread:$0]  %s5103_s3, 384, %s62_s20, [#allocation13]  }
  0x27   :  { %s4547_s22 = smov [#allocation15]   ;;  %s4309_s26 = scalar_lea.hbm %s5105_s5, 4096 }
  0x28   :  { %s82_s23 = sshll.u32 %s4547_s22, 4  ;;  %p4310_p2 = scmp.ne.s32.totalorder %s5105_s5, %s4309_s26  ;;  %s83_s23 = int_to_ptr.vmem [resolvable:$true] %s82_s23 }
  0x29   :  { %p4313_p3 = scmp.lt.u32.totalorder %s4309_s26, %s5105_s5 }
  0x2b   :  { %p4315_p4 = pnand %p4313_p3, %p4310_p2 }
  0x2d   :  { %4318 = shalt.err (!%p4315_p4)
}
  0x2e   :  { %s4319_s12 = scalar_lea.vmem %s83_s23, 4096  ;;  %p4324_p6 = scmp.lt.s32.totalorder %s83_s23, %s83_s23 }
  0x2f   :  { %p4320_p5 = scmp.ne.s32.totalorder %s83_s23, %s4319_s12  ;;  %p4325_p7 = scmp.lt.s32.totalorder %s4319_s12, %s4319_s12 }
  0x31   :  { %p4326_p8 = por %p4325_p7, %p4324_p6 }
  0x33   :  { %p4327_p9 = pnand %p4326_p8, %p4320_p5 }
  0x35   :  { %4330 = shalt.err (!%p4327_p9)
}
  0x36   :  { %s4548_s3 = smov 256   ;;  %s4549_s20 = smov 16  }
  0x37   :  { %88 = dma.hbm_to_vmem [thread:$0]  %s5105_s5, 4096, %s83_s23, [#allocation16], %s4548_s3, %s4548_s3, %s4549_s20  }
  0x38   :  { %s4550_s15 = smov [#allocation6]   ;;  %s4551_s17 = smov [#allocation11]  }
  0x39   :  { %s31_s16 = sshll.u32 %s4550_s15, 4  ;;  %s51_s19 = sshll.u32 %s4551_s17, 4  ;;  %s32_s16 = int_to_ptr.vmem [resolvable:$true] %s31_s16  ;;  %s52_s19 = int_to_ptr.vmem [resolvable:$true] %s51_s19 }
  0x3a   :  { %s4331_s18 = scalar_lea.hbm %s5100_s0, 96 }
  0x3b   :  { %p4332_p10 = scmp.ne.s32.totalorder %s5100_s0, %s4331_s18  ;;  %p4335_p11 = scmp.lt.u32.totalorder %s4331_s18, %s5100_s0 }
  0x3d   :  { %p4337_p12 = pnand %p4335_p11, %p4332_p10 }
  0x3f   :  { %4340 = shalt.err (!%p4337_p12)
}
  0x40   :  { %s4341_s5 = scalar_lea.vmem %s32_s16, 96  ;;  %p4346_p0 = scmp.lt.s32.totalorder %s32_s16, %s32_s16 }
  0x41   :  { %p4342_p13 = scmp.ne.s32.totalorder %s32_s16, %s4341_s5  ;;  %p4347_p1 = scmp.lt.s32.totalorder %s4341_s5, %s4341_s5 }
  0x43   :  { %p4348_p2 = por %p4347_p1, %p4346_p0 }
  0x45   :  { %p4349_p3 = pnand %p4348_p2, %p4342_p13 }
  0x47   :  { %4352 = shalt.err (!%p4349_p3)
}
  0x48   :  { %34 = dma.hbm_to_vmem [thread:$0]  %s5100_s0, 96, %s32_s16, [#allocation7]  }
  0x49   :  { %s4353_s30 = scalar_lea.hbm %s5102_s2, 384 }
  0x4a   :  { %p4354_p4 = scmp.ne.s32.totalorder %s5102_s2, %s4353_s30  ;;  %p4357_p5 = scmp.lt.u32.totalorder %s4353_s30, %s5102_s2 }
  0x4c   :  { %p4359_p6 = pnand %p4357_p5, %p4354_p4 }
  0x4e   :  { %4362 = shalt.err (!%p4359_p6)
}
  0x4f   :  { %s4363_s17 = scalar_lea.vmem %s52_s19, 384  ;;  %p4368_p8 = scmp.lt.s32.totalorder %s52_s19, %s52_s19 }
  0x50   :  { %p4364_p7 = scmp.ne.s32.totalorder %s52_s19, %s4363_s17  ;;  %p4369_p9 = scmp.lt.s32.totalorder %s4363_s17, %s4363_s17 }
  0x52   :  { %p4370_p10 = por %p4369_p9, %p4368_p8 }
  0x54   :  { %p4371_p11 = pnand %p4370_p10, %p4364_p7 }
  0x56   :  { %4374 = shalt.err (!%p4371_p11)
}
  0x57   :  { %54 = dma.hbm_to_vmem [thread:$0]  %s5102_s2, 384, %s52_s19, [#allocation10]  }
  0x58   :  { %s4552_s21 = smov [#allocation14]   ;;  %s4375_s24 = scalar_lea.hbm %s5104_s4, 1024 }
  0x59   :  { %s70_s1 = sshll.u32 %s4552_s21, 4  ;;  %p4376_p12 = scmp.ne.s32.totalorder %s5104_s4, %s4375_s24  ;;  %s71_s1 = int_to_ptr.vmem [resolvable:$true] %s70_s1 }
  0x5a   :  { %p4379_p13 = scmp.lt.u32.totalorder %s4375_s24, %s5104_s4 }
  0x5c   :  { %p4381_p0 = pnand %p4379_p13, %p4376_p12 }
  0x5e   :  { %4384 = shalt.err (!%p4381_p0)
}
  0x5f   :  { %s4385_s27 = scalar_lea.vmem %s71_s1, 1024  ;;  %p4390_p2 = scmp.lt.s32.totalorder %s71_s1, %s71_s1 }
  0x60   :  { %p4386_p1 = scmp.ne.s32.totalorder %s71_s1, %s4385_s27  ;;  %p4391_p3 = scmp.lt.s32.totalorder %s4385_s27, %s4385_s27 }
  0x62   :  { %p4392_p4 = por %p4391_p3, %p4390_p2 }
  0x64   :  { %p4393_p5 = pnand %p4392_p4, %p4386_p1 }
  0x66   :  { %4396 = shalt.err (!%p4393_p5)
}
  0x67   :  { %s4553_s2 = smov 128   ;;  %s4554_s19 = smov 8  }
  0x68   :  { %76 = dma.hbm_to_vmem [thread:$0]  %s5104_s4, 1024, %s71_s1, [#allocation13], %s4553_s2, %s4553_s2, %s4554_s19  }
  0x69   :  { %s4555_s30 = smov [#allocation17]   ;;  %s4397_s15 = scalar_lea.hbm %s5106_s6, 40960 }
  0x6a   :  { %s94_s12 = sshll.u32 %s4555_s30, 4  ;;  %p4398_p6 = scmp.ne.s32.totalorder %s5106_s6, %s4397_s15  ;;  %s95_s12 = int_to_ptr.vmem [resolvable:$true] %s94_s12 }
  0x6b   :  { %p4401_p7 = scmp.lt.u32.totalorder %s4397_s15, %s5106_s6 }
  0x6d   :  { %p4403_p8 = pnand %p4401_p7, %p4398_p6 }
  0x6f   :  { %4406 = shalt.err (!%p4403_p8)
}
  0x70   :  { %s4407_s18 = scalar_lea.vmem %s95_s12, 40960  ;;  %p4412_p10 = scmp.lt.s32.totalorder %s95_s12, %s95_s12 }
  0x71   :  { %p4408_p9 = scmp.ne.s32.totalorder %s95_s12, %s4407_s18  ;;  %p4413_p11 = scmp.lt.s32.totalorder %s4407_s18, %s4407_s18 }
  0x73   :  { %p4414_p12 = por %p4413_p11, %p4412_p10 }
  0x75   :  { %p4415_p13 = pnand %p4414_p12, %p4408_p9 }
  0x77   :  { %4418 = shalt.err (!%p4415_p13)
}
  0x78   :  { %s4556_s4 = smov 640   ;;  %s4557_s1 = smov 40  }
  0x79   :  { %100 = dma.hbm_to_vmem [thread:$0]  %s5106_s6, 40960, %s95_s12, [#allocation16], %s4556_s4, %s4556_s4, %s4557_s1  }
  0x7a   :  { %s4558_s25 = smov [#allocation18]   ;;  %s4419_s27 = scalar_lea.hbm %s5107_s7, 65536 }
  0x7b   :  { %s106_s26 = sshll.u32 %s4558_s25, 4  ;;  %p4420_p0 = scmp.ne.s32.totalorder %s5107_s7, %s4419_s27  ;;  %s107_s26 = int_to_ptr.vmem [resolvable:$true] %s106_s26 }
  0x7c   :  { %p4423_p1 = scmp.lt.u32.totalorder %s4419_s27, %s5107_s7 }
  0x7e   :  { %p4425_p2 = pnand %p4423_p1, %p4420_p0 }
  0x80   :  { %4428 = shalt.err (!%p4425_p2)
}
  0x81   :  { %s4429_s14 = scalar_lea.vmem %s107_s26, 65536  ;;  %p4434_p4 = scmp.lt.s32.totalorder %s107_s26, %s107_s26 }
  0x82   :  { %p4430_p3 = scmp.ne.s32.totalorder %s107_s26, %s4429_s14  ;;  %p4435_p5 = scmp.lt.s32.totalorder %s4429_s14, %s4429_s14 }
  0x84   :  { %p4436_p6 = por %p4435_p5, %p4434_p4 }
  0x86   :  { %p4437_p7 = pnand %p4436_p6, %p4430_p3 }
  0x88   :  { %4440 = shalt.err (!%p4437_p7)
}
  0x89   :  { %s4559_s6 = smov 1024   ;;  %s4560_s12 = smov 64  }
  0x8a   :  { %112 = dma.hbm_to_vmem [thread:$0]  %s5107_s7, 65536, %s107_s26, [#allocation19], %s4559_s6, %s4559_s6, %s4560_s12  }
  0x8b   :  { %4529 = dma.done.wait [#allocation7], 96  }
  0x8c   :  { %4530 = vsyncadd [#allocation7], 4294967200 }
  0x8d   :  { %4531 = dma.done.wait [#allocation10], 448  }
  0x8e   :  { %4532 = vsyncadd [#allocation10], 4294966848 }
  0x8f   :  { %4533 = dma.done.wait [#allocation13], 1408  }
  0x90   :  { %4534 = vsyncadd [#allocation13], 4294965888 }
  0x91   :  { %4535 = dma.done.wait [#allocation16], 45056  }
  0x92   :  { %4536 = vsyncadd [#allocation16], 4294922240 }
  0x93   :  { %4537 = dma.done.wait [#allocation19], 65536  }
  0x94   :  { %4538 = vsyncadd [#allocation19], 4294901760  ;;  %v182_v0 = vlaneseq  ;;  %v198_v4 = vld [vmem:[#allocation6] sm:$0x5]  ;;  %s4561_s7 = smov 32   ;;  %s4562_s0 = smov 48  }
  0x95   :  { %v180_v5 = vld [vmem:[#allocation6] sm:$0x5]  ;;  %v643_v13 = vld [vmem:[#allocation9] sm:$0x5]  ;;  %v757_v15 = vld [vmem:[#allocation15 + $0x18] sm:$0xff]  ;;  %s4563_s16 = smov 96  }
  0x96   :  { %v183_v1 = vshrl.u32 %v182_v0, 7  ;;  %v216_v10 = vld [vmem:[#allocation6] sm:$0x5]  ;;  %v756_v17 = vld [vmem:[#allocation15 + $0x10] sm:$0xff]  ;;  %v761_v19 = vld [vmem:[#allocation15 + $0x38] sm:$0xff]  ;;  %v4564_v46 = vmov 0.0|0.0  }
  0x97   :  { %v755_v14 = vld [vmem:[#allocation15 + $0x8] sm:$0xff]  ;;  %v754_v16 = vld [vmem:[#allocation15] sm:$0xff]  ;;  %v760_v23 = vld [vmem:[#allocation15 + $0x30] sm:$0xff]  ;;  %3313 = vmatprep.subr.bf16.mxu0 %v4564_v46  ;;  %vm138_vm0 = vcmask 516096   ;;  %vm4566_vm1 = vmmov 0   ;;  %s4567_s21 = smov 112  }
  0x98   :  { %v4742_v2 = vsub.s32 0, %v183_v1  ;;  %v4744_v3 = vsub.s32 2, %v183_v1  ;;  %v759_v18 = vld [vmem:[#allocation15 + $0x28] sm:$0xff]  ;;  %v3325_v20 = vpack.c.bf16 %v757_v15, %v755_v14  ;;  %v3327_v21 = vpack.c.bf16 %v756_v17, %v754_v16  ;;  %v758_v22 = vld [vmem:[#allocation15 + $0x20] sm:$0xff]  ;;  %v765_v28 = vld [vmem:[#allocation15 + $0x58] sm:$0xff]  ;;  %s4568_s18 = smov 80  }
  0x99   :  { %v3329_v26 = vpack.c.bf16 %v761_v19, %v759_v18  ;;  %v763_v27 = vld [vmem:[#allocation15 + $0x48] sm:$0xff]  ;;  %v3331_v30 = vpack.c.bf16 %v760_v23, %v758_v22  ;;  %v762_v32 = vld [vmem:[#allocation15 + $0x40] sm:$0xff]  ;;  %v764_v33 = vld [vmem:[#allocation15 + $0x50] sm:$0xff]  ;;  %v4565_v14 = vmov 0.0   ;;  %vm4832_vm2 = vcmp.lt.s32.totalorder %v182_v0, 512  ;;  %s4569_s22 = smov [#allocation21]  }
  0x9a   :  { %v203_v6 = vrot.slane %v198_v4, %v4742_v2  ;;  %v185_v7 = vrot.slane %v180_v5, %v4742_v2  ;;  %v207_v8 = vrot.slane %v198_v4, %v4744_v3  ;;  %v189_v9 = vrot.slane %v180_v5, %v4744_v3  ;;  %v661_v29 = vld [vmem:[#allocation9] sm:$0x5]  ;;  %3326 = vmatprep.subr.bf16.mxu1 %v3325_v20  ;;  %v769_v37 = vld [vmem:[#allocation15 + $0x78] sm:$0xff]  ;;  %v522_v39 = vld [vmem:[#allocation14] sm:$0xff]  ;;  %s3115_s24 = sshll.u32 %s4569_s22, 4  ;;  %s4570_s25 = smov [#allocation20]   ;;  %s3116_s24 = int_to_ptr.vmem [resolvable:$true] %s3115_s24 }
  0x9b   :  { %v225_v11 = vrot.slane %v216_v10, %v4744_v3  ;;  %v221_v12 = vrot.slane %v216_v10, %v4742_v2  ;;  %v652_v24 = vrot.slane %v643_v13, %v4744_v3  ;;  %v648_v25 = vrot.slane %v643_v13, %v4742_v2  ;;  %3328 = vmatpush1.bf16.msra.mxu1 %v3327_v21  ;;  %v767_v36 = vld [vmem:[#allocation15 + $0x68] sm:$0xff]  ;;  %v766_v42 = vld [vmem:[#allocation15 + $0x60] sm:$0xff]  ;;  %v768_v43 = vld [vmem:[#allocation15 + $0x70] sm:$0xff]  ;;  %s3103_s26 = sshll.u32 %s4570_s25, 4  ;;  %s4441_s5 = scalar_lea.vmem %s3116_s24, 512  ;;  %s3104_s26 = int_to_ptr.vmem [resolvable:$true] %s3103_s26 }
  0x9c   :  { %208 = vrot.lane.b32.xlu1 %v203_v6, %s4561_s7  ;;  %190 = vrot.lane.b32.xlu0 %v185_v7, %s4562_s0  ;;  %v3333_v31 = vpack.c.bf16 %v765_v28, %v763_v27  ;;  %v670_v34 = vrot.slane %v661_v29, %v4744_v3  ;;  %v666_v35 = vrot.slane %v661_v29, %v4742_v2  ;;  %v678_v38 = vld [vmem:[#allocation9] sm:$0x5]  ;;  %v697_v49 = vld [vmem:[#allocation9 + $0x1] sm:$0x1]  ;;  %v773_v53 = vld [vmem:[#allocation15 + $0x98] sm:$0xff]  ;;  %vm212_vm3 = vcmask 261120   ;;  %p4442_p8 = scmp.ne.s32.totalorder %s3116_s24, %s4441_s5  ;;  %p4446_p9 = scmp.lt.s32.totalorder %s3116_s24, %s3116_s24 }
  0x9d   :  { %3330 = vmatprep.subr.bf16.mxu1 %v3329_v26  ;;  %v523_v40 = vld [vmem:[#allocation14 + $0x8] sm:$0xff]  ;;  %v3335_v41 = vpack.c.bf16 %v764_v33, %v762_v32  ;;  %v3337_v45 = vpack.c.bf16 %v769_v37, %v767_v36  ;;  %v687_v50 = vrot.slane %v678_v38, %v4744_v3  ;;  %v683_v51 = vrot.slane %v678_v38, %v4742_v2  ;;  %v524_v55 = vld [vmem:[#allocation14 + $0x10] sm:$0xff]  ;;  %v525_v56 = vld [vmem:[#allocation14 + $0x18] sm:$0xff]  ;;  %p4447_p10 = scmp.lt.s32.totalorder %s4441_s5, %s4441_s5 }
  0x9e   :  { %v3314_v44 = vpack.c.bf16 %v523_v40, %v522_v39  ;;  %v641_v47 = vld [vmem:[#allocation9] sm:$0x1]  ;;  %v695_v48 = vld [vmem:[#allocation9 + $0x2] sm:$0x1]  ;;  %698 = vst [vmem:[#allocation3 + $0x5] sm:$0x1] %v697_v49  ;;  %v3339_v57 = vpack.c.bf16 %v768_v43, %v766_v42  ;;  %v3317_v58 = vpack.c.bf16 %v525_v56, %v524_v55  ;;  %850 = vmatprep.mubr.f32.mxu1 %v4565_v14 }
  0x9f   :  { %3332 = vmatpush1.bf16.msra.mxu1 %v3331_v30  ;;  %v771_v52 = vld [vmem:[#allocation15 + $0x88] sm:$0xff]  ;;  %642 = vst [vmem:[#allocation3] sm:$0x1] %v641_v47  ;;  %696 = vst [vmem:[#allocation3 + $0x4] sm:$0x1] %v695_v48  ;;  %v770_v60 = vld [vmem:[#allocation15 + $0x80] sm:$0xff]  ;;  %3298 = vmatprep.mubr.msk.f32.mxu0 %vm4566_vm1, %v4565_v14  ;;  %p4448_p11 = por %p4447_p10, %p4446_p9 }
  0xa0   :  { %210 = vrot.lane.b32.xlu1 %v207_v8, %s4561_s7  ;;  %192 = vrot.lane.b32.xlu0 %v189_v9, %s4562_s0  ;;  %v699_v54 = vld [vmem:[#allocation9 + $0x1] sm:$0x5]  ;;  %v3341_v59 = vpack.c.bf16 %v773_v53, %v771_v52  ;;  %v772_v61 = vld [vmem:[#allocation15 + $0x90] sm:$0xff]  ;;  %v777_v4 = vld [vmem:[#allocation15 + $0xb8] sm:$0xff]  ;;  %vm194_vm4 = vcmask 392192   ;;  %vm230_vm5 = vcmask 130048  }
  0xa1   :  { %3334 = vmatprep.subr.bf16.mxu1 %v3333_v31  ;;  %3315 = vmatpush3.bf16.msra.mxu0 %v3314_v44  ;;  %v708_v62 = vrot.slane %v699_v54, %v4744_v3  ;;  %v704_v63 = vrot.slane %v699_v54, %v4742_v2  ;;  %v775_v1 = vld [vmem:[#allocation15 + $0xa8] sm:$0xff]  ;;  %v526_v6 = vld [vmem:[#allocation14 + $0x20] sm:$0xff]  ;;  %v3343_v8 = vpack.c.bf16 %v772_v61, %v770_v60  ;;  %v776_v13 = vld [vmem:[#allocation15 + $0xb0] sm:$0xff]  ;;  %vm657_vm6 = vcmask 785408   ;;  %p4449_p12 = pnand %p4448_p11, %p4442_p8 }
  0xa2   :  { %3316 = vmatprep.subr.bf16.mxu0 %v4564_v46  ;;  %v716_v5 = vld [vmem:[#allocation9 + $0x1] sm:$0x5]  ;;  %v137_v10 = vld [vmem:[#allocation6] sm:$0x1]  ;;  %v781_v18 = vld [vmem:[#allocation15 + $0xd8] sm:$0xff]  ;;  %vm530_vm7 = vcmask 523264  }
  0xa3   :  { %3336 = vmatpush1.bf16.msra.mxu1 %v3335_v41  ;;  %v527_v7 = vld [vmem:[#allocation14 + $0x28] sm:$0xff]  ;;  %139 = vst.msk [vmem:[#allocation2] sm:$0x1] %vm138_vm0, %v137_v10  ;;  %v725_v15 = vrot.slane %v716_v5, %v4744_v3  ;;  %v721_v16 = vrot.slane %v716_v5, %v4742_v2  ;;  %v528_v19 = vld [vmem:[#allocation14 + $0x30] sm:$0xff]  ;;  %v529_v20 = vld [vmem:[#allocation14 + $0x38] sm:$0xff] }
  0xa4   :  { %228 = vrot.lane.b32.xlu1 %v225_v11, %s4549_s20  ;;  %226 = vrot.lane.b32.xlu0 %v221_v12, %s4549_s20  ;;  %v3320_v9 = vpack.c.bf16 %v527_v7, %v526_v6  ;;  %v3345_v11 = vpack.c.bf16 %v777_v4, %v775_v1  ;;  %v774_v12 = vld [vmem:[#allocation15 + $0xa0] sm:$0xff]  ;;  %v779_v17 = vld [vmem:[#allocation15 + $0xc8] sm:$0xff]  ;;  %v3323_v22 = vpack.c.bf16 %v529_v20, %v528_v19  ;;  %v785_v27 = vld [vmem:[#allocation15 + $0xf8] sm:$0xff] }
  0xa5   :  { %3338 = vmatprep.subr.bf16.mxu1 %v3337_v45  ;;  %3318 = vmatpush3.bf16.msra.mxu0 %v3317_v58  ;;  %v3347_v21 = vpack.c.bf16 %v776_v13, %v774_v12  ;;  %v3349_v23 = vpack.c.bf16 %v781_v18, %v779_v17  ;;  %v783_v26 = vld [vmem:[#allocation15 + $0xe8] sm:$0xff]  ;;  %v977_v29 = vld [vmem:[#allocation17 + $0x30] sm:$0xff]  ;;  %v3167_v30 = vld [vmem:[#allocation6] ss:$0 sm:$0xff] }
  0xa6   :  { %3319 = vmatprep.subr.bf16.mxu0 %v4564_v46  ;;  %v972_v28 = vld [vmem:[#allocation17 + $0x8] sm:$0xff]  ;;  %v3353_v33 = vpack.c.bf16 %v785_v27, %v783_v26  ;;  %v974_v36 = vld [vmem:[#allocation17 + $0x18] sm:$0xff]  ;;  %v979_v38 = vld [vmem:[#allocation17 + $0x40] sm:$0xff] }
  0xa7   :  { %3340 = vmatpush1.bf16.msra.mxu1 %v3339_v57  ;;  %v3357_v31 = vpack.c.bf16 %v977_v29, %v972_v28  ;;  %v276_v37 = vld [vmem:[#allocation6 + $0x2] sm:$0x5]  ;;  %v3485_v40 = vpack.c.bf16 %v979_v38, %v974_v36  ;;  %v388_v54 = vld [vmem:[#allocation6 + $0x1] sm:$0x5]  ;;  %v1925_v10 = vld [vmem:[#allocation18 + $0xd8] sm:$0xff] }
  0xa8   :  { %655 = vrot.lane.b32.xlu1 %v652_v24, %s4563_s16  ;;  %653 = vrot.lane.b32.xlu0 %v648_v25, %s4563_s16  ;;  %v778_v24 = vld [vmem:[#allocation15 + $0xc0] sm:$0xff]  ;;  %v780_v25 = vld [vmem:[#allocation15 + $0xd0] sm:$0xff]  ;;  %v285_v41 = vrot.slane %v276_v37, %v4744_v3  ;;  %v281_v42 = vrot.slane %v276_v37, %v4742_v2  ;;  %v293_v43 = vld [vmem:[#allocation6 + $0x2] sm:$0x5]  ;;  %v397_v57 = vrot.slane %v388_v54, %v4744_v3 }
  0xa9   :  { %3342 = vmatprep.subr.bf16.mxu1 %v3341_v59  ;;  %3321 = vmatpush3.bf16.msra.mxu0 %v3320_v9  ;;  %v3351_v32 = vpack.c.bf16 %v780_v25, %v778_v24  ;;  %v302_v44 = vrot.slane %v293_v43, %v4744_v3  ;;  %v298_v45 = vrot.slane %v293_v43, %v4742_v2  ;;  %v234_v47 = vld [vmem:[#allocation6 + $0x2] sm:$0x1]  ;;  %v327_v55 = vld [vmem:[#allocation6 + $0x4] sm:$0x1]  ;;  %v329_v56 = vld [vmem:[#allocation6 + $0x1] sm:$0x1] }
  0xaa   :  { %3322 = vmatprep.subr.bf16.mxu0 %v4564_v46  ;;  %v310_v46 = vld [vmem:[#allocation6 + $0x2] sm:$0x5]  ;;  %235 = vst.msk [vmem:[#allocation2 + $0x8] sm:$0x1] %vm138_vm0, %v234_v47  ;;  %328 = vst.msk [vmem:[#allocation2 + $0x10] sm:$0x1] %vm138_vm0, %v327_v55  ;;  %v393_v58 = vrot.slane %v388_v54, %v4742_v2 }
  0xab   :  { %3344 = vmatpush1.bf16.msra.mxu1 %v3343_v8  ;;  %v319_v48 = vrot.slane %v310_v46, %v4744_v3  ;;  %v315_v49 = vrot.slane %v310_v46, %v4742_v2  ;;  %330 = vst.msk [vmem:[#allocation2 + $0x11] sm:$0x1] %vm138_vm0, %v329_v56  ;;  %v3175_v59 = vld [vmem:[#allocation6 + $0x1] ss:$0 sm:$0xff]  ;;  %v481_v5 = vld [vmem:[#allocation6 + $0x3] sm:$0x5] }
  0xac   :  { %673 = vrot.lane.b32.xlu1 %v670_v34, %s4560_s12  ;;  %671 = vrot.lane.b32.xlu0 %v666_v35, %s4560_s12  ;;  %v782_v34 = vld [vmem:[#allocation15 + $0xe0] sm:$0xff]  ;;  %v784_v35 = vld [vmem:[#allocation15 + $0xf0] sm:$0xff]  ;;  %v422_v6 = vld [vmem:[#allocation6 + $0x3] sm:$0x1]  ;;  %v490_v7 = vrot.slane %v481_v5, %v4744_v3  ;;  %v486_v8 = vrot.slane %v481_v5, %v4742_v2 }
  0xad   :  { %3346 = vmatprep.subr.bf16.mxu1 %v3345_v11  ;;  %3324 = vmatpush3.bf16.msra.mxu0 %v3323_v22  ;;  %v3355_v39 = vpack.c.bf16 %v784_v35, %v782_v34  ;;  %v405_v60 = vld [vmem:[#allocation6 + $0x1] sm:$0x5]  ;;  %423 = vst.msk [vmem:[#allocation2 + $0x19] sm:$0x1] %vm138_vm0, %v422_v6  ;;  %v515_v9 = vld [vmem:[#allocation6 + $0x5] sm:$0x1] }
  0xae   :  { %3358 = vmatprep.subr.bf16.mxu0 %v3357_v31  ;;  %v414_v61 = vrot.slane %v405_v60, %v4744_v3  ;;  %516 = vst.msk [vmem:[#allocation2 + $0x21] sm:$0x1] %vm138_vm0, %v515_v9  ;;  %v3179_v11 = vld [vmem:[#allocation6 + $0x3] ss:$0 sm:$0xff]  ;;  %v733_v22 = vld [vmem:[#allocation9 + $0x1] sm:$0x5] }
  0xaf   :  { %3348 = vmatpush1.bf16.msra.mxu1 %v3347_v21  ;;  %v867_v12 = vld [vmem:[#allocation11] ss:$2 sm:$0xf]  ;;  %v890_v17 = vld [vmem:[#allocation11 + $0x8] ss:$2 sm:$0xf]  ;;  %v742_v25 = vrot.slane %v733_v22, %v4744_v3  ;;  %v738_v26 = vrot.slane %v733_v22, %v4742_v2 }
  0xb0   :  { %690 = vrot.lane.b32.xlu1 %v687_v50, %s4561_s7  ;;  %688 = vrot.lane.b32.xlu0 %v683_v51, %s4561_s7  ;;  %v3171_v50 = vld [vmem:[#allocation6 + $0x2] ss:$0 sm:$0xff]  ;;  %v371_v51 = vld [vmem:[#allocation6 + $0x1] sm:$0x5]  ;;  %v750_v24 = vld [vmem:[#allocation9 + $0x3] sm:$0x1] }
  0xb1   :  { %3350 = vmatprep.subr.bf16.mxu1 %v3349_v23  ;;  %v380_v52 = vrot.slane %v371_v51, %v4744_v3  ;;  %v376_v53 = vrot.slane %v371_v51, %v4742_v2  ;;  %v875_v13 = vld [vmem:[#allocation11 + $0x2] ss:$2 sm:$0xf]  ;;  %872 = vst.msk [vmem:[#allocation4] ss:$8 sm:$0xf] %vm4832_vm2, %v867_v12 }
  0xb2   :  { %877 = vst.msk [vmem:[#allocation4 + $0x1] ss:$8 sm:$0xf] %vm4832_vm2, %v875_v13  ;;  %v885_v0 = vld [vmem:[#allocation11 + $0x6] ss:$2 sm:$0xf] }
  0xb3   :  { %3352 = vmatpush1.bf16.msra.mxu1 %v3351_v32  ;;  %887 = vst.msk [vmem:[#allocation4 + $0x3] ss:$8 sm:$0xf] %vm4832_vm2, %v885_v0  ;;  %892 = vst.msk [vmem:[#allocation4 + $0x4] ss:$8 sm:$0xf] %vm4832_vm2, %v890_v17 }
  0xb4   :  { %711 = vrot.lane.b32.xlu1 %v708_v62, %s4563_s16  ;;  %709 = vrot.lane.b32.xlu0 %v704_v63, %s4563_s16  ;;  %v410_v62 = vrot.slane %v405_v60, %v4742_v2  ;;  %v464_v63 = vld [vmem:[#allocation6 + $0x3] sm:$0x5]  ;;  %v895_v20 = vld [vmem:[#allocation11 + $0xa] ss:$2 sm:$0xf]  ;;  %v973_v54 = vld [vmem:[#allocation17 + $0x10] sm:$0xff] }
  0xb5   :  { %3354 = vmatprep.subr.bf16.mxu1 %v3353_v33  ;;  %v473_v1 = vrot.slane %v464_v63, %v4744_v3  ;;  %v469_v4 = vrot.slane %v464_v63, %v4742_v2  ;;  %v900_v21 = vld [vmem:[#allocation11 + $0xc] ss:$2 sm:$0xf]  ;;  %897 = vst.msk [vmem:[#allocation4 + $0x5] ss:$8 sm:$0xf] %vm4832_vm2, %v895_v20 }
  0xb6   :  { %902 = vst.msk [vmem:[#allocation4 + $0x6] ss:$8 sm:$0xf] %vm4832_vm2, %v900_v21  ;;  %v905_v23 = vld [vmem:[#allocation11 + $0xe] ss:$2 sm:$0xf] }
  0xb7   :  { %3356 = vmatpush1.bf16.msra.mxu1 %v3355_v39  ;;  %907 = vst.msk [vmem:[#allocation4 + $0x7] ss:$8 sm:$0xf] %vm4832_vm2, %v905_v23  ;;  %751 = vst [vmem:[#allocation3 + $0x9] sm:$0x1] %v750_v24  ;;  %v978_v55 = vld [vmem:[#allocation17 + $0x38] sm:$0xff] }
  0xb8   :  { %728 = vrot.lane.b32.xlu1 %v725_v15, %s4560_s12  ;;  %726 = vrot.lane.b32.xlu0 %v721_v16, %s4560_s12  ;;  %v498_v15 = vld [vmem:[#allocation6 + $0x3] sm:$0x5]  ;;  %v880_v16 = vld [vmem:[#allocation11 + $0x4] ss:$2 sm:$0xf]  ;;  %v983_v6 = vld [vmem:[#allocation17 + $0x60] sm:$0xff] }
  0xb9   :  { %3486 = vmatprep.subr.bf16.mxu1 %v3485_v40  ;;  %882 = vst.msk [vmem:[#allocation4 + $0x2] ss:$8 sm:$0xf] %vm4832_vm2, %v880_v16  ;;  %v507_v18 = vrot.slane %v498_v15, %v4744_v3  ;;  %v503_v19 = vrot.slane %v498_v15, %v4742_v2  ;;  %v920_v51 = vld [vmem:[#allocation11 + $0x3] ss:$2 sm:$0xf] }
  0xba   :  { %922 = vst.msk [vmem:[#allocation4 + $0x22] ss:$8 sm:$0xf] %vm4832_vm2, %v920_v51  ;;  %v984_v56 = vld [vmem:[#allocation17 + $0x68] sm:$0xff]  ;;  %v994_v9 = vld [vmem:[#allocation17 + $0xb8] sm:$0xff]  ;;  %v971_v12 = vld [vmem:[#allocation17] sm:$0xff] }
  0xbb   :  { %v935_v60 = vld [vmem:[#allocation11 + $0x9] ss:$2 sm:$0xf]  ;;  %v976_v13 = vld [vmem:[#allocation17 + $0x28] sm:$0xff]  ;;  %v987_v20 = vld [vmem:[#allocation17 + $0x80] sm:$0xff] }
  0xbc   :  { %156 = vrot.lane.b32.xlu1 %v3167_v30, %s4563_s16  ;;  %146 = vrot.lane.b32.xlu0 %v3167_v30, %s4567_s21  ;;  %937 = vst.msk [vmem:[#allocation4 + $0x25] ss:$8 sm:$0xf] %vm4832_vm2, %v935_v60  ;;  %v945_v63 = vld [vmem:[#allocation11 + $0xd] ss:$2 sm:$0xf] }
  0xbd   :  { %947 = vst.msk [vmem:[#allocation4 + $0x27] ss:$8 sm:$0xf] %vm4832_vm2, %v945_v63  ;;  %v982_v15 = vld [vmem:[#allocation17 + $0x58] sm:$0xff]  ;;  %v993_v22 = vld [vmem:[#allocation17 + $0xb0] sm:$0xff]  ;;  %v1012_v60 = vld [vmem:[#allocation17 + $0x148] sm:$0xff] }
  0xbe   :  { %v950_v0 = vld [vmem:[#allocation11 + $0xf] ss:$2 sm:$0xf]  ;;  %v1013_v51 = vld [vmem:[#allocation17 + $0x150] sm:$0xff] }
  0xbf   :  { %v955_v17 = vld [vmem:[#allocation11 + $0x11] ss:$2 sm:$0xf]  ;;  %v998_v23 = vld [vmem:[#allocation17 + $0xd8] sm:$0xff] }
  0xc0   :  { %176 = vrot.lane.b32.xlu1 %v3167_v30, %s4560_s12  ;;  %166 = vrot.lane.b32.xlu0 %v3167_v30, %s4568_s18  ;;  %952 = vst.msk [vmem:[#allocation4 + $0x40] ss:$8 sm:$0xf] %vm4832_vm2, %v950_v0  ;;  %957 = vst.msk [vmem:[#allocation4 + $0x41] ss:$8 sm:$0xf] %vm4832_vm2, %v955_v17 }
  0xc4   :  { %288 = vrot.lane.b32.xlu1 %v285_v41, %s4562_s0  ;;  %286 = vrot.lane.b32.xlu0 %v281_v42, %s4562_s0 }
  0xc8   :  { %305 = vrot.lane.b32.xlu1 %v302_v44, %s4561_s7  ;;  %303 = vrot.lane.b32.xlu0 %v298_v45, %s4561_s7 }
  0xcc   :  { %322 = vrot.lane.b32.xlu1 %v319_v48, %s4549_s20  ;;  %320 = vrot.lane.b32.xlu0 %v315_v49, %s4549_s20  ;;  %v910_v49 = vld [vmem:[#allocation11 + $0x10] ss:$2 sm:$0xf] }
  0xcd   :  { %912 = vst.msk [vmem:[#allocation4 + $0x20] ss:$8 sm:$0xf] %vm4832_vm2, %v910_v49  ;;  %v1007_v49 = vld [vmem:[#allocation17 + $0x120] sm:$0xff] }
  0xd0   :  { %252 = vrot.lane.b32.xlu1 %v3171_v50, %s4563_s16  ;;  %242 = vrot.lane.b32.xlu0 %v3171_v50, %s4567_s21 }
  0xd4   :  { %272 = vrot.lane.b32.xlu1 %v3171_v50, %s4560_s12  ;;  %262 = vrot.lane.b32.xlu0 %v3171_v50, %s4568_s18  ;;  %v915_v50 = vld [vmem:[#allocation11 + $0x1] ss:$2 sm:$0xf] }
  0xd5   :  { %917 = vst.msk [vmem:[#allocation4 + $0x21] ss:$8 sm:$0xf] %vm4832_vm2, %v915_v50 }
  0xd8   :  { %383 = vrot.lane.b32.xlu1 %v380_v52, %s4562_s0  ;;  %381 = vrot.lane.b32.xlu0 %v376_v53, %s4562_s0 }
  0xdc   :  { %400 = vrot.lane.b32.xlu1 %v397_v57, %s4561_s7  ;;  %398 = vrot.lane.b32.xlu0 %v393_v58, %s4561_s7  ;;  %v989_v57 = vld [vmem:[#allocation17 + $0x90] sm:$0xff] }
  0xdd   :  { %v925_v58 = vld [vmem:[#allocation11 + $0x5] ss:$2 sm:$0xf]  ;;  %v3489_v5 = vpack.c.bf16 %v989_v57, %v984_v56 }
  0xde   :  { %927 = vst.msk [vmem:[#allocation4 + $0x23] ss:$8 sm:$0xf] %vm4832_vm2, %v925_v58  ;;  %v1001_v58 = vld [vmem:[#allocation17 + $0xf0] sm:$0xff] }
  0xe0   :  { %347 = vrot.lane.b32.xlu1 %v3175_v59, %s4563_s16  ;;  %337 = vrot.lane.b32.xlu0 %v3175_v59, %s4567_s21 }
  0xe4   :  { %367 = vrot.lane.b32.xlu1 %v3175_v59, %s4560_s12  ;;  %357 = vrot.lane.b32.xlu0 %v3175_v59, %s4568_s18  ;;  %v930_v59 = vld [vmem:[#allocation11 + $0x7] ss:$2 sm:$0xf] }
  0xe5   :  { %932 = vst.msk [vmem:[#allocation4 + $0x24] ss:$8 sm:$0xf] %vm4832_vm2, %v930_v59  ;;  %v1006_v59 = vld [vmem:[#allocation17 + $0x118] sm:$0xff] }
  0xe8   :  { %417 = vrot.lane.b32.xlu1 %v414_v61, %s4549_s20  ;;  %415 = vrot.lane.b32.xlu0 %v410_v62, %s4549_s20  ;;  %v3487_v61 = vpack.c.bf16 %v978_v55, %v973_v54  ;;  %v940_v62 = vld [vmem:[#allocation11 + $0xb] ss:$2 sm:$0xf]  ;;  %v1024_v54 = vld [vmem:[#allocation17 + $0x1a8] sm:$0xff]  ;;  %v1029_v55 = vld [vmem:[#allocation17 + $0x1d0] sm:$0xff] }
  0xe9   :  { %942 = vst.msk [vmem:[#allocation4 + $0x26] ss:$8 sm:$0xf] %vm4832_vm2, %v940_v62 }
  0xec   :  { %476 = vrot.lane.b32.xlu1 %v473_v1, %s4562_s0  ;;  %474 = vrot.lane.b32.xlu0 %v469_v4, %s4562_s0 }
  0xf0   :  { %493 = vrot.lane.b32.xlu1 %v490_v7, %s4561_s7  ;;  %491 = vrot.lane.b32.xlu0 %v486_v8, %s4561_s7  ;;  %v988_v7 = vld [vmem:[#allocation17 + $0x88] sm:$0xff] }
  0xf1   :  { %v3491_v16 = vpack.c.bf16 %v988_v7, %v983_v6  ;;  %v1028_v6 = vld [vmem:[#allocation17 + $0x1c8] sm:$0xff]  ;;  %v1034_v7 = vld [vmem:[#allocation17 + $0x1f8] sm:$0xff] }
  0xf4   :  { %440 = vrot.lane.b32.xlu1 %v3179_v11, %s4563_s16  ;;  %430 = vrot.lane.b32.xlu0 %v3179_v11, %s4567_s21 }
  0xf8   :  { %460 = vrot.lane.b32.xlu1 %v3179_v11, %s4560_s12  ;;  %450 = vrot.lane.b32.xlu0 %v3179_v11, %s4568_s18  ;;  %v999_v11 = vld [vmem:[#allocation17 + $0xe0] sm:$0xff] }
  0xf9   :  { %v3493_v21 = vpack.c.bf16 %v999_v11, %v994_v9  ;;  %v3371_v9 = vpack.c.bf16 %v1006_v59, %v1001_v58 }
  0xfc   :  { %510 = vrot.lane.b32.xlu1 %v507_v18, %s4549_s20  ;;  %508 = vrot.lane.b32.xlu0 %v503_v19, %s4549_s20 }
 0x100   :  { %745 = vrot.lane.b32.xlu1 %v742_v25, %s4561_s7  ;;  %743 = vrot.lane.b32.xlu0 %v738_v26, %s4561_s7  ;;  %v1004_v25 = vld [vmem:[#allocation17 + $0x108] sm:$0xff]  ;;  %v1009_v26 = vld [vmem:[#allocation17 + $0x130] sm:$0xff] }
 0x10e   :  { %v209_v27 = vpop.permute.xlu1 %208  ;;  %v191_v28 = vpop.permute.xlu0 %190 }
 0x112   :  { %v211_v29 = vpop.permute.xlu1 %210  ;;  %v193_v30 = vpop.permute.xlu0 %192 }
 0x113   :  { %v213_v31 = vsel %vm212_vm3, %v209_v27, %v211_v29  ;;  %v195_v32 = vsel %vm194_vm4, %v191_v28, %v193_v30  ;;  %v3359_v27 = vpack.c.bf16 %v976_v13, %v971_v12  ;;  %v981_v28 = vld [vmem:[#allocation17 + $0x50] sm:$0xff]  ;;  %v3361_v29 = vpack.c.bf16 %v987_v20, %v982_v15  ;;  %v986_v30 = vld [vmem:[#allocation17 + $0x78] sm:$0xff]  ;;  %v1011_v12 = vld [vmem:[#allocation17 + $0x140] sm:$0xff] }
 0x114   :  { %215 = vst.msk [vmem:[#allocation2 + $0x6] sm:$0x1] %vm138_vm0, %v213_v31  ;;  %197 = vst.msk [vmem:[#allocation2 + $0x5] sm:$0x1] %vm138_vm0, %v195_v32  ;;  %v992_v31 = vld [vmem:[#allocation17 + $0xa8] sm:$0xff]  ;;  %v997_v32 = vld [vmem:[#allocation17 + $0xd0] sm:$0xff] }
 0x115   :  { %v1016_v13 = vld [vmem:[#allocation17 + $0x168] sm:$0xff]  ;;  %v1022_v15 = vld [vmem:[#allocation17 + $0x198] sm:$0xff]  ;;  %v1033_v20 = vld [vmem:[#allocation17 + $0x1f0] sm:$0xff] }
 0x116   :  { %v229_v2 = vpop.permute.xlu1 %228  ;;  %v227_v3 = vpop.permute.xlu0 %226 }
 0x117   :  { %v231_v33 = vsel %vm230_vm5, %v227_v3, %v229_v2  ;;  %v3495_v2 = vpack.c.bf16 %v998_v23, %v993_v22  ;;  %v1044_v22 = vld [vmem:[#allocation17 + $0x248] sm:$0xff]  ;;  %v1049_v23 = vld [vmem:[#allocation17 + $0x270] sm:$0xff] }
 0x118   :  { %233 = vst.msk [vmem:[#allocation2 + $0x7] sm:$0x1] %vm138_vm0, %v231_v33 }
 0x11a   :  { %v656_v34 = vpop.permute.xlu1 %655  ;;  %v654_v35 = vpop.permute.xlu0 %653 }
 0x11b   :  { %v658_v36 = vsel %vm657_vm6, %v654_v35, %v656_v34  ;;  %v3497_v35 = vpack.c.bf16 %v1009_v26, %v1004_v25  ;;  %v1021_v26 = vld [vmem:[#allocation17 + $0x190] sm:$0xff] }
 0x11c   :  { %660 = vst [vmem:[#allocation3 + $0x1] sm:$0x1] %v658_v36  ;;  %v1003_v36 = vld [vmem:[#allocation17 + $0x100] sm:$0xff] }
 0x11e   :  { %v674_v37 = vpop.permute.xlu1 %673  ;;  %v672_v38 = vpop.permute.xlu0 %671 }
 0x11f   :  { %v675_v39 = vsel %vm530_vm7, %v672_v38, %v674_v37  ;;  %v1008_v37 = vld [vmem:[#allocation17 + $0x128] sm:$0xff] }
 0x120   :  { %677 = vst [vmem:[#allocation3 + $0x2] sm:$0x1] %v675_v39  ;;  %v1014_v39 = vld [vmem:[#allocation17 + $0x158] sm:$0xff] }
 0x122   :  { %v691_v40 = vpop.permute.xlu1 %690  ;;  %v689_v41 = vpop.permute.xlu0 %688 }
 0x123   :  { %v692_v42 = vsel %vm212_vm3, %v689_v41, %v691_v40  ;;  %v1019_v40 = vld [vmem:[#allocation17 + $0x180] sm:$0xff]  ;;  %v3363_v41 = vpack.c.bf16 %v986_v30, %v981_v28  ;;  %v1032_v28 = vld [vmem:[#allocation17 + $0x1e8] sm:$0xff] }
 0x124   :  { %694 = vst [vmem:[#allocation3 + $0x3] sm:$0x1] %v692_v42  ;;  %v3365_v42 = vpack.c.bf16 %v997_v32, %v992_v31  ;;  %v3501_v50 = vpack.c.bf16 %v1019_v40, %v1014_v39  ;;  %v1037_v32 = vld [vmem:[#allocation17 + $0x210] sm:$0xff]  ;;  %v1036_v40 = vld [vmem:[#allocation17 + $0x208] sm:$0xff] }
 0x125   :  { %v3381_v39 = vpack.c.bf16 %v1037_v32, %v1032_v28  ;;  %v1088_v32 = vld [vmem:[#allocation17 + $0x3a8] sm:$0xff] }
 0x126   :  { %v712_v43 = vpop.permute.xlu1 %711  ;;  %v710_v44 = vpop.permute.xlu0 %709 }
 0x127   :  { %v713_v45 = vsel %vm657_vm6, %v710_v44, %v712_v43  ;;  %v991_v43 = vld [vmem:[#allocation17 + $0xa0] sm:$0xff]  ;;  %v996_v44 = vld [vmem:[#allocation17 + $0xc8] sm:$0xff] }
 0x128   :  { %715 = vst [vmem:[#allocation3 + $0x6] sm:$0x1] %v713_v45  ;;  %v1002_v45 = vld [vmem:[#allocation17 + $0xf8] sm:$0xff]  ;;  %v3367_v56 = vpack.c.bf16 %v996_v44, %v991_v43 }
 0x129   :  { %v3369_v57 = vpack.c.bf16 %v1007_v49, %v1002_v45  ;;  %v1058_v49 = vld [vmem:[#allocation17 + $0x2b8] sm:$0xff] }
 0x12a   :  { %v729_v46 = vpop.permute.xlu1 %728  ;;  %v727_v47 = vpop.permute.xlu0 %726 }
 0x12b   :  { %v730_v48 = vsel %vm530_vm7, %v727_v47, %v729_v46  ;;  %v3499_v46 = vpack.c.bf16 %v1008_v37, %v1003_v36  ;;  %v1059_v36 = vld [vmem:[#allocation17 + $0x2c0] sm:$0xff] }
 0x12c   :  { %732 = vst [vmem:[#allocation3 + $0x7] sm:$0x1] %v730_v48 }
 0x12e   :  { %v157_v52 = vpop.permute.xlu1 %156  ;;  %v147_v53 = vpop.permute.xlu0 %146 }
 0x12f   :  { %159 = vst.msk [vmem:[#allocation2 + $0x2] sm:$0x1] %vm138_vm0, %v157_v52  ;;  %149 = vst.msk [vmem:[#allocation2 + $0x1] sm:$0x1] %vm138_vm0, %v147_v53  ;;  %v1018_v52 = vld [vmem:[#allocation17 + $0x178] sm:$0xff] }
 0x132   :  { %v177_v1 = vpop.permute.xlu1 %176  ;;  %v167_v4 = vpop.permute.xlu0 %166 }
 0x133   :  { %179 = vst.msk [vmem:[#allocation2 + $0x4] sm:$0x1] %vm138_vm0, %v177_v1  ;;  %169 = vst.msk [vmem:[#allocation2 + $0x3] sm:$0x1] %vm138_vm0, %v167_v4  ;;  %v752_v8 = vld [vmem:[#allocation3] sm:$0xff]  ;;  %v3505_v4 = vpack.c.bf16 %v1029_v55, %v1024_v54 }
 0x134   :  { %851 = vmatmul.mubr.f32.vlgmr.msra.gmra.mrb[0].mxu1 %v752_v8  ;;  %v1017_v1 = vld [vmem:[#allocation17 + $0x170] sm:$0xff]  ;;  %v1039_v8 = vld [vmem:[#allocation17 + $0x220] sm:$0xff] }
 0x135   :  { %3488 = vmatpush1.bf16.msra.mxu1 %v3487_v61  ;;  %856 = vmatprep.mubr.f32.mxu1 %v4565_v14  ;;  %v3503_v61 = vpack.c.bf16 %v1018_v52, %v1013_v51  ;;  %v3373_v11 = vpack.c.bf16 %v1017_v1, %v1012_v60  ;;  %v1064_v51 = vld [vmem:[#allocation17 + $0x2e8] sm:$0xff]  ;;  %v1069_v52 = vld [vmem:[#allocation17 + $0x310] sm:$0xff] }
 0x136   :  { %v289_v18 = vpop.permute.xlu1 %288  ;;  %v287_v19 = vpop.permute.xlu0 %286  ;;  %3490 = vmatprep.subr.bf16.mxu1 %v3489_v5  ;;  %v1023_v5 = vld [vmem:[#allocation17 + $0x1a0] sm:$0xff]  ;;  %v1041_v55 = vld [vmem:[#allocation17 + $0x230] sm:$0xff]  ;;  %v1068_v1 = vld [vmem:[#allocation17 + $0x308] sm:$0xff] }
 0x137   :  { %v290_v24 = vsel %vm194_vm4, %v287_v19, %v289_v18  ;;  %v1027_v18 = vld [vmem:[#allocation17 + $0x1c0] sm:$0xff]  ;;  %v3509_v19 = vpack.c.bf16 %v1039_v8, %v1034_v7 }
 0x138   :  { %292 = vst.msk [vmem:[#allocation2 + $0xd] sm:$0x1] %vm138_vm0, %v290_v24  ;;  %v3375_v24 = vpack.c.bf16 %v1016_v13, %v1011_v12  ;;  %v3377_v25 = vpack.c.bf16 %v1027_v18, %v1022_v15  ;;  %v1051_v8 = vld [vmem:[#allocation17 + $0x280] sm:$0xff]  ;;  %v1078_v18 = vld [vmem:[#allocation17 + $0x358] sm:$0xff] }
 0x139   :  { %3492 = vmatpush1.bf16.msra.mxu1 %v3491_v16  ;;  %v3507_v16 = vpack.c.bf16 %v1028_v6, %v1023_v5  ;;  %v1079_v5 = vld [vmem:[#allocation17 + $0x360] sm:$0xff] }
 0x13a   :  { %v306_v3 = vpop.permute.xlu1 %305  ;;  %v304_v33 = vpop.permute.xlu0 %303  ;;  %v517_v34 = vld [vmem:[#allocation2] sm:$0xff]  ;;  %3494 = vmatprep.subr.bf16.mxu1 %v3493_v21  ;;  %v1038_v21 = vld [vmem:[#allocation17 + $0x218] sm:$0xff] }
 0x13b   :  { %v307_v38 = vsel %vm212_vm3, %v304_v33, %v306_v3  ;;  %3299 = vmatmul.mubr.msk.f32.vlgmr.msra.gmra.mrb[0].mxu0 %vm530_vm7, %v517_v34  ;;  %v1043_v3 = vld [vmem:[#allocation17 + $0x240] sm:$0xff]  ;;  %v1048_v33 = vld [vmem:[#allocation17 + $0x268] sm:$0xff] }
 0x13c   :  { %309 = vst.msk [vmem:[#allocation2 + $0xe] sm:$0x1] %vm138_vm0, %v307_v38  ;;  %3360 = vmatpush1.bf16.msra.mxu0 %v3359_v27  ;;  %3301 = vmatprep.mubr.msk.f32.mxu0 %vm4566_vm1, %v4565_v14  ;;  %v1026_v27 = vld [vmem:[#allocation17 + $0x1b8] sm:$0xff]  ;;  %v1031_v38 = vld [vmem:[#allocation17 + $0x1e0] sm:$0xff]  ;;  %v3515_v43 = vpack.c.bf16 %v1048_v33, %v1043_v3 }
 0x13d   :  { %3362 = vmatprep.subr.bf16.mxu0 %v3361_v29  ;;  %3496 = vmatpush1.bf16.msra.mxu1 %v3495_v2  ;;  %v3511_v29 = vpack.c.bf16 %v1038_v21, %v1033_v20  ;;  %v3513_v2 = vpack.c.bf16 %v1049_v23, %v1044_v22  ;;  %v3379_v37 = vpack.c.bf16 %v1026_v27, %v1021_v26  ;;  %v1089_v20 = vld [vmem:[#allocation17 + $0x3b0] sm:$0xff]  ;;  %v1094_v3 = vld [vmem:[#allocation17 + $0x3d8] sm:$0xff]  ;;  %v1099_v33 = vld [vmem:[#allocation17 + $0x400] sm:$0xff] }
 0x13e   :  { %v323_v47 = vpop.permute.xlu1 %322  ;;  %v321_v48 = vpop.permute.xlu0 %320  ;;  %3498 = vmatprep.subr.bf16.mxu1 %v3497_v35  ;;  %v1054_v35 = vld [vmem:[#allocation17 + $0x298] sm:$0xff]  ;;  %v1061_v23 = vld [vmem:[#allocation17 + $0x2d0] sm:$0xff] }
 0x13f   :  { %v324_v53 = vsel %vm230_vm5, %v321_v48, %v323_v47  ;;  %v3517_v47 = vpack.c.bf16 %v1059_v36, %v1054_v35  ;;  %v1053_v48 = vld [vmem:[#allocation17 + $0x290] sm:$0xff]  ;;  %v1071_v35 = vld [vmem:[#allocation17 + $0x320] sm:$0xff] }
 0x140   :  { %326 = vst.msk [vmem:[#allocation2 + $0xf] sm:$0x1] %vm138_vm0, %v324_v53  ;;  %3364 = vmatpush1.bf16.msra.mxu0 %v3363_v41  ;;  %v1042_v41 = vld [vmem:[#allocation17 + $0x238] sm:$0xff]  ;;  %v3383_v53 = vpack.c.bf16 %v1036_v40, %v1031_v38  ;;  %v3519_v58 = vpack.c.bf16 %v1058_v49, %v1053_v48  ;;  %v1104_v48 = vld [vmem:[#allocation17 + $0x428] sm:$0xff]  ;;  %v1109_v49 = vld [vmem:[#allocation17 + $0x450] sm:$0xff] }
 0x141   :  { %3366 = vmatprep.subr.bf16.mxu0 %v3365_v42  ;;  %3500 = vmatpush1.bf16.msra.mxu1 %v3499_v46  ;;  %v1047_v42 = vld [vmem:[#allocation17 + $0x260] sm:$0xff]  ;;  %v1082_v38 = vld [vmem:[#allocation17 + $0x378] sm:$0xff] }
 0x142   :  { %v253_v62 = vpop.permute.xlu1 %252  ;;  %v243_v63 = vpop.permute.xlu0 %242  ;;  %3502 = vmatprep.subr.bf16.mxu1 %v3501_v50  ;;  %v3385_v54 = vpack.c.bf16 %v1047_v42, %v1042_v41 }
 0x143   :  { %255 = vst.msk [vmem:[#allocation2 + $0xa] sm:$0x1] %vm138_vm0, %v253_v62  ;;  %245 = vst.msk [vmem:[#allocation2 + $0x9] sm:$0x1] %vm138_vm0, %v243_v63  ;;  %v3521_v62 = vpack.c.bf16 %v1069_v52, %v1064_v51  ;;  %v1063_v63 = vld [vmem:[#allocation17 + $0x2e0] sm:$0xff]  ;;  %v1081_v52 = vld [vmem:[#allocation17 + $0x370] sm:$0xff] }
 0x144   :  { %3368 = vmatpush1.bf16.msra.mxu0 %v3367_v56  ;;  %v1046_v56 = vld [vmem:[#allocation17 + $0x258] sm:$0xff]  ;;  %v3523_v12 = vpack.c.bf16 %v1068_v1, %v1063_v63  ;;  %v1119_v1 = vld [vmem:[#allocation17 + $0x4a0] sm:$0xff] }
 0x145   :  { %3370 = vmatprep.subr.bf16.mxu0 %v3369_v57  ;;  %3504 = vmatpush1.bf16.msra.mxu1 %v3503_v61  ;;  %v1052_v57 = vld [vmem:[#allocation17 + $0x288] sm:$0xff]  ;;  %v1057_v61 = vld [vmem:[#allocation17 + $0x2b0] sm:$0xff]  ;;  %v3387_v6 = vpack.c.bf16 %v1046_v56, %v1041_v55  ;;  %v1114_v63 = vld [vmem:[#allocation17 + $0x478] sm:$0xff] }
 0x146   :  { %v273_v0 = vpop.permute.xlu1 %272  ;;  %v263_v17 = vpop.permute.xlu0 %262  ;;  %3506 = vmatprep.subr.bf16.mxu1 %v3505_v4  ;;  %v1074_v4 = vld [vmem:[#allocation17 + $0x338] sm:$0xff]  ;;  %v3389_v7 = vpack.c.bf16 %v1057_v61, %v1052_v57  ;;  %v1108_v61 = vld [vmem:[#allocation17 + $0x448] sm:$0xff] }
 0x147   :  { %275 = vst.msk [vmem:[#allocation2 + $0xc] sm:$0x1] %vm138_vm0, %v273_v0  ;;  %265 = vst.msk [vmem:[#allocation2 + $0xb] sm:$0x1] %vm138_vm0, %v263_v17  ;;  %v3525_v0 = vpack.c.bf16 %v1079_v5, %v1074_v4  ;;  %v1073_v17 = vld [vmem:[#allocation17 + $0x330] sm:$0xff] }
 0x148   :  { %3372 = vmatpush1.bf16.msra.mxu0 %v3371_v9  ;;  %v1056_v9 = vld [vmem:[#allocation17 + $0x2a8] sm:$0xff]  ;;  %v3527_v26 = vpack.c.bf16 %v1078_v18, %v1073_v17  ;;  %v1129_v18 = vld [vmem:[#allocation17 + $0x4f0] sm:$0xff] }
 0x149   :  { %3374 = vmatprep.subr.bf16.mxu0 %v3373_v11  ;;  %3508 = vmatpush1.bf16.msra.mxu1 %v3507_v16  ;;  %v1062_v11 = vld [vmem:[#allocation17 + $0x2d8] sm:$0xff]  ;;  %v1067_v16 = vld [vmem:[#allocation17 + $0x300] sm:$0xff]  ;;  %v3391_v21 = vpack.c.bf16 %v1056_v9, %v1051_v8  ;;  %v1124_v17 = vld [vmem:[#allocation17 + $0x4c8] sm:$0xff] }
 0x14a   :  { %v384_v30 = vpop.permute.xlu1 %383  ;;  %v382_v31 = vpop.permute.xlu0 %381  ;;  %3510 = vmatprep.subr.bf16.mxu1 %v3509_v19  ;;  %v1084_v19 = vld [vmem:[#allocation17 + $0x388] sm:$0xff]  ;;  %v3393_v22 = vpack.c.bf16 %v1067_v16, %v1062_v11  ;;  %v1102_v8 = vld [vmem:[#allocation17 + $0x418] sm:$0xff]  ;;  %v1113_v16 = vld [vmem:[#allocation17 + $0x470] sm:$0xff] }
 0x14b   :  { %v385_v34 = vsel %vm194_vm4, %v382_v31, %v384_v30  ;;  %v3529_v30 = vpack.c.bf16 %v1089_v20, %v1084_v19  ;;  %v1083_v31 = vld [vmem:[#allocation17 + $0x380] sm:$0xff] }
 0x14c   :  { %387 = vst.msk [vmem:[#allocation2 + $0x16] sm:$0x1] %vm138_vm0, %v385_v34  ;;  %3376 = vmatpush1.bf16.msra.mxu0 %v3375_v24  ;;  %v1066_v24 = vld [vmem:[#allocation17 + $0x2f8] sm:$0xff]  ;;  %v3531_v40 = vpack.c.bf16 %v1088_v32, %v1083_v31  ;;  %v1139_v32 = vld [vmem:[#allocation17 + $0x540] sm:$0xff] }
 0x14d   :  { %3378 = vmatprep.subr.bf16.mxu0 %v3377_v25  ;;  %3512 = vmatpush1.bf16.msra.mxu1 %v3511_v29  ;;  %v1072_v25 = vld [vmem:[#allocation17 + $0x328] sm:$0xff]  ;;  %v1077_v29 = vld [vmem:[#allocation17 + $0x350] sm:$0xff]  ;;  %v3395_v34 = vpack.c.bf16 %v1066_v24, %v1061_v23  ;;  %v1134_v31 = vld [vmem:[#allocation17 + $0x518] sm:$0xff] }
 0x14e   :  { %v401_v44 = vpop.permute.xlu1 %400  ;;  %v399_v45 = vpop.permute.xlu0 %398  ;;  %v518_v46 = vld [vmem:[#allocation2 + $0x8] sm:$0xff]  ;;  %3514 = vmatprep.subr.bf16.mxu1 %v3513_v2  ;;  %v3397_v36 = vpack.c.bf16 %v1077_v29, %v1072_v25  ;;  %v1112_v23 = vld [vmem:[#allocation17 + $0x468] sm:$0xff]  ;;  %v1123_v29 = vld [vmem:[#allocation17 + $0x4c0] sm:$0xff] }
 0x14f   :  { %v402_v50 = vsel %vm212_vm3, %v399_v45, %v401_v44  ;;  %3302 = vmatmul.mubr.msk.f32.gmra.mrb[2].mxu0 %vm530_vm7, %v518_v46  ;;  %v3533_v44 = vpack.c.bf16 %v1099_v33, %v1094_v3  ;;  %v1093_v45 = vld [vmem:[#allocation17 + $0x3d0] sm:$0xff]  ;;  %v1098_v46 = vld [vmem:[#allocation17 + $0x3f8] sm:$0xff]  ;;  %v1111_v33 = vld [vmem:[#allocation17 + $0x460] sm:$0xff] }
 0x150   :  { %404 = vst.msk [vmem:[#allocation2 + $0x17] sm:$0x1] %vm138_vm0, %v402_v50  ;;  %3380 = vmatpush1.bf16.msra.mxu0 %v3379_v37  ;;  %3304 = vmatprep.mubr.msk.f32.mxu0 %vm4566_vm1, %v4565_v14  ;;  %v1076_v37 = vld [vmem:[#allocation17 + $0x348] sm:$0xff]  ;;  %v3535_v55 = vpack.c.bf16 %v1098_v46, %v1093_v45 }
 0x151   :  { %3382 = vmatprep.subr.bf16.mxu0 %v3381_v39  ;;  %3516 = vmatpush1.bf16.msra.mxu1 %v3515_v43  ;;  %v1087_v39 = vld [vmem:[#allocation17 + $0x3a0] sm:$0xff]  ;;  %v3399_v50 = vpack.c.bf16 %v1076_v37, %v1071_v35 }
 0x152   :  { %v348_v59 = vpop.permute.xlu1 %347  ;;  %v338_v60 = vpop.permute.xlu0 %337  ;;  %3518 = vmatprep.subr.bf16.mxu1 %v3517_v47  ;;  %v3401_v51 = vpack.c.bf16 %v1087_v39, %v1082_v38  ;;  %v1122_v38 = vld [vmem:[#allocation17 + $0x4b8] sm:$0xff]  ;;  %v1127_v39 = vld [vmem:[#allocation17 + $0x4e0] sm:$0xff] }
 0x153   :  { %350 = vst.msk [vmem:[#allocation2 + $0x13] sm:$0x1] %vm138_vm0, %v348_v59  ;;  %340 = vst.msk [vmem:[#allocation2 + $0x12] sm:$0x1] %vm138_vm0, %v338_v60  ;;  %v3537_v59 = vpack.c.bf16 %v1109_v49, %v1104_v48  ;;  %v1103_v60 = vld [vmem:[#allocation17 + $0x420] sm:$0xff]  ;;  %v1126_v48 = vld [vmem:[#allocation17 + $0x4d8] sm:$0xff] }
 0x154   :  { %3384 = vmatpush1.bf16.msra.mxu0 %v3383_v53  ;;  %v1086_v53 = vld [vmem:[#allocation17 + $0x398] sm:$0xff]  ;;  %v3539_v9 = vpack.c.bf16 %v1108_v61, %v1103_v60  ;;  %v1141_v60 = vld [vmem:[#allocation17 + $0x550] sm:$0xff] }
 0x155   :  { %3386 = vmatprep.subr.bf16.mxu0 %v3385_v54  ;;  %3520 = vmatpush1.bf16.msra.mxu1 %v3519_v58  ;;  %v1092_v54 = vld [vmem:[#allocation17 + $0x3c8] sm:$0xff]  ;;  %v1097_v58 = vld [vmem:[#allocation17 + $0x3f0] sm:$0xff]  ;;  %v3403_v4 = vpack.c.bf16 %v1086_v53, %v1081_v52  ;;  %v1146_v61 = vld [vmem:[#allocation17 + $0x578] sm:$0xff] }
 0x156   :  { %v368_v13 = vpop.permute.xlu1 %367  ;;  %v358_v15 = vpop.permute.xlu0 %357  ;;  %3522 = vmatprep.subr.bf16.mxu1 %v3521_v62  ;;  %v3405_v5 = vpack.c.bf16 %v1097_v58, %v1092_v54  ;;  %v4943_v53 = vld [vmem:[#allocation4 + $0x8] sm:$0xff]  ;;  %v1142_v58 = vld [vmem:[#allocation17 + $0x558] sm:$0xff] }
 0x157   :  { %370 = vst.msk [vmem:[#allocation2 + $0x15] sm:$0x1] %vm138_vm0, %v368_v13  ;;  %360 = vst.msk [vmem:[#allocation2 + $0x14] sm:$0x1] %vm138_vm0, %v358_v15  ;;  %v1107_v13 = vld [vmem:[#allocation17 + $0x440] sm:$0xff]  ;;  %v3541_v15 = vpack.c.bf16 %v1119_v1, %v1114_v63  ;;  %v1133_v63 = vld [vmem:[#allocation17 + $0x510] sm:$0xff] }
 0x158   :  { %3388 = vmatpush1.bf16.msra.mxu0 %v3387_v6  ;;  %v1091_v6 = vld [vmem:[#allocation17 + $0x3c0] sm:$0xff]  ;;  %v3409_v20 = vpack.c.bf16 %v1107_v13, %v1102_v8  ;;  %v1138_v1 = vld [vmem:[#allocation17 + $0x538] sm:$0xff] }
 0x159   :  { %3390 = vmatprep.subr.bf16.mxu0 %v3389_v7  ;;  %3524 = vmatpush1.bf16.msra.mxu1 %v3523_v12  ;;  %v1096_v7 = vld [vmem:[#allocation17 + $0x3e8] sm:$0xff]  ;;  %v3551_v13 = vpack.c.bf16 %v1138_v1, %v1133_v63 }
 0x15a   :  { %v418_v27 = vpop.permute.xlu1 %417  ;;  %v416_v28 = vpop.permute.xlu0 %415  ;;  %3526 = vmatprep.subr.bf16.mxu1 %v3525_v0  ;;  %v1118_v0 = vld [vmem:[#allocation17 + $0x498] sm:$0xff]  ;;  %v3407_v19 = vpack.c.bf16 %v1096_v7, %v1091_v6  ;;  %v1157_v6 = vld [vmem:[#allocation17 + $0x5d0] sm:$0xff]  ;;  %v1144_v7 = vld [vmem:[#allocation17 + $0x568] sm:$0xff] }
 0x15b   :  { %v419_v2 = vsel %vm230_vm5, %v416_v28, %v418_v27  ;;  %v3543_v24 = vpack.c.bf16 %v1118_v0, %v1113_v16  ;;  %v1117_v27 = vld [vmem:[#allocation17 + $0x490] sm:$0xff]  ;;  %v3545_v28 = vpack.c.bf16 %v1129_v18, %v1124_v17  ;;  %v1156_v16 = vld [vmem:[#allocation17 + $0x5c8] sm:$0xff] }
 0x15c   :  { %421 = vst.msk [vmem:[#allocation2 + $0x18] sm:$0x1] %vm138_vm0, %v419_v2  ;;  %3392 = vmatpush1.bf16.msra.mxu0 %v3391_v21  ;;  %v1101_v21 = vld [vmem:[#allocation17 + $0x410] sm:$0xff]  ;;  %v3413_v3 = vpack.c.bf16 %v1117_v27, %v1112_v23  ;;  %v4953_v0 = vld [vmem:[#allocation4 + $0x20] sm:$0xff]  ;;  %v1154_v23 = vld [vmem:[#allocation17 + $0x5b8] sm:$0xff] }
 0x15d   :  { %3394 = vmatprep.subr.bf16.mxu0 %v3393_v22  ;;  %3528 = vmatpush1.bf16.msra.mxu1 %v3527_v26  ;;  %v1106_v22 = vld [vmem:[#allocation17 + $0x438] sm:$0xff] }
 0x15e   :  { %v477_v41 = vpop.permute.xlu1 %476  ;;  %v475_v42 = vpop.permute.xlu0 %474  ;;  %v519_v43 = vld [vmem:[#allocation2 + $0x10] sm:$0xff]  ;;  %3530 = vmatprep.subr.bf16.mxu1 %v3529_v30  ;;  %v1128_v30 = vld [vmem:[#allocation17 + $0x4e8] sm:$0xff]  ;;  %v3411_v2 = vpack.c.bf16 %v1106_v22, %v1101_v21 }
 0x15f   :  { %v478_v47 = vsel %vm194_vm4, %v475_v42, %v477_v41  ;;  %3305 = vmatmul.mubr.msk.f32.gmra.mrb[4].mxu0 %vm530_vm7, %v519_v43  ;;  %v3547_v35 = vpack.c.bf16 %v1128_v30, %v1123_v29  ;;  %v3417_v43 = vpack.c.bf16 %v1127_v39, %v1122_v38  ;;  %v1162_v21 = vld [vmem:[#allocation17 + $0x5f8] sm:$0xff]  ;;  %v1167_v22 = vld [vmem:[#allocation17 + $0x620] sm:$0xff] }
 0x160   :  { %480 = vst.msk [vmem:[#allocation2 + $0x1e] sm:$0x1] %vm138_vm0, %v478_v47  ;;  %3396 = vmatpush1.bf16.msra.mxu0 %v3395_v34  ;;  %3307 = vmatprep.mubr.msk.f32.mxu0 %vm4566_vm1, %v4565_v14  ;;  %v1116_v34 = vld [vmem:[#allocation17 + $0x488] sm:$0xff]  ;;  %v1121_v47 = vld [vmem:[#allocation17 + $0x4b0] sm:$0xff]  ;;  %v1166_v29 = vld [vmem:[#allocation17 + $0x618] sm:$0xff] }
 0x161   :  { %3398 = vmatprep.subr.bf16.mxu0 %v3397_v36  ;;  %3532 = vmatpush1.bf16.msra.mxu1 %v3531_v40  ;;  %v3549_v40 = vpack.c.bf16 %v1139_v32, %v1134_v31  ;;  %v3415_v42 = vpack.c.bf16 %v1116_v34, %v1111_v33  ;;  %v3419_v52 = vpack.c.bf16 %v1126_v48, %v1121_v47  ;;  %v4960_v30 = vld [vmem:[#allocation4 + $0x40] sm:$0x3]  ;;  %v1172_v33 = vld [vmem:[#allocation17 + $0x648] sm:$0xff]  ;;  %v1177_v34 = vld [vmem:[#allocation17 + $0x670] sm:$0xff] }
 0x162   :  { %v494_v56 = vpop.permute.xlu1 %493  ;;  %v492_v57 = vpop.permute.xlu0 %491  ;;  %3534 = vmatprep.subr.bf16.mxu1 %v3533_v44  ;;  %v3433_v31 = vpack.c.bf16 %v1167_v22, %v1162_v21  ;;  %v1187_v47 = vld [vmem:[#allocation17 + $0x6c0] sm:$0xff]  ;;  %v1174_v48 = vld [vmem:[#allocation17 + $0x658] sm:$0xff]  ;;  %v1193_v21 = vld [vmem:[#allocation17 + $0x6f0] sm:$0xff] }
 0x163   :  { %v495_v62 = vsel %vm212_vm3, %v492_v57, %v494_v56  ;;  %v1136_v56 = vld [vmem:[#allocation17 + $0x528] sm:$0xff] }
 0x164   :  { %497 = vst.msk [vmem:[#allocation2 + $0x1f] sm:$0x1] %vm138_vm0, %v495_v62  ;;  %3400 = vmatpush1.bf16.msra.mxu0 %v3399_v50  ;;  %v1132_v50 = vld [vmem:[#allocation17 + $0x508] sm:$0xff] }
 0x165   :  { %3402 = vmatprep.subr.bf16.mxu0 %v3401_v51  ;;  %3536 = vmatpush1.bf16.msra.mxu1 %v3535_v55  ;;  %v1137_v51 = vld [vmem:[#allocation17 + $0x530] sm:$0xff]  ;;  %v1131_v55 = vld [vmem:[#allocation17 + $0x500] sm:$0xff] }
 0x166   :  { %v441_v11 = vpop.permute.xlu1 %440  ;;  %v431_v12 = vpop.permute.xlu0 %430  ;;  %3538 = vmatprep.subr.bf16.mxu1 %v3537_v59  ;;  %v3421_v54 = vpack.c.bf16 %v1137_v51, %v1132_v50  ;;  %v1147_v59 = vld [vmem:[#allocation17 + $0x580] sm:$0xff] }
 0x167   :  { %443 = vst.msk [vmem:[#allocation2 + $0x1b] sm:$0x1] %vm138_vm0, %v441_v11  ;;  %433 = vst.msk [vmem:[#allocation2 + $0x1a] sm:$0x1] %vm138_vm0, %v431_v12  ;;  %v4947_v62 = vld [vmem:[#allocation4] sm:$0xff]  ;;  %v4949_v11 = vld [vmem:[#allocation4 + $0x28] sm:$0xff]  ;;  %v3427_v12 = vpack.c.bf16 %v1146_v61, %v1141_v60 }
 0x168   :  { %3404 = vmatpush1.bf16.msra.mxu0 %v3403_v4  ;;  %v3425_v4 = vpack.c.bf16 %v1147_v59, %v1142_v58  ;;  %v1178_v58 = vld [vmem:[#allocation17 + $0x678] sm:$0xff]  ;;  %v1192_v59 = vld [vmem:[#allocation17 + $0x6e8] sm:$0xff]  ;;  %v1197_v60 = vld [vmem:[#allocation17 + $0x710] sm:$0xff] }
 0x169   :  { %3406 = vmatprep.subr.bf16.mxu0 %v3405_v5  ;;  %3540 = vmatpush1.bf16.msra.mxu1 %v3539_v9  ;;  %v1152_v5 = vld [vmem:[#allocation17 + $0x5a8] sm:$0xff]  ;;  %v1149_v9 = vld [vmem:[#allocation17 + $0x590] sm:$0xff] }
 0x16a   :  { %v461_v25 = vpop.permute.xlu1 %460  ;;  %v451_v26 = vpop.permute.xlu0 %450  ;;  %3542 = vmatprep.subr.bf16.mxu1 %v3541_v15  ;;  %v1151_v15 = vld [vmem:[#allocation17 + $0x5a0] sm:$0xff]  ;;  %v3429_v17 = vpack.c.bf16 %v1157_v6, %v1152_v5  ;;  %v3553_v18 = vpack.c.bf16 %v1149_v9, %v1144_v7  ;;  %v1184_v61 = vld [vmem:[#allocation17 + $0x6a8] sm:$0xff]  ;;  %v3445_v6 = vpack.c.bf16 %v1197_v60, %v1192_v59  ;;  %v1237_v60 = vld [vmem:[#allocation17 + $0x850] sm:$0xff] }
 0x16b   :  { %463 = vst.msk [vmem:[#allocation2 + $0x1d] sm:$0x1] %vm138_vm0, %v461_v25  ;;  %453 = vst.msk [vmem:[#allocation2 + $0x1c] sm:$0x1] %vm138_vm0, %v451_v26  ;;  %v4958_v25 = vld [vmem:[#allocation4 + $0x48] sm:$0x3]  ;;  %v3431_v26 = vpack.c.bf16 %v1156_v16, %v1151_v15 }
 0x16c   :  { %3408 = vmatpush1.bf16.msra.mxu0 %v3407_v19  ;;  %v1143_v19 = vld [vmem:[#allocation17 + $0x560] sm:$0xff]  ;;  %v1196_v5 = vld [vmem:[#allocation17 + $0x708] sm:$0xff]  ;;  %v1194_v15 = vld [vmem:[#allocation17 + $0x6f8] sm:$0xff] }
 0x16d   :  { %3410 = vmatprep.subr.bf16.mxu0 %v3409_v20  ;;  %3544 = vmatpush1.bf16.msra.mxu1 %v3543_v24  ;;  %v1148_v20 = vld [vmem:[#allocation17 + $0x588] sm:$0xff]  ;;  %v1159_v24 = vld [vmem:[#allocation17 + $0x5e0] sm:$0xff] }
 0x16e   :  { %v511_v36 = vpop.permute.xlu1 %510  ;;  %v509_v37 = vpop.permute.xlu0 %508  ;;  %3546 = vmatprep.subr.bf16.mxu1 %v3545_v28  ;;  %v3555_v27 = vpack.c.bf16 %v1148_v20, %v1143_v19  ;;  %v1161_v28 = vld [vmem:[#allocation17 + $0x5f0] sm:$0xff]  ;;  %v3557_v32 = vpack.c.bf16 %v1159_v24, %v1154_v23  ;;  %v1188_v9 = vld [vmem:[#allocation17 + $0x6c8] sm:$0xff]  ;;  %v1199_v16 = vld [vmem:[#allocation17 + $0x720] sm:$0xff] }
 0x16f   :  { %v512_v41 = vsel %vm230_vm5, %v509_v37, %v511_v36  ;;  %v1169_v36 = vld [vmem:[#allocation17 + $0x630] sm:$0xff]  ;;  %v4966_v37 = vld [vmem:[#allocation4 + $0x18] sm:$0xff]  ;;  %v3435_v38 = vpack.c.bf16 %v1166_v29, %v1161_v28  ;;  %v3573_v23 = vpack.c.bf16 %v1199_v16, %v1194_v15  ;;  %v1204_v28 = vld [vmem:[#allocation17 + $0x748] sm:$0xff] }
 0x170   :  { %514 = vst.msk [vmem:[#allocation2 + $0x20] sm:$0x1] %vm138_vm0, %v512_v41  ;;  %3412 = vmatpush1.bf16.msra.mxu0 %v3411_v2  ;;  %v1153_v2 = vld [vmem:[#allocation17 + $0x5b0] sm:$0xff]  ;;  %v1176_v41 = vld [vmem:[#allocation17 + $0x668] sm:$0xff]  ;;  %v1206_v20 = vld [vmem:[#allocation17 + $0x758] sm:$0xff] }
 0x171   :  { %3414 = vmatprep.subr.bf16.mxu0 %v3413_v3  ;;  %3548 = vmatpush1.bf16.msra.mxu1 %v3547_v35  ;;  %v1158_v3 = vld [vmem:[#allocation17 + $0x5d8] sm:$0xff]  ;;  %v1164_v35 = vld [vmem:[#allocation17 + $0x608] sm:$0xff]  ;;  %v1201_v19 = vld [vmem:[#allocation17 + $0x730] sm:$0xff] }
 0x172   :  { %v746_v44 = vpop.permute.xlu1 %745  ;;  %v744_v45 = vpop.permute.xlu0 %743  ;;  %v520_v46 = vld [vmem:[#allocation2 + $0x18] sm:$0xff]  ;;  %3550 = vmatprep.subr.bf16.mxu1 %v3549_v40  ;;  %v3559_v39 = vpack.c.bf16 %v1158_v3, %v1153_v2  ;;  %v1198_v24 = vld [vmem:[#allocation17 + $0x718] sm:$0xff]  ;;  %v1209_v29 = vld [vmem:[#allocation17 + $0x770] sm:$0xff]  ;;  %v3451_v3 = vpack.c.bf16 %v1206_v20, %v1201_v19 }
 0x173   :  { %v747_v49 = vsel %vm212_vm3, %v744_v45, %v746_v44  ;;  %3308 = vmatmul.mubr.msk.f32.gmra.mrb[6].mxu0 %vm530_vm7, %v520_v46  ;;  %v1171_v40 = vld [vmem:[#allocation17 + $0x640] sm:$0xff]  ;;  %v1168_v45 = vld [vmem:[#allocation17 + $0x628] sm:$0xff]  ;;  %v1182_v46 = vld [vmem:[#allocation17 + $0x698] sm:$0xff] }
 0x174   :  { %749 = vst [vmem:[#allocation3 + $0x8] sm:$0x1] %v747_v49  ;;  %3416 = vmatpush1.bf16.msra.mxu0 %v3415_v42  ;;  %3310 = vmatprep.mubr.msk.f32.mxu0 %vm4566_vm1, %v4565_v14  ;;  %v3423_v14 = vpack.c.bf16 %v1136_v56, %v1131_v55  ;;  %v3437_v42 = vpack.c.bf16 %v1177_v34, %v1172_v33  ;;  %v1163_v44 = vld [vmem:[#allocation17 + $0x600] sm:$0xff]  ;;  %v1807_v2 = vld [vmem:[#allocation12 + $0x4] ss:$2 sm:$0xf] }
 0x175   :  { %3418 = vmatprep.subr.bf16.mxu0 %v3417_v43  ;;  %v3561_v43 = vpack.c.bf16 %v1169_v36, %v1164_v35  ;;  %v1179_v49 = vld [vmem:[#allocation17 + $0x680] sm:$0xff]  ;;  %v3439_v50 = vpack.c.bf16 %v1176_v41, %v1171_v40  ;;  %v3563_v51 = vpack.c.bf16 %v1168_v45, %v1163_v44  ;;  %v3441_v55 = vpack.c.bf16 %v1187_v47, %v1182_v46  ;;  %v1216_v35 = vld [vmem:[#allocation17 + $0x7a8] sm:$0xff]  ;;  %v1222_v41 = vld [vmem:[#allocation17 + $0x7d8] sm:$0xff] }
 0x176   :  { %v3565_v56 = vpack.c.bf16 %v1179_v49, %v1174_v48  ;;  %v3575_v33 = vpack.c.bf16 %v1198_v24, %v1193_v21  ;;  %v1211_v34 = vld [vmem:[#allocation17 + $0x780] sm:$0xff]  ;;  %1809 = vst.msk [vmem:[#allocation5 + $0x2] ss:$8 sm:$0xf] %vm4832_vm2, %v1807_v2  ;;  %v1208_v40 = vld [vmem:[#allocation17 + $0x768] sm:$0xff]  ;;  %v1221_v46 = vld [vmem:[#allocation17 + $0x7d0] sm:$0xff] }
 0x177   :  { %v521_v57 = vld [vmem:[#allocation2 + $0x20] sm:$0x3]  ;;  %v1203_v36 = vld [vmem:[#allocation17 + $0x740] sm:$0xff]  ;;  %v1226_v47 = vld [vmem:[#allocation17 + $0x7f8] sm:$0xff] }
 0x178   :  { %3311 = vmatmul.mubr.msk.f32.gmra.mrb[8].mxu0 %vm530_vm7, %v521_v57  ;;  %v1173_v57 = vld [vmem:[#allocation17 + $0x650] sm:$0xff]  ;;  %v1219_v44 = vld [vmem:[#allocation17 + $0x7c0] sm:$0xff]  ;;  %v1232_v59 = vld [vmem:[#allocation17 + $0x828] sm:$0xff] }
 0x179   :  { %3420 = vmatpush1.bf16.msra.mxu0 %v3419_v52  ;;  %1355 = vmatprep.mubr.f32.mxu0 %v4943_v53  ;;  %v1181_v52 = vld [vmem:[#allocation17 + $0x690] sm:$0xff]  ;;  %v3567_v1 = vpack.c.bf16 %v1178_v58, %v1173_v57  ;;  %v1218_v58 = vld [vmem:[#allocation17 + $0x7b8] sm:$0xff]  ;;  %v1239_v16 = vld [vmem:[#allocation17 + $0x860] sm:$0xff] }
 0x17a   :  { %3422 = vmatprep.subr.bf16.mxu0 %v3421_v54  ;;  %v1186_v54 = vld [vmem:[#allocation17 + $0x6b8] sm:$0xff]  ;;  %v1812_v45 = vld [vmem:[#allocation12 + $0x6] ss:$2 sm:$0xf]  ;;  %v1251_v2 = vld [vmem:[#allocation17 + $0x8c0] sm:$0xff] }
 0x17b   :  { %v753_v8 = vld [vmem:[#allocation3 + $0x8] sm:$0x3]  ;;  %v3443_v63 = vpack.c.bf16 %v1186_v54, %v1181_v52  ;;  %1814 = vst.msk [vmem:[#allocation5 + $0x3] ss:$8 sm:$0xf] %vm4832_vm2, %v1812_v45  ;;  %v1213_v57 = vld [vmem:[#allocation17 + $0x790] sm:$0xff] }
 0x17c   :  { %857 = vmatmul.mubr.f32.gmra.mrb[2].mxu1 %v753_v8  ;;  %1356 = vmatmul.mubr.f32.vlgmr.msra.gmra.mrb[10].mxu0 %v4947_v62  ;;  %v1183_v8 = vld [vmem:[#allocation17 + $0x6a0] sm:$0xff]  ;;  %v1817_v48 = vld [vmem:[#allocation12 + $0x8] ss:$2 sm:$0xf]  ;;  %v1234_v15 = vld [vmem:[#allocation17 + $0x838] sm:$0xff] }
 0x17d   :  { %3424 = vmatpush1.bf16.msra.mxu0 %v3423_v14  ;;  %1521 = vmatprep.mubr.f32.mxu1 %v4943_v53  ;;  %v1189_v14 = vld [vmem:[#allocation17 + $0x6d0] sm:$0xff]  ;;  %1819 = vst.msk [vmem:[#allocation5 + $0x4] ss:$8 sm:$0xf] %vm4832_vm2, %v1817_v48  ;;  %v1246_v20 = vld [vmem:[#allocation17 + $0x898] sm:$0xff] }
 0x17e   :  { %3426 = vmatprep.subr.bf16.mxu0 %v3425_v4  ;;  %1361 = vmatprep.mubr.f32.mxu0 %v4949_v11  ;;  %v1191_v4 = vld [vmem:[#allocation17 + $0x6e0] sm:$0xff]  ;;  %v3569_v7 = vpack.c.bf16 %v1189_v14, %v1184_v61  ;;  %v1822_v49 = vld [vmem:[#allocation12 + $0xa] ss:$2 sm:$0xf]  ;;  %v1224_v61 = vld [vmem:[#allocation17 + $0x7e8] sm:$0xff] }
 0x17f   :  { %1824 = vst.msk [vmem:[#allocation5 + $0x5] ss:$8 sm:$0xf] %vm4832_vm2, %v1822_v49  ;;  %v1827_v52 = vld [vmem:[#allocation12 + $0xc] ss:$2 sm:$0xf] }
 0x180   :  { %1522 = vmatmul.mubr.f32.vlgmr.msra.gmra.mrb[4].mxu1 %v4947_v62  ;;  %1362 = vmatmul.mubr.f32.gmra.mrb[12].mxu0 %v4953_v0  ;;  %v1832_v54 = vld [vmem:[#allocation12 + $0xe] ss:$2 sm:$0xf]  ;;  %1829 = vst.msk [vmem:[#allocation5 + $0x6] ss:$8 sm:$0xf] %vm4832_vm2, %v1827_v52 }
 0x181   :  { %3428 = vmatpush1.bf16.msra.mxu0 %v3427_v12  ;;  %3552 = vmatpush1.bf16.msra.mxu1 %v3551_v13  ;;  %v1202_v12 = vld [vmem:[#allocation17 + $0x738] sm:$0xff]  ;;  %v1207_v13 = vld [vmem:[#allocation17 + $0x760] sm:$0xff]  ;;  %1834 = vst.msk [vmem:[#allocation5 + $0x7] ss:$8 sm:$0xf] %vm4832_vm2, %v1832_v54  ;;  %v1229_v14 = vld [vmem:[#allocation17 + $0x810] sm:$0xff] }
 0x182   :  { %3430 = vmatprep.subr.bf16.mxu0 %v3429_v17  ;;  %3554 = vmatprep.subr.bf16.mxu1 %v3553_v18  ;;  %v3447_v17 = vpack.c.bf16 %v1196_v5, %v1191_v4  ;;  %v3571_v18 = vpack.c.bf16 %v1188_v9, %v1183_v8  ;;  %v3449_v22 = vpack.c.bf16 %v1207_v13, %v1202_v12  ;;  %v1231_v4 = vld [vmem:[#allocation17 + $0x820] sm:$0xff]  ;;  %v1236_v5 = vld [vmem:[#allocation17 + $0x848] sm:$0xff]  ;;  %v1242_v12 = vld [vmem:[#allocation17 + $0x878] sm:$0xff] }
 0x183   :  { %1367 = vmatprep.mubr.f32.mxu0 %v4958_v25  ;;  %1527 = vmatprep.mubr.f32.mxu1 %v4949_v11  ;;  %v1223_v8 = vld [vmem:[#allocation17 + $0x7e0] sm:$0xff]  ;;  %v1228_v9 = vld [vmem:[#allocation17 + $0x808] sm:$0xff]  ;;  %v1241_v19 = vld [vmem:[#allocation17 + $0x870] sm:$0xff] }
 0x184   :  { %1368 = vmatmul.mubr.f32.gmra.mrb[14].mxu0 %v4960_v30  ;;  %1528 = vmatmul.mubr.f32.gmra.mrb[6].mxu1 %v4953_v0  ;;  %v1247_v13 = vld [vmem:[#allocation17 + $0x8a0] sm:$0xff]  ;;  %v1238_v24 = vld [vmem:[#allocation17 + $0x858] sm:$0xff]  ;;  %v1253_v48 = vld [vmem:[#allocation17 + $0x8d0] sm:$0xff] }
 0x185   :  { %3432 = vmatpush1.bf16.msra.mxu0 %v3431_v26  ;;  %3556 = vmatpush1.bf16.msra.mxu1 %v3555_v27  ;;  %v1212_v26 = vld [vmem:[#allocation17 + $0x788] sm:$0xff]  ;;  %v1217_v27 = vld [vmem:[#allocation17 + $0x7b0] sm:$0xff]  ;;  %v3465_v21 = vpack.c.bf16 %v1247_v13, %v1242_v12  ;;  %v1266_v45 = vld [vmem:[#allocation17 + $0x938] sm:$0xff] }
 0x186   :  { %3434 = vmatprep.subr.bf16.mxu0 %v3433_v31  ;;  %3558 = vmatprep.subr.bf16.mxu1 %v3557_v32  ;;  %v1798_v31 = vld [vmem:[#allocation12] ss:$2 sm:$0xf]  ;;  %v1258_v49 = vld [vmem:[#allocation17 + $0x8f8] sm:$0xff]  ;;  %v1269_v54 = vld [vmem:[#allocation17 + $0x950] sm:$0xff] }
 0x187   :  { %1438 = vmatprep.mubr.f32.mxu0 %v4966_v37  ;;  %1533 = vmatprep.mubr.f32.mxu1 %v4958_v25  ;;  %1799 = vst.msk [vmem:[#allocation5] ss:$8 sm:$0xf] %vm4832_vm2, %v1798_v31  ;;  %v1802_v32 = vld [vmem:[#allocation12 + $0x2] ss:$2 sm:$0xf]  ;;  %v3467_v31 = vpack.c.bf16 %v1246_v20, %v1241_v19 }
 0x188   :  { %1534 = vmatmul.mubr.f32.gmra.mrb[8].mxu1 %v4960_v30  ;;  %1804 = vst.msk [vmem:[#allocation5 + $0x1] ss:$8 sm:$0xf] %vm4832_vm2, %v1802_v32  ;;  %v1264_v52 = vld [vmem:[#allocation17 + $0x928] sm:$0xff]  ;;  %v1055_v19 = vld [vmem:[#allocation17 + $0x2a0] sm:$0xff] }
 0x189   :  { %3436 = vmatpush1.bf16.msra.mxu0 %v3435_v38  ;;  %3560 = vmatpush1.bf16.msra.mxu1 %v3559_v39  ;;  %v3453_v38 = vpack.c.bf16 %v1217_v27, %v1212_v26  ;;  %v3577_v39 = vpack.c.bf16 %v1209_v29, %v1204_v28  ;;  %v1252_v26 = vld [vmem:[#allocation17 + $0x8c8] sm:$0xff]  ;;  %v1257_v27 = vld [vmem:[#allocation17 + $0x8f0] sm:$0xff] }
 0x18a   :  { %3438 = vmatprep.subr.bf16.mxu0 %v3437_v42  ;;  %3562 = vmatprep.subr.bf16.mxu1 %v3561_v43  ;;  %v1227_v42 = vld [vmem:[#allocation17 + $0x800] sm:$0xff]  ;;  %v1214_v43 = vld [vmem:[#allocation17 + $0x798] sm:$0xff]  ;;  %v1244_v28 = vld [vmem:[#allocation17 + $0x888] sm:$0xff] }
 0x18b   :  { %1604 = vmatprep.mubr.f32.mxu1 %v4966_v37  ;;  %v1249_v29 = vld [vmem:[#allocation17 + $0x8b0] sm:$0xff]  ;;  %v1060_v20 = vld [vmem:[#allocation17 + $0x2c8] sm:$0xff] }
 0x18d   :  { %3440 = vmatpush1.bf16.msra.mxu0 %v3439_v50  ;;  %3564 = vmatpush1.bf16.msra.mxu1 %v3563_v51  ;;  %v3455_v50 = vpack.c.bf16 %v1216_v35, %v1211_v34  ;;  %v3579_v51 = vpack.c.bf16 %v1208_v40, %v1203_v36  ;;  %v3593_v34 = vpack.c.bf16 %v1249_v29, %v1244_v28  ;;  %v1243_v35 = vld [vmem:[#allocation17 + $0x880] sm:$0xff]  ;;  %v1248_v36 = vld [vmem:[#allocation17 + $0x8a8] sm:$0xff]  ;;  %v1254_v40 = vld [vmem:[#allocation17 + $0x8d8] sm:$0xff] }
 0x18e   :  { %3442 = vmatprep.subr.bf16.mxu0 %v3441_v55  ;;  %3566 = vmatprep.subr.bf16.mxu1 %v3565_v56  ;;  %v3457_v55 = vpack.c.bf16 %v1227_v42, %v1222_v41  ;;  %v3581_v56 = vpack.c.bf16 %v1219_v44, %v1214_v43  ;;  %v1259_v41 = vld [vmem:[#allocation17 + $0x900] sm:$0xff]  ;;  %v3595_v43 = vpack.c.bf16 %v1248_v36, %v1243_v35  ;;  %v1261_v44 = vld [vmem:[#allocation17 + $0x910] sm:$0xff]  ;;  %v980_v29 = vld [vmem:[#allocation17 + $0x48] sm:$0xff] }
 0x18f   :  { %v975_v28 = vld [vmem:[#allocation17 + $0x20] sm:$0xff]  ;;  %v985_v36 = vld [vmem:[#allocation17 + $0x70] sm:$0xff] }
 0x190   :  { %v3615_v35 = vpack.c.bf16 %v980_v29, %v975_v28  ;;  %v1110_v28 = vld [vmem:[#allocation17 + $0x458] sm:$0xff]  ;;  %v1255_v29 = vld [vmem:[#allocation17 + $0x8e0] sm:$0xff] }
 0x191   :  { %3444 = vmatpush1.bf16.msra.mxu0 %v3443_v63  ;;  %3568 = vmatpush1.bf16.msra.mxu1 %v3567_v1  ;;  %v3459_v63 = vpack.c.bf16 %v1226_v47, %v1221_v46  ;;  %v3583_v1 = vpack.c.bf16 %v1218_v58, %v1213_v57  ;;  %v3597_v47 = vpack.c.bf16 %v1259_v41, %v1254_v40  ;;  %v1271_v57 = vld [vmem:[#allocation17 + $0x960] sm:$0xff]  ;;  %v1276_v58 = vld [vmem:[#allocation17 + $0x988] sm:$0xff] }
 0x192   :  { %3446 = vmatprep.subr.bf16.mxu0 %v3445_v6  ;;  %3570 = vmatprep.subr.bf16.mxu1 %v3569_v7  ;;  %v3461_v6 = vpack.c.bf16 %v1237_v60, %v1232_v59  ;;  %v3585_v7 = vpack.c.bf16 %v1229_v14, %v1224_v61  ;;  %v3601_v60 = vpack.c.bf16 %v1269_v54, %v1264_v52  ;;  %v1263_v61 = vld [vmem:[#allocation17 + $0x920] sm:$0xff]  ;;  %v1268_v14 = vld [vmem:[#allocation17 + $0x948] sm:$0xff]  ;;  %v1145_v54 = vld [vmem:[#allocation17 + $0x570] sm:$0xff] }
 0x193   :  { %v1135_v40 = vld [vmem:[#allocation17 + $0x520] sm:$0xff]  ;;  %v1140_v41 = vld [vmem:[#allocation17 + $0x548] sm:$0xff] }
 0x194   :  { %v1000_v52 = vld [vmem:[#allocation17 + $0xe8] sm:$0xff] }
 0x195   :  { %3448 = vmatpush1.bf16.msra.mxu0 %v3447_v17  ;;  %3572 = vmatpush1.bf16.msra.mxu1 %v3571_v18  ;;  %v3463_v17 = vpack.c.bf16 %v1236_v5, %v1231_v4  ;;  %v3587_v18 = vpack.c.bf16 %v1228_v9, %v1223_v8  ;;  %v1274_v4 = vld [vmem:[#allocation17 + $0x978] sm:$0xff]  ;;  %v1279_v5 = vld [vmem:[#allocation17 + $0x9a0] sm:$0xff]  ;;  %v1281_v8 = vld [vmem:[#allocation17 + $0x9b0] sm:$0xff] }
 0x196   :  { %3450 = vmatprep.subr.bf16.mxu0 %v3449_v22  ;;  %3574 = vmatprep.subr.bf16.mxu1 %v3573_v23  ;;  %v3589_v22 = vpack.c.bf16 %v1239_v16, %v1234_v15  ;;  %v1233_v23 = vld [vmem:[#allocation17 + $0x830] sm:$0xff]  ;;  %v1286_v9 = vld [vmem:[#allocation17 + $0x9d8] sm:$0xff]  ;;  %v3605_v13 = vpack.c.bf16 %v1279_v5, %v1274_v4 }
 0x197   :  { %v3591_v32 = vpack.c.bf16 %v1238_v24, %v1233_v23  ;;  %v1273_v15 = vld [vmem:[#allocation17 + $0x970] sm:$0xff]  ;;  %v1278_v16 = vld [vmem:[#allocation17 + $0x998] sm:$0xff]  ;;  %v1283_v23 = vld [vmem:[#allocation17 + $0x9c0] sm:$0xff] }
 0x198   :  { %v1005_v5 = vld [vmem:[#allocation17 + $0x110] sm:$0xff] }
 0x199   :  { %3452 = vmatpush1.bf16.msra.mxu0 %v3451_v3  ;;  %3576 = vmatpush1.bf16.msra.mxu1 %v3575_v33  ;;  %v1256_v3 = vld [vmem:[#allocation17 + $0x8e8] sm:$0xff]  ;;  %v3469_v33 = vpack.c.bf16 %v1257_v27, %v1252_v26  ;;  %v3613_v26 = vpack.c.bf16 %v1060_v20, %v1055_v19  ;;  %v1015_v20 = vld [vmem:[#allocation17 + $0x160] sm:$0xff] }
 0x19a   :  { %3454 = vmatprep.subr.bf16.mxu0 %v3453_v38  ;;  %3578 = vmatprep.subr.bf16.mxu1 %v3577_v39  ;;  %v1262_v38 = vld [vmem:[#allocation17 + $0x918] sm:$0xff]  ;;  %v1267_v39 = vld [vmem:[#allocation17 + $0x940] sm:$0xff]  ;;  %v3471_v42 = vpack.c.bf16 %v1256_v3, %v1251_v2  ;;  %v1288_v27 = vld [vmem:[#allocation17 + $0x9e8] sm:$0xff] }
 0x19b   :  { %v3473_v46 = vpack.c.bf16 %v1267_v39, %v1262_v38  ;;  %v1215_v2 = vld [vmem:[#allocation17 + $0x7a0] sm:$0xff]  ;;  %v1220_v3 = vld [vmem:[#allocation17 + $0x7c8] sm:$0xff]  ;;  %v990_v39 = vld [vmem:[#allocation17 + $0x98] sm:$0xff] }
 0x19d   :  { %3456 = vmatpush1.bf16.msra.mxu0 %v3455_v50  ;;  %3580 = vmatpush1.bf16.msra.mxu1 %v3579_v51  ;;  %v1272_v50 = vld [vmem:[#allocation17 + $0x968] sm:$0xff]  ;;  %v1277_v51 = vld [vmem:[#allocation17 + $0x990] sm:$0xff] }
 0x19e   :  { %3458 = vmatprep.subr.bf16.mxu0 %v3457_v55  ;;  %3582 = vmatprep.subr.bf16.mxu1 %v3581_v56  ;;  %v3475_v55 = vpack.c.bf16 %v1266_v45, %v1261_v44  ;;  %v3599_v56 = vpack.c.bf16 %v1258_v49, %v1253_v48  ;;  %v3477_v59 = vpack.c.bf16 %v1277_v51, %v1272_v50  ;;  %v1075_v44 = vld [vmem:[#allocation17 + $0x340] sm:$0xff]  ;;  %v1080_v45 = vld [vmem:[#allocation17 + $0x368] sm:$0xff]  ;;  %v4993_v48 = vld [vmem:[#allocation4 + $0x30] sm:$0xff] }
 0x19f   :  { %v3619_v49 = vpack.c.bf16 %v990_v39, %v985_v36  ;;  %v3647_v50 = vpack.c.bf16 %v1140_v41, %v1135_v40  ;;  %v995_v51 = vld [vmem:[#allocation17 + $0xc0] sm:$0xff]  ;;  %v1180_v39 = vld [vmem:[#allocation17 + $0x688] sm:$0xff] }
 0x1a0   :  { %v1115_v40 = vld [vmem:[#allocation17 + $0x480] sm:$0xff]  ;;  %v1120_v41 = vld [vmem:[#allocation17 + $0x4a8] sm:$0xff] }
 0x1a1   :  { %3460 = vmatpush1.bf16.msra.mxu0 %v3459_v63  ;;  %3584 = vmatpush1.bf16.msra.mxu1 %v3583_v1  ;;  %v1282_v63 = vld [vmem:[#allocation17 + $0x9b8] sm:$0xff]  ;;  %v1287_v1 = vld [vmem:[#allocation17 + $0x9e0] sm:$0xff] }
 0x1a2   :  { %3462 = vmatprep.subr.bf16.mxu0 %v3461_v6  ;;  %3586 = vmatprep.subr.bf16.mxu1 %v3585_v7  ;;  %v3479_v6 = vpack.c.bf16 %v1276_v58, %v1271_v57  ;;  %v3603_v7 = vpack.c.bf16 %v1268_v14, %v1263_v61  ;;  %v3481_v12 = vpack.c.bf16 %v1287_v1, %v1282_v63  ;;  %v1235_v61 = vld [vmem:[#allocation17 + $0x840] sm:$0xff]  ;;  %v1240_v14 = vld [vmem:[#allocation17 + $0x868] sm:$0xff]  ;;  %v5000_v63 = vld [vmem:[#allocation4 + $0x50] sm:$0x3] }
 0x1a3   :  { %v3621_v57 = vpack.c.bf16 %v1080_v45, %v1075_v44  ;;  %v3623_v1 = vpack.c.bf16 %v1000_v52, %v995_v51  ;;  %v1270_v44 = vld [vmem:[#allocation17 + $0x958] sm:$0xff]  ;;  %v1842_v45 = vld [vmem:[#allocation12 + $0x1] ss:$2 sm:$0xf]  ;;  %v1185_v52 = vld [vmem:[#allocation17 + $0x6b0] sm:$0xff] }
 0x1a4   :  { %v1040_v51 = vld [vmem:[#allocation17 + $0x228] sm:$0xff]  ;;  %1844 = vst.msk [vmem:[#allocation5 + $0x21] ss:$8 sm:$0xf] %vm4832_vm2, %v1842_v45 }
 0x1a5   :  { %3464 = vmatpush1.bf16.msra.mxu0 %v3463_v17  ;;  %3588 = vmatpush1.bf16.msra.mxu1 %v3587_v18  ;;  %v1284_v17 = vld [vmem:[#allocation17 + $0x9c8] sm:$0xff]  ;;  %v1289_v18 = vld [vmem:[#allocation17 + $0x9f0] sm:$0xff] }
 0x1a6   :  { %3466 = vmatprep.subr.bf16.mxu0 %v3465_v21  ;;  %3590 = vmatprep.subr.bf16.mxu1 %v3589_v22  ;;  %v3483_v21 = vpack.c.bf16 %v1286_v9, %v1281_v8  ;;  %v3607_v22 = vpack.c.bf16 %v1278_v16, %v1273_v15  ;;  %v3609_v24 = vpack.c.bf16 %v1289_v18, %v1284_v17  ;;  %v1155_v8 = vld [vmem:[#allocation17 + $0x5c0] sm:$0xff]  ;;  %v1160_v9 = vld [vmem:[#allocation17 + $0x5e8] sm:$0xff]  ;;  %v1245_v16 = vld [vmem:[#allocation17 + $0x890] sm:$0xff] }
 0x1a7   :  { %v1100_v15 = vld [vmem:[#allocation17 + $0x408] sm:$0xff]  ;;  %v1250_v17 = vld [vmem:[#allocation17 + $0x8b8] sm:$0xff]  ;;  %v3655_v19 = vpack.c.bf16 %v1160_v9, %v1155_v8 }
 0x1a8   :  { %v1867_v8 = vld [vmem:[#allocation12 + $0xb] ss:$2 sm:$0xf]  ;;  %v1931_v45 = vld [vmem:[#allocation18 + $0x108] sm:$0xff] }
 0x1a9   :  { %3468 = vmatpush1.bf16.msra.mxu0 %v3467_v31  ;;  %3592 = vmatpush1.bf16.msra.mxu1 %v3591_v32  ;;  %v1065_v31 = vld [vmem:[#allocation17 + $0x2f0] sm:$0xff]  ;;  %v1070_v32 = vld [vmem:[#allocation17 + $0x318] sm:$0xff]  ;;  %1869 = vst.msk [vmem:[#allocation5 + $0x26] ss:$8 sm:$0xf] %vm4832_vm2, %v1867_v8 }
 0x1aa   :  { %3470 = vmatprep.subr.bf16.mxu0 %v3469_v33  ;;  %3594 = vmatprep.subr.bf16.mxu1 %v3593_v34  ;;  %v4988_v33 = vld [vmem:[#allocation4 + $0x10] sm:$0xff]  ;;  %v3611_v34 = vpack.c.bf16 %v1288_v27, %v1283_v23  ;;  %v3617_v38 = vpack.c.bf16 %v1070_v32, %v1065_v31  ;;  %v3657_v23 = vpack.c.bf16 %v1250_v17, %v1245_v16  ;;  %v1260_v31 = vld [vmem:[#allocation17 + $0x908] sm:$0xff] }
 0x1ab   :  { %v1105_v27 = vld [vmem:[#allocation17 + $0x430] sm:$0xff]  ;;  %v1200_v16 = vld [vmem:[#allocation17 + $0x728] sm:$0xff] }
 0x1ac   :  { %v3633_v36 = vpack.c.bf16 %v1110_v28, %v1105_v27  ;;  %v1872_v9 = vld [vmem:[#allocation12 + $0xd] ss:$2 sm:$0xf] }
 0x1ad   :  { %3472 = vmatpush1.bf16.msra.mxu0 %v3471_v42  ;;  %3596 = vmatpush1.bf16.msra.mxu1 %v3595_v43  ;;  %v4990_v42 = vld [vmem:[#allocation4 + $0x38] sm:$0xff]  ;;  %v3645_v43 = vpack.c.bf16 %v1220_v3, %v1215_v2  ;;  %v1025_v3 = vld [vmem:[#allocation17 + $0x1b0] sm:$0xff]  ;;  %1874 = vst.msk [vmem:[#allocation5 + $0x27] ss:$8 sm:$0xf] %vm4832_vm2, %v1872_v9  ;;  %v1963_v9 = vld [vmem:[#allocation18 + $0x208] sm:$0xff] }
 0x1ae   :  { %3474 = vmatprep.subr.bf16.mxu0 %v3473_v46  ;;  %3598 = vmatprep.subr.bf16.mxu1 %v3597_v47  ;;  %v1225_v46 = vld [vmem:[#allocation17 + $0x7f0] sm:$0xff]  ;;  %v1230_v47 = vld [vmem:[#allocation17 + $0x818] sm:$0xff] }
 0x1af   :  { %v3649_v58 = vpack.c.bf16 %v1230_v47, %v1225_v46  ;;  %v1847_v46 = vld [vmem:[#allocation12 + $0x3] ss:$2 sm:$0xf]  ;;  %v1882_v27 = vld [vmem:[#allocation12 + $0x11] ss:$2 sm:$0xf] }
 0x1b0   :  { %1849 = vst.msk [vmem:[#allocation5 + $0x22] ss:$8 sm:$0xf] %vm4832_vm2, %v1847_v46  ;;  %v1285_v17 = vld [vmem:[#allocation17 + $0x9d0] sm:$0xff]  ;;  %v1939_v46 = vld [vmem:[#allocation18 + $0x148] sm:$0xff] }
 0x1b1   :  { %3476 = vmatpush1.bf16.msra.mxu0 %v3475_v55  ;;  %3600 = vmatpush1.bf16.msra.mxu1 %v3599_v56  ;;  %v1150_v55 = vld [vmem:[#allocation17 + $0x598] sm:$0xff]  ;;  %1884 = vst.msk [vmem:[#allocation5 + $0x41] ss:$8 sm:$0xf] %vm4832_vm2, %v1882_v27  ;;  %v1940_v8 = vld [vmem:[#allocation18 + $0x150] sm:$0xff] }
 0x1b2   :  { %3478 = vmatprep.subr.bf16.mxu0 %v3477_v59  ;;  %3602 = vmatprep.subr.bf16.mxu1 %v3601_v60  ;;  %v4996_v56 = vld [vmem:[#allocation4 + $0x58] sm:$0x3]  ;;  %v1085_v59 = vld [vmem:[#allocation17 + $0x390] sm:$0xff]  ;;  %v3651_v4 = vpack.c.bf16 %v1150_v55, %v1145_v54 }
 0x1b3   :  { %v1090_v60 = vld [vmem:[#allocation17 + $0x3b8] sm:$0xff] }
 0x1b4   :  { %v1190_v55 = vld [vmem:[#allocation17 + $0x6d8] sm:$0xff] }
 0x1b5   :  { %3480 = vmatpush1.bf16.msra.mxu0 %v3479_v6  ;;  %3604 = vmatpush1.bf16.msra.mxu1 %v3603_v7  ;;  %v1010_v6 = vld [vmem:[#allocation17 + $0x138] sm:$0xff]  ;;  %v3625_v7 = vpack.c.bf16 %v1090_v60, %v1085_v59  ;;  %v1275_v59 = vld [vmem:[#allocation17 + $0x980] sm:$0xff]  ;;  %v1280_v60 = vld [vmem:[#allocation17 + $0x9a8] sm:$0xff] }
 0x1b6   :  { %3482 = vmatprep.subr.bf16.mxu0 %v3481_v12  ;;  %3606 = vmatprep.subr.bf16.mxu1 %v3605_v13  ;;  %v1095_v12 = vld [vmem:[#allocation17 + $0x3e0] sm:$0xff]  ;;  %v3653_v13 = vpack.c.bf16 %v1240_v14, %v1235_v61  ;;  %v3627_v18 = vpack.c.bf16 %v1010_v6, %v1005_v5  ;;  %v1852_v61 = vld [vmem:[#allocation12 + $0x5] ss:$2 sm:$0xf] }
 0x1b7   :  { %v1045_v14 = vld [vmem:[#allocation17 + $0x250] sm:$0xff]  ;;  %1854 = vst.msk [vmem:[#allocation5 + $0x23] ss:$8 sm:$0xf] %vm4832_vm2, %v1852_v61  ;;  %v1941_v61 = vld [vmem:[#allocation18 + $0x158] sm:$0xff] }
 0x1b8   :  { %v1862_v5 = vld [vmem:[#allocation12 + $0x9] ss:$2 sm:$0xf] }
 0x1b9   :  { %3484 = vmatpush1.bf16.msra.mxu0 %v3483_v21  ;;  %3608 = vmatpush1.bf16.msra.mxu1 %v3607_v22  ;;  %v1020_v21 = vld [vmem:[#allocation17 + $0x188] sm:$0xff]  ;;  %v3629_v22 = vpack.c.bf16 %v1100_v15, %v1095_v12  ;;  %1864 = vst.msk [vmem:[#allocation5 + $0x25] ss:$8 sm:$0xf] %vm4832_vm2, %v1862_v5  ;;  %v1195_v15 = vld [vmem:[#allocation17 + $0x700] sm:$0xff] }
 0x1ba   :  { %3610 = vmatprep.subr.bf16.mxu1 %v3609_v24  ;;  %3614 = vmatprep.subr.bf16.mxu0 %v3613_v26  ;;  %v1165_v24 = vld [vmem:[#allocation17 + $0x610] sm:$0xff]  ;;  %v1170_v26 = vld [vmem:[#allocation17 + $0x638] sm:$0xff]  ;;  %v3631_v32 = vpack.c.bf16 %v1020_v21, %v1015_v20  ;;  %v1907_v20 = vld [vmem:[#allocation18 + $0x48] sm:$0xff] }
 0x1bb   :  { %v3659_v2 = vpack.c.bf16 %v1170_v26, %v1165_v24  ;;  %v1877_v21 = vld [vmem:[#allocation12 + $0xf] ss:$2 sm:$0xf] }
 0x1bc   :  { %1439 = vmatmul.mubr.f32.vlgmr.msra.gmra.mrb[10].mxu0 %v4988_v33  ;;  %v1205_v24 = vld [vmem:[#allocation17 + $0x750] sm:$0xff]  ;;  %v1210_v26 = vld [vmem:[#allocation17 + $0x778] sm:$0xff]  ;;  %1879 = vst.msk [vmem:[#allocation5 + $0x40] ss:$8 sm:$0xf] %vm4832_vm2, %v1877_v21 }
 0x1bd   :  { %3612 = vmatpush1.bf16.msra.mxu1 %v3611_v34  ;;  %3616 = vmatpush3.bf16.msra.mxu0 %v3615_v35  ;;  %v1030_v34 = vld [vmem:[#allocation17 + $0x1d8] sm:$0xff]  ;;  %v1175_v35 = vld [vmem:[#allocation17 + $0x660] sm:$0xff]  ;;  %v1956_v21 = vld [vmem:[#allocation18 + $0x1d0] sm:$0xff] }
 0x1be   :  { %1444 = vmatprep.mubr.f32.mxu0 %v4990_v42  ;;  %3618 = vmatprep.subr.bf16.mxu0 %v3617_v38  ;;  %v3661_v38 = vpack.c.bf16 %v1260_v31, %v1255_v29  ;;  %v3635_v47 = vpack.c.bf16 %v1030_v34, %v1025_v3  ;;  %v1898_v31 = vld [vmem:[#allocation18] sm:$0xff]  ;;  %v1923_v3 = vld [vmem:[#allocation18 + $0xc8] sm:$0xff]  ;;  %v1901_v34 = vld [vmem:[#allocation18 + $0x18] sm:$0xff] }
 0x1bf   :  { %3646 = vmatprep.subr.bf16.mxu1 %v3645_v43  ;;  %v1265_v43 = vld [vmem:[#allocation17 + $0x930] sm:$0xff] }
 0x1c0   :  { %1445 = vmatmul.mubr.f32.gmra.mrb[12].mxu0 %v4993_v48  ;;  %1605 = vmatmul.mubr.f32.vlgmr.msra.gmra.mrb[4].mxu1 %v4988_v33  ;;  %v3665_v54 = vpack.c.bf16 %v1270_v44, %v1265_v43  ;;  %v1900_v44 = vld [vmem:[#allocation18 + $0x10] sm:$0xff] }
 0x1c1   :  { %3620 = vmatpush3.bf16.msra.mxu0 %v3619_v49  ;;  %3648 = vmatpush3.bf16.msra.mxu1 %v3647_v50  ;;  %v3663_v49 = vpack.c.bf16 %v1180_v39, %v1175_v35  ;;  %v1035_v50 = vld [vmem:[#allocation17 + $0x200] sm:$0xff]  ;;  %v1909_v35 = vld [vmem:[#allocation18 + $0x58] sm:$0xff] }
 0x1c2   :  { %1450 = vmatprep.mubr.f32.mxu0 %v4996_v56  ;;  %1610 = vmatprep.mubr.f32.mxu1 %v4990_v42  ;;  %v3639_v6 = vpack.c.bf16 %v1040_v51, %v1035_v50  ;;  %v1914_v39 = vld [vmem:[#allocation18 + $0x80] sm:$0xff]  ;;  %v3805_v43 = vpack.c.bf16 %v1909_v35, %v1901_v34  ;;  %v1989_v34 = vld [vmem:[#allocation18 + $0x2d8] sm:$0xff] }
 0x1c3   :  { %3622 = vmatprep.subr.bf16.mxu0 %v3621_v57  ;;  %3650 = vmatprep.subr.bf16.mxu1 %v3649_v58  ;;  %v1125_v57 = vld [vmem:[#allocation17 + $0x4d0] sm:$0xff]  ;;  %v1130_v58 = vld [vmem:[#allocation17 + $0x4f8] sm:$0xff]  ;;  %v1930_v51 = vld [vmem:[#allocation18 + $0x100] sm:$0xff] }
 0x1c4   :  { %1451 = vmatmul.mubr.f32.gmra.mrb[14].mxu0 %v5000_v63  ;;  %1611 = vmatmul.mubr.f32.gmra.mrb[6].mxu1 %v4993_v48  ;;  %v3641_v12 = vpack.c.bf16 %v1130_v58, %v1125_v57  ;;  %v1924_v57 = vld [vmem:[#allocation18 + $0xd0] sm:$0xff]  ;;  %v1947_v58 = vld [vmem:[#allocation18 + $0x188] sm:$0xff]  ;;  %v1994_v35 = vld [vmem:[#allocation18 + $0x300] sm:$0xff] }
 0x1c5   :  { %3624 = vmatpush3.bf16.msra.mxu0 %v3623_v1  ;;  %3652 = vmatpush3.bf16.msra.mxu1 %v3651_v4  ;;  %v1050_v1 = vld [vmem:[#allocation17 + $0x278] sm:$0xff]  ;;  %v1857_v4 = vld [vmem:[#allocation12 + $0x7] ss:$2 sm:$0xf] }
 0x1c6   :  { %1616 = vmatprep.mubr.f32.mxu1 %v4996_v56  ;;  %3626 = vmatprep.subr.bf16.mxu0 %v3625_v7  ;;  %v3667_v7 = vpack.c.bf16 %v1190_v55, %v1185_v52  ;;  %1859 = vst.msk [vmem:[#allocation5 + $0x24] ss:$8 sm:$0xf] %vm4832_vm2, %v1857_v4  ;;  %v1938_v52 = vld [vmem:[#allocation18 + $0x140] sm:$0xff]  ;;  %v1916_v55 = vld [vmem:[#allocation18 + $0x90] sm:$0xff] }
 0x1c7   :  { %3654 = vmatprep.subr.bf16.mxu1 %v3653_v13  ;;  %1687 = vmatprep.mubr.f32.mxu0 %v4943_v53  ;;  %v1837_v53 = vld [vmem:[#allocation12 + $0x10] ss:$2 sm:$0xf]  ;;  %v3669_v13 = vpack.c.bf16 %v1280_v60, %v1275_v59  ;;  %v1955_v59 = vld [vmem:[#allocation18 + $0x1c8] sm:$0xff]  ;;  %v1954_v4 = vld [vmem:[#allocation18 + $0x1c0] sm:$0xff] }
 0x1c8   :  { %1617 = vmatmul.mubr.f32.gmra.mrb[8].mxu1 %v5000_v63  ;;  %1839 = vst.msk [vmem:[#allocation5 + $0x20] ss:$8 sm:$0xf] %vm4832_vm2, %v1837_v53  ;;  %v1908_v53 = vld [vmem:[#allocation18 + $0x50] sm:$0xff]  ;;  %v1933_v60 = vld [vmem:[#allocation18 + $0x118] sm:$0xff]  ;;  %v3689_v5 = vpack.c.bf16 %v1955_v59, %v1947_v58 }
 0x1c9   :  { %3628 = vmatpush3.bf16.msra.mxu0 %v3627_v18  ;;  %3656 = vmatpush3.bf16.msra.mxu1 %v3655_v19  ;;  %v1290_v18 = vld [vmem:[#allocation17 + $0x9f8] sm:$0xff]  ;;  %v1899_v19 = vld [vmem:[#allocation18 + $0x8] sm:$0xff]  ;;  %v3807_v50 = vpack.c.bf16 %v1908_v53, %v1900_v44 }
 0x1ca   :  { %3630 = vmatprep.subr.bf16.mxu0 %v3629_v22  ;;  %3658 = vmatprep.subr.bf16.mxu1 %v3657_v23  ;;  %v3643_v22 = vpack.c.bf16 %v1050_v1, %v1045_v14  ;;  %v3671_v23 = vpack.c.bf16 %v1200_v16, %v1195_v15  ;;  %v3673_v28 = vpack.c.bf16 %v1290_v18, %v1285_v17  ;;  %v1946_v1 = vld [vmem:[#allocation18 + $0x180] sm:$0xff]  ;;  %v2019_v44 = vld [vmem:[#allocation18 + $0x3c8] sm:$0xff]  ;;  %v1997_v53 = vld [vmem:[#allocation18 + $0x318] sm:$0xff] }
 0x1cb   :  { %1767 = vmatprep.mubr.f32.mxu1 %v4966_v37  ;;  %v3637_v37 = vpack.c.bf16 %v1120_v41, %v1115_v40  ;;  %v3677_v29 = vpack.c.bf16 %v1907_v20, %v1899_v19  ;;  %v1922_v40 = vld [vmem:[#allocation18 + $0xc0] sm:$0xff]  ;;  %v3811_v14 = vpack.c.bf16 %v1924_v57, %v1916_v55  ;;  %v1948_v20 = vld [vmem:[#allocation18 + $0x190] sm:$0xff]  ;;  %v2035_v55 = vld [vmem:[#allocation18 + $0x448] sm:$0xff] }
 0x1cc   :  { %v1962_v16 = vld [vmem:[#allocation18 + $0x200] sm:$0xff]  ;;  %v2013_v57 = vld [vmem:[#allocation18 + $0x398] sm:$0xff] }
 0x1cd   :  { %3632 = vmatpush3.bf16.msra.mxu0 %v3631_v32  ;;  %3660 = vmatpush3.bf16.msra.mxu1 %v3659_v2  ;;  %v1906_v32 = vld [vmem:[#allocation18 + $0x40] sm:$0xff]  ;;  %v1915_v2 = vld [vmem:[#allocation18 + $0x88] sm:$0xff]  ;;  %v2021_v58 = vld [vmem:[#allocation18 + $0x3d8] sm:$0xff] }
 0x1ce   :  { %3634 = vmatprep.subr.bf16.mxu0 %v3633_v36  ;;  %3662 = vmatprep.subr.bf16.mxu1 %v3661_v38  ;;  %v3675_v36 = vpack.c.bf16 %v1210_v26, %v1205_v24  ;;  %v3679_v38 = vpack.c.bf16 %v1906_v32, %v1898_v31  ;;  %v3681_v41 = vpack.c.bf16 %v1923_v3, %v1915_v2  ;;  %v1970_v17 = vld [vmem:[#allocation18 + $0x240] sm:$0xff]  ;;  %v1972_v31 = vld [vmem:[#allocation18 + $0x250] sm:$0xff]  ;;  %v1995_v32 = vld [vmem:[#allocation18 + $0x308] sm:$0xff] }
 0x1cf   :  { %v1978_v24 = vld [vmem:[#allocation18 + $0x280] sm:$0xff]  ;;  %v2003_v2 = vld [vmem:[#allocation18 + $0x348] sm:$0xff]  ;;  %v1981_v3 = vld [vmem:[#allocation18 + $0x298] sm:$0xff] }
 0x1d0   :  { %v1986_v26 = vld [vmem:[#allocation18 + $0x2c0] sm:$0xff] }
 0x1d1   :  { %3636 = vmatpush3.bf16.msra.mxu0 %v3635_v47  ;;  %3664 = vmatpush3.bf16.msra.mxu1 %v3663_v49  ;;  %v1917_v47 = vld [vmem:[#allocation18 + $0x98] sm:$0xff]  ;;  %v3683_v49 = vpack.c.bf16 %v1922_v40, %v1914_v39  ;;  %v3825_v39 = vpack.c.bf16 %v1989_v34, %v1981_v3  ;;  %v1980_v40 = vld [vmem:[#allocation18 + $0x290] sm:$0xff]  ;;  %v2074_v3 = vld [vmem:[#allocation18 + $0x580] sm:$0xff] }
 0x1d2   :  { %3638 = vmatprep.subr.bf16.mxu0 %v3637_v37  ;;  %3666 = vmatprep.subr.bf16.mxu1 %v3665_v54  ;;  %v3685_v37 = vpack.c.bf16 %v1939_v46, %v1931_v45  ;;  %v3809_v54 = vpack.c.bf16 %v1925_v10, %v1917_v47  ;;  %v2005_v45 = vld [vmem:[#allocation18 + $0x358] sm:$0xff]  ;;  %v2010_v10 = vld [vmem:[#allocation18 + $0x380] sm:$0xff] }
 0x1d3   :  { %v2082_v34 = vld [vmem:[#allocation18 + $0x5c0] sm:$0xff] }
 0x1d5   :  { %3640 = vmatpush3.bf16.msra.mxu0 %v3639_v6  ;;  %3668 = vmatpush3.bf16.msra.mxu1 %v3667_v7  ;;  %v3813_v6 = vpack.c.bf16 %v1941_v61, %v1933_v60  ;;  %v1932_v7 = vld [vmem:[#allocation18 + $0x110] sm:$0xff]  ;;  %v2026_v61 = vld [vmem:[#allocation18 + $0x400] sm:$0xff] }
 0x1d6   :  { %3642 = vmatprep.subr.bf16.mxu0 %v3641_v12  ;;  %3670 = vmatprep.subr.bf16.mxu1 %v3669_v13  ;;  %v1971_v12 = vld [vmem:[#allocation18 + $0x248] sm:$0xff]  ;;  %v1949_v13 = vld [vmem:[#allocation18 + $0x198] sm:$0xff]  ;;  %v3815_v15 = vpack.c.bf16 %v1940_v8, %v1932_v7 }
 0x1d7   :  { %v3693_v18 = vpack.c.bf16 %v1971_v12, %v1963_v9  ;;  %v2051_v7 = vld [vmem:[#allocation18 + $0x4c8] sm:$0xff]  ;;  %v2029_v8 = vld [vmem:[#allocation18 + $0x418] sm:$0xff] }
 0x1d8   :  { %v2037_v9 = vld [vmem:[#allocation18 + $0x458] sm:$0xff] }
 0x1d9   :  { %3644 = vmatpush3.bf16.msra.mxu0 %v3643_v22  ;;  %3672 = vmatpush3.bf16.msra.mxu1 %v3671_v23  ;;  %v1987_v22 = vld [vmem:[#allocation18 + $0x2c8] sm:$0xff]  ;;  %v1973_v23 = vld [vmem:[#allocation18 + $0x258] sm:$0xff] }
 0x1da   :  { %3674 = vmatprep.subr.bf16.mxu1 %v3673_v28  ;;  %3678 = vmatprep.subr.bf16.mxu0 %v3677_v29  ;;  %v1964_v29 = vld [vmem:[#allocation18 + $0x210] sm:$0xff] }
 0x1dc   :  { %1688 = vmatmul.mubr.f32.vlgmr.msra.gmra.mrb[16].mxu0 %v4947_v62  ;;  %v3687_v62 = vpack.c.bf16 %v1938_v52, %v1930_v51  ;;  %v3829_v51 = vpack.c.bf16 %v2005_v45, %v1997_v53  ;;  %v1996_v52 = vld [vmem:[#allocation18 + $0x310] sm:$0xff]  ;;  %v2090_v53 = vld [vmem:[#allocation18 + $0x600] sm:$0xff] }
 0x1dd   :  { %3676 = vmatpush3.bf16.msra.mxu1 %v3675_v36  ;;  %3680 = vmatpush1.bf16.msra.mxu0 %v3679_v38  ;;  %v2002_v36 = vld [vmem:[#allocation18 + $0x340] sm:$0xff]  ;;  %v3701_v38 = vpack.c.bf16 %v2003_v2, %v1995_v32 }
 0x1de   :  { %3682 = vmatprep.subr.bf16.mxu0 %v3681_v41  ;;  %3806 = vmatprep.subr.bf16.mxu1 %v3805_v43  ;;  %v1988_v41 = vld [vmem:[#allocation18 + $0x2d0] sm:$0xff]  ;;  %v2011_v43 = vld [vmem:[#allocation18 + $0x388] sm:$0xff]  ;;  %v3703_v46 = vpack.c.bf16 %v2002_v36, %v1994_v35  ;;  %v2098_v45 = vld [vmem:[#allocation18 + $0x640] sm:$0xff] }
 0x1df   :  { %1692 = vmatprep.mubr.f32.mxu0 %v4949_v11  ;;  %v1957_v11 = vld [vmem:[#allocation18 + $0x1d8] sm:$0xff]  ;;  %v3827_v47 = vpack.c.bf16 %v1988_v41, %v1980_v40  ;;  %v2060_v35 = vld [vmem:[#allocation18 + $0x510] sm:$0xff] }
 0x1e0   :  { %1768 = vmatmul.mubr.f32.vlgmr.msra.gmra.mrb[10].mxu1 %v4988_v33  ;;  %1693 = vmatmul.mubr.f32.gmra.mrb[18].mxu0 %v4953_v0  ;;  %v1887_v0 = vld [vmem:[#allocation5 + $0x8] sm:$0xff]  ;;  %v3691_v33 = vpack.c.bf16 %v1954_v4, %v1946_v1  ;;  %v3817_v19 = vpack.c.bf16 %v1957_v11, %v1949_v13  ;;  %v3833_v1 = vpack.c.bf16 %v2021_v58, %v2013_v57  ;;  %v2042_v11 = vld [vmem:[#allocation18 + $0x480] sm:$0xff]  ;;  %v2077_v40 = vld [vmem:[#allocation18 + $0x598] sm:$0xff] }
 0x1e1   :  { %3684 = vmatpush1.bf16.msra.mxu0 %v3683_v49  ;;  %3808 = vmatpush1.bf16.msra.mxu1 %v3807_v50  ;;  %v2018_v49 = vld [vmem:[#allocation18 + $0x3c0] sm:$0xff]  ;;  %v3705_v50 = vpack.c.bf16 %v2019_v44, %v2011_v43  ;;  %v2012_v4 = vld [vmem:[#allocation18 + $0x390] sm:$0xff]  ;;  %v2085_v41 = vld [vmem:[#allocation18 + $0x5d8] sm:$0xff]  ;;  %v3723_v43 = vpack.c.bf16 %v2082_v34, %v2074_v3  ;;  %v3727_v57 = vpack.c.bf16 %v2098_v45, %v2090_v53 }
 0x1e2   :  { %3686 = vmatprep.subr.bf16.mxu0 %v3685_v37  ;;  %3810 = vmatprep.subr.bf16.mxu1 %v3809_v54  ;;  %v2004_v37 = vld [vmem:[#allocation18 + $0x350] sm:$0xff]  ;;  %v2027_v54 = vld [vmem:[#allocation18 + $0x408] sm:$0xff]  ;;  %v3707_v59 = vpack.c.bf16 %v2018_v49, %v2010_v10  ;;  %v2154_v3 = vld [vmem:[#allocation18 + $0x800] sm:$0xff] }
 0x1e3   :  { %1772 = vmatprep.mubr.f32.mxu1 %v4990_v42  ;;  %1697 = vmatprep.mubr.f32.mxu0 %v4958_v25  ;;  %v1979_v42 = vld [vmem:[#allocation18 + $0x288] sm:$0xff]  ;;  %v1965_v25 = vld [vmem:[#allocation18 + $0x218] sm:$0xff]  ;;  %v3831_v60 = vpack.c.bf16 %v2004_v37, %v1996_v52  ;;  %v2068_v36 = vld [vmem:[#allocation18 + $0x550] sm:$0xff] }
 0x1e4   :  { %1773 = vmatmul.mubr.f32.gmra.mrb[12].mxu1 %v4993_v48  ;;  %1698 = vmatmul.mubr.f32.gmra.mrb[20].mxu0 %v4960_v30  ;;  %v3695_v30 = vpack.c.bf16 %v1970_v17, %v1962_v16  ;;  %v3819_v48 = vpack.c.bf16 %v1956_v21, %v1948_v20  ;;  %v3697_v27 = vpack.c.bf16 %v1987_v22, %v1979_v42  ;;  %v2028_v16 = vld [vmem:[#allocation18 + $0x410] sm:$0xff]  ;;  %v2045_v20 = vld [vmem:[#allocation18 + $0x498] sm:$0xff]  ;;  %v2115_v52 = vld [vmem:[#allocation18 + $0x6c8] sm:$0xff] }
 0x1e5   :  { %3688 = vmatpush1.bf16.msra.mxu0 %v3687_v62  ;;  %3812 = vmatpush1.bf16.msra.mxu1 %v3811_v14  ;;  %v3821_v28 = vpack.c.bf16 %v1973_v23, %v1965_v25  ;;  %v2034_v62 = vld [vmem:[#allocation18 + $0x440] sm:$0xff]  ;;  %v3709_v14 = vpack.c.bf16 %v2035_v55, %v2027_v54  ;;  %v2036_v17 = vld [vmem:[#allocation18 + $0x450] sm:$0xff]  ;;  %v2053_v21 = vld [vmem:[#allocation18 + $0x4d8] sm:$0xff]  ;;  %v3847_v44 = vpack.c.bf16 %v2068_v36, %v2060_v35 }
 0x1e6   :  { %3690 = vmatprep.subr.bf16.mxu0 %v3689_v5  ;;  %3814 = vmatprep.subr.bf16.mxu1 %v3813_v6  ;;  %v2020_v5 = vld [vmem:[#allocation18 + $0x3d0] sm:$0xff]  ;;  %v2043_v6 = vld [vmem:[#allocation18 + $0x488] sm:$0xff]  ;;  %v3711_v12 = vpack.c.bf16 %v2034_v62, %v2026_v61  ;;  %v3839_v22 = vpack.c.bf16 %v2036_v17, %v2028_v16  ;;  %v2058_v25 = vld [vmem:[#allocation18 + $0x500] sm:$0xff] }
 0x1e7   :  { %1777 = vmatprep.mubr.f32.mxu1 %v4996_v56  ;;  %2474 = vmatprep.mubr.f32.mxu0 %v1887_v0  ;;  %v3699_v56 = vpack.c.bf16 %v1986_v26, %v1978_v24  ;;  %v3835_v13 = vpack.c.bf16 %v2020_v5, %v2012_v4  ;;  %v2066_v23 = vld [vmem:[#allocation18 + $0x540] sm:$0xff]  ;;  %v2044_v24 = vld [vmem:[#allocation18 + $0x490] sm:$0xff]  ;;  %v2093_v37 = vld [vmem:[#allocation18 + $0x618] sm:$0xff] }
 0x1e8   :  { %1778 = vmatmul.mubr.f32.gmra.mrb[14].mxu1 %v5000_v63  ;;  %v3823_v63 = vpack.c.bf16 %v1972_v31, %v1964_v29  ;;  %v2052_v26 = vld [vmem:[#allocation18 + $0x4d0] sm:$0xff]  ;;  %v2061_v29 = vld [vmem:[#allocation18 + $0x518] sm:$0xff]  ;;  %v3719_v32 = vpack.c.bf16 %v2066_v23, %v2058_v25  ;;  %v2123_v4 = vld [vmem:[#allocation18 + $0x708] sm:$0xff] }
 0x1e9   :  { %3692 = vmatpush1.bf16.msra.mxu0 %v3691_v33  ;;  %3816 = vmatpush1.bf16.msra.mxu1 %v3815_v15  ;;  %v3713_v33 = vpack.c.bf16 %v2051_v7, %v2043_v6  ;;  %v3837_v15 = vpack.c.bf16 %v2037_v9, %v2029_v8  ;;  %v2069_v31 = vld [vmem:[#allocation18 + $0x558] sm:$0xff]  ;;  %v3843_v2 = vpack.c.bf16 %v2052_v26, %v2044_v24  ;;  %v2076_v10 = vld [vmem:[#allocation18 + $0x590] sm:$0xff]  ;;  %v2131_v5 = vld [vmem:[#allocation18 + $0x748] sm:$0xff] }
 0x1ea   :  { %3694 = vmatprep.subr.bf16.mxu0 %v3693_v18  ;;  %3818 = vmatprep.subr.bf16.mxu1 %v3817_v19  ;;  %v2059_v18 = vld [vmem:[#allocation18 + $0x508] sm:$0xff]  ;;  %v2084_v49 = vld [vmem:[#allocation18 + $0x5d0] sm:$0xff]  ;;  %v2101_v54 = vld [vmem:[#allocation18 + $0x658] sm:$0xff] }
 0x1eb   :  { %2640 = vmatprep.mubr.f32.mxu1 %v1887_v0  ;;  %v2050_v0 = vld [vmem:[#allocation18 + $0x4c0] sm:$0xff]  ;;  %v2067_v19 = vld [vmem:[#allocation18 + $0x548] sm:$0xff]  ;;  %v3851_v58 = vpack.c.bf16 %v2084_v49, %v2076_v10  ;;  %v3853_v62 = vpack.c.bf16 %v2101_v54, %v2093_v37  ;;  %v2109_v6 = vld [vmem:[#allocation18 + $0x698] sm:$0xff] }
 0x1ec   :  { %v3715_v42 = vpack.c.bf16 %v2050_v0, %v2042_v11  ;;  %v2117_v7 = vld [vmem:[#allocation18 + $0x6d8] sm:$0xff]  ;;  %v3733_v0 = vpack.c.bf16 %v2131_v5, %v2123_v4  ;;  %v2116_v16 = vld [vmem:[#allocation18 + $0x6d0] sm:$0xff]  ;;  %v2139_v17 = vld [vmem:[#allocation18 + $0x788] sm:$0xff] }
 0x1ed   :  { %3696 = vmatpush1.bf16.msra.mxu0 %v3695_v30  ;;  %3820 = vmatpush1.bf16.msra.mxu1 %v3819_v48  ;;  %v3717_v30 = vpack.c.bf16 %v2067_v19, %v2059_v18  ;;  %v3841_v48 = vpack.c.bf16 %v2053_v21, %v2045_v20  ;;  %v2147_v19 = vld [vmem:[#allocation18 + $0x7c8] sm:$0xff]  ;;  %v2125_v20 = vld [vmem:[#allocation18 + $0x718] sm:$0xff]  ;;  %v2138_v25 = vld [vmem:[#allocation18 + $0x780] sm:$0xff] }
 0x1ee   :  { %3698 = vmatprep.subr.bf16.mxu0 %v3697_v27  ;;  %3822 = vmatprep.subr.bf16.mxu1 %v3821_v28  ;;  %v2075_v27 = vld [vmem:[#allocation18 + $0x588] sm:$0xff]  ;;  %v2133_v21 = vld [vmem:[#allocation18 + $0x758] sm:$0xff]  ;;  %v2146_v23 = vld [vmem:[#allocation18 + $0x7c0] sm:$0xff] }
 0x1ef   :  { %v2083_v28 = vld [vmem:[#allocation18 + $0x5c8] sm:$0xff]  ;;  %v2124_v24 = vld [vmem:[#allocation18 + $0x710] sm:$0xff]  ;;  %v2162_v34 = vld [vmem:[#allocation18 + $0x840] sm:$0xff] }
 0x1f0   :  { %v2132_v26 = vld [vmem:[#allocation18 + $0x750] sm:$0xff]  ;;  %v2170_v45 = vld [vmem:[#allocation18 + $0x880] sm:$0xff]  ;;  %v2173_v37 = vld [vmem:[#allocation18 + $0x898] sm:$0xff] }
 0x1f1   :  { %3700 = vmatpush1.bf16.msra.mxu0 %v3699_v56  ;;  %3824 = vmatpush1.bf16.msra.mxu1 %v3823_v63  ;;  %v3721_v56 = vpack.c.bf16 %v2083_v28, %v2075_v27  ;;  %v3845_v63 = vpack.c.bf16 %v2069_v31, %v2061_v29  ;;  %v2155_v27 = vld [vmem:[#allocation18 + $0x808] sm:$0xff]  ;;  %v2141_v29 = vld [vmem:[#allocation18 + $0x798] sm:$0xff]  ;;  %v2140_v35 = vld [vmem:[#allocation18 + $0x790] sm:$0xff] }
 0x1f2   :  { %3702 = vmatprep.subr.bf16.mxu0 %v3701_v38  ;;  %3826 = vmatprep.subr.bf16.mxu1 %v3825_v39  ;;  %v2091_v38 = vld [vmem:[#allocation18 + $0x608] sm:$0xff]  ;;  %v2149_v31 = vld [vmem:[#allocation18 + $0x7d8] sm:$0xff]  ;;  %v2148_v36 = vld [vmem:[#allocation18 + $0x7d0] sm:$0xff] }
 0x1f3   :  { %v2099_v39 = vld [vmem:[#allocation18 + $0x648] sm:$0xff]  ;;  %v3867_v53 = vpack.c.bf16 %v2148_v36, %v2140_v35  ;;  %v2156_v49 = vld [vmem:[#allocation18 + $0x810] sm:$0xff]  ;;  %v2181_v54 = vld [vmem:[#allocation18 + $0x8d8] sm:$0xff] }
 0x1f4   :  { %v2163_v28 = vld [vmem:[#allocation18 + $0x848] sm:$0xff]  ;;  %v2180_v4 = vld [vmem:[#allocation18 + $0x8d0] sm:$0xff]  ;;  %v2234_v35 = vld [vmem:[#allocation18 + $0xa80] sm:$0xff] }
 0x1f5   :  { %3704 = vmatpush1.bf16.msra.mxu0 %v3703_v46  ;;  %3828 = vmatpush1.bf16.msra.mxu1 %v3827_v47  ;;  %v3725_v46 = vpack.c.bf16 %v2099_v39, %v2091_v38  ;;  %v3849_v47 = vpack.c.bf16 %v2085_v41, %v2077_v40  ;;  %v2171_v38 = vld [vmem:[#allocation18 + $0x888] sm:$0xff]  ;;  %v2157_v40 = vld [vmem:[#allocation18 + $0x818] sm:$0xff]  ;;  %v2242_v36 = vld [vmem:[#allocation18 + $0xac0] sm:$0xff] }
 0x1f6   :  { %3706 = vmatprep.subr.bf16.mxu0 %v3705_v50  ;;  %3830 = vmatprep.subr.bf16.mxu1 %v3829_v51  ;;  %v2107_v50 = vld [vmem:[#allocation18 + $0x688] sm:$0xff]  ;;  %v2165_v41 = vld [vmem:[#allocation18 + $0x858] sm:$0xff] }
 0x1f7   :  { %v3729_v61 = vpack.c.bf16 %v2115_v52, %v2107_v50  ;;  %v2179_v39 = vld [vmem:[#allocation18 + $0x8c8] sm:$0xff]  ;;  %v3869_v10 = vpack.c.bf16 %v2165_v41, %v2157_v40  ;;  %v2164_v50 = vld [vmem:[#allocation18 + $0x850] sm:$0xff] }
 0x1f8   :  { %v2195_v52 = vld [vmem:[#allocation18 + $0x948] sm:$0xff]  ;;  %v2220_v40 = vld [vmem:[#allocation18 + $0xa10] sm:$0xff] }
 0x1f9   :  { %3708 = vmatpush1.bf16.msra.mxu0 %v3707_v59  ;;  %3832 = vmatpush1.bf16.msra.mxu1 %v3831_v60  ;;  %v2106_v59 = vld [vmem:[#allocation18 + $0x680] sm:$0xff]  ;;  %v2203_v5 = vld [vmem:[#allocation18 + $0x988] sm:$0xff]  ;;  %v2228_v41 = vld [vmem:[#allocation18 + $0xa50] sm:$0xff] }
 0x1fa   :  { %3710 = vmatprep.subr.bf16.mxu0 %v3709_v14  ;;  %3834 = vmatprep.subr.bf16.mxu1 %v3833_v1  ;;  %v2114_v60 = vld [vmem:[#allocation18 + $0x6c0] sm:$0xff]  ;;  %v2092_v14 = vld [vmem:[#allocation18 + $0x610] sm:$0xff] }
 0x1fb   :  { %v2100_v1 = vld [vmem:[#allocation18 + $0x650] sm:$0xff]  ;;  %v3731_v8 = vpack.c.bf16 %v2114_v60, %v2106_v59  ;;  %v2186_v59 = vld [vmem:[#allocation18 + $0x900] sm:$0xff] }
 0x1fc   :  { %v3855_v9 = vpack.c.bf16 %v2100_v1, %v2092_v14  ;;  %v2194_v60 = vld [vmem:[#allocation18 + $0x940] sm:$0xff]  ;;  %v3873_v14 = vpack.c.bf16 %v2181_v54, %v2173_v37  ;;  %v2172_v1 = vld [vmem:[#allocation18 + $0x890] sm:$0xff]  ;;  %v2267_v54 = vld [vmem:[#allocation18 + $0xb88] sm:$0xff] }
 0x1fd   :  { %3712 = vmatpush1.bf16.msra.mxu0 %v3711_v12  ;;  %3836 = vmatpush1.bf16.msra.mxu1 %v3835_v13  ;;  %v2122_v12 = vld [vmem:[#allocation18 + $0x700] sm:$0xff]  ;;  %v2244_v37 = vld [vmem:[#allocation18 + $0xad0] sm:$0xff] }
 0x1fe   :  { %3714 = vmatprep.subr.bf16.mxu0 %v3713_v33  ;;  %3838 = vmatprep.subr.bf16.mxu1 %v3837_v15  ;;  %v2130_v13 = vld [vmem:[#allocation18 + $0x740] sm:$0xff]  ;;  %v3857_v33 = vpack.c.bf16 %v2117_v7, %v2109_v6  ;;  %v2108_v15 = vld [vmem:[#allocation18 + $0x690] sm:$0xff]  ;;  %v2211_v6 = vld [vmem:[#allocation18 + $0x9c8] sm:$0xff] }
 0x1ff   :  { %v2189_v7 = vld [vmem:[#allocation18 + $0x918] sm:$0xff] }
 0x201   :  { %3716 = vmatpush1.bf16.msra.mxu0 %v3715_v42  ;;  %3840 = vmatpush1.bf16.msra.mxu1 %v3839_v22  ;;  %v3735_v42 = vpack.c.bf16 %v2130_v13, %v2122_v12  ;;  %v3859_v22 = vpack.c.bf16 %v2116_v16, %v2108_v15  ;;  %v3751_v12 = vpack.c.bf16 %v2194_v60, %v2186_v59 }
 0x202   :  { %3718 = vmatprep.subr.bf16.mxu0 %v3717_v30  ;;  %3842 = vmatprep.subr.bf16.mxu1 %v3841_v48  ;;  %v3737_v30 = vpack.c.bf16 %v2147_v19, %v2139_v17  ;;  %v3861_v48 = vpack.c.bf16 %v2133_v21, %v2125_v20  ;;  %v3875_v13 = vpack.c.bf16 %v2180_v4, %v2172_v1  ;;  %v2196_v19 = vld [vmem:[#allocation18 + $0x950] sm:$0xff]  ;;  %v2219_v20 = vld [vmem:[#allocation18 + $0xa08] sm:$0xff] }
 0x203   :  { %v3753_v16 = vpack.c.bf16 %v2211_v6, %v2203_v5  ;;  %v2252_v5 = vld [vmem:[#allocation18 + $0xb10] sm:$0xff] }
 0x204   :  { %v2260_v6 = vld [vmem:[#allocation18 + $0xb50] sm:$0xff] }
 0x205   :  { %3720 = vmatpush1.bf16.msra.mxu0 %v3719_v32  ;;  %3844 = vmatpush1.bf16.msra.mxu1 %v3843_v2  ;;  %v3739_v32 = vpack.c.bf16 %v2146_v23, %v2138_v25  ;;  %v3863_v2 = vpack.c.bf16 %v2132_v26, %v2124_v24  ;;  %v2213_v25 = vld [vmem:[#allocation18 + $0x9d8] sm:$0xff]  ;;  %v2218_v24 = vld [vmem:[#allocation18 + $0xa00] sm:$0xff] }
 0x206   :  { %3722 = vmatprep.subr.bf16.mxu0 %v3721_v56  ;;  %3846 = vmatprep.subr.bf16.mxu1 %v3845_v63  ;;  %v3741_v56 = vpack.c.bf16 %v2163_v28, %v2155_v27  ;;  %v3865_v63 = vpack.c.bf16 %v2149_v31, %v2141_v29  ;;  %v1889_v23 = vld [vmem:[#allocation5 + $0x18] sm:$0xff]  ;;  %v2204_v29 = vld [vmem:[#allocation18 + $0x990] sm:$0xff] }
 0x207   :  { %v852_v51 = vpop.f32.mrb[0].mxu1  ;;  %v2226_v26 = vld [vmem:[#allocation18 + $0xa40] sm:$0xff]  ;;  %v2212_v31 = vld [vmem:[#allocation18 + $0x9d0] sm:$0xff] }
 0x208   :  { %863 = vst [vmem:[#allocation21] sm:$0xff] %v852_v51  ;;  %v854_v55 = vpop.f32.mrb[1].mxu1  ;;  %v2187_v51 = vld [vmem:[#allocation18 + $0x908] sm:$0xff] }
 0x209   :  { %864 = vst [vmem:[#allocation21 + $0x8] sm:$0xff] %v854_v55  ;;  %3724 = vmatpush1.bf16.msra.mxu0 %v3723_v43  ;;  %3848 = vmatpush1.bf16.msra.mxu1 %v3847_v44  ;;  %v1886_v43 = vld [vmem:[#allocation5] sm:$0xff]  ;;  %v3743_v44 = vpack.c.bf16 %v2162_v34, %v2154_v3  ;;  %v1891_v55 = vld [vmem:[#allocation5 + $0x28] sm:$0xff]  ;;  %v2221_v3 = vld [vmem:[#allocation18 + $0xa18] sm:$0xff] }
 0x20a   :  { %3726 = vmatprep.subr.bf16.mxu0 %v3725_v46  ;;  %3850 = vmatprep.subr.bf16.mxu1 %v3849_v47  ;;  %v2178_v46 = vld [vmem:[#allocation18 + $0x8c0] sm:$0xff]  ;;  %v3745_v47 = vpack.c.bf16 %v2179_v39, %v2171_v38  ;;  %v2229_v34 = vld [vmem:[#allocation18 + $0xa58] sm:$0xff] }
 0x20b   :  { %v3885_v39 = vpack.c.bf16 %v2229_v34, %v2221_v3 }
 0x20d   :  { %3728 = vmatpush1.bf16.msra.mxu0 %v3727_v57  ;;  %3852 = vmatpush1.bf16.msra.mxu1 %v3851_v58  ;;  %v3747_v57 = vpack.c.bf16 %v2178_v46, %v2170_v45  ;;  %v3871_v58 = vpack.c.bf16 %v2164_v50, %v2156_v49  ;;  %v2245_v45 = vld [vmem:[#allocation18 + $0xad8] sm:$0xff]  ;;  %v3763_v46 = vpack.c.bf16 %v2242_v36, %v2234_v35  ;;  %v2258_v49 = vld [vmem:[#allocation18 + $0xb40] sm:$0xff] }
 0x20e   :  { %v612_v11 = vpop.f32.mrb[0].mxu0  ;;  %3730 = vmatprep.subr.bf16.mxu0 %v3729_v61  ;;  %3854 = vmatprep.subr.bf16.mxu1 %v3853_v62  ;;  %v1890_v61 = vld [vmem:[#allocation5 + $0x20] sm:$0xff]  ;;  %v3749_v62 = vpack.c.bf16 %v2195_v52, %v2187_v51  ;;  %v2236_v52 = vld [vmem:[#allocation18 + $0xa90] sm:$0xff] }
 0x20f   :  { %636 = vst [vmem:[#allocation20] sm:$0xff] %v612_v11  ;;  %v3300_v18 = vpop.f32.mrb[1].mxu0  ;;  %v2202_v11 = vld [vmem:[#allocation18 + $0x980] sm:$0xff]  ;;  %v3891_v60 = vpack.c.bf16 %v2244_v37, %v2236_v52  ;;  %v2347_v52 = vld [vmem:[#allocation18 + $0xe08] sm:$0xff] }
 0x210   :  { %v2188_v18 = vld [vmem:[#allocation18 + $0x910] sm:$0xff]  ;;  %v2355_v37 = vld [vmem:[#allocation18 + $0xe48] sm:$0xff] }
 0x211   :  { %3732 = vmatpush1.bf16.msra.mxu0 %v3731_v8  ;;  %3856 = vmatpush1.bf16.msra.mxu1 %v3855_v9  ;;  %v2197_v8 = vld [vmem:[#allocation18 + $0x958] sm:$0xff]  ;;  %v1895_v9 = vld [vmem:[#allocation5 + $0x48] sm:$0x3] }
 0x212   :  { %3734 = vmatprep.subr.bf16.mxu0 %v3733_v0  ;;  %3858 = vmatprep.subr.bf16.mxu1 %v3857_v33  ;;  %v2210_v0 = vld [vmem:[#allocation18 + $0x9c0] sm:$0xff]  ;;  %v3877_v17 = vpack.c.bf16 %v2197_v8, %v2189_v7  ;;  %v2283_v7 = vld [vmem:[#allocation18 + $0xc08] sm:$0xff] }
 0x213   :  { %v1894_v33 = vld [vmem:[#allocation5 + $0x40] sm:$0x3] }
 0x215   :  { %3736 = vmatpush1.bf16.msra.mxu0 %v3735_v42  ;;  %3860 = vmatpush1.bf16.msra.mxu1 %v3859_v22  ;;  %v2227_v42 = vld [vmem:[#allocation18 + $0xa48] sm:$0xff]  ;;  %v2205_v22 = vld [vmem:[#allocation18 + $0x998] sm:$0xff] }
 0x216   :  { %3738 = vmatprep.subr.bf16.mxu0 %v3737_v30  ;;  %3862 = vmatprep.subr.bf16.mxu1 %v3861_v48  ;;  %v3755_v30 = vpack.c.bf16 %v2210_v0, %v2202_v11  ;;  %v3879_v48 = vpack.c.bf16 %v2196_v19, %v2188_v18  ;;  %v3757_v27 = vpack.c.bf16 %v2227_v42, %v2219_v20  ;;  %v2268_v18 = vld [vmem:[#allocation18 + $0xb90] sm:$0xff]  ;;  %v2299_v20 = vld [vmem:[#allocation18 + $0xc88] sm:$0xff]  ;;  %v2285_v42 = vld [vmem:[#allocation18 + $0xc18] sm:$0xff] }
 0x217   :  { %v3881_v28 = vpack.c.bf16 %v2213_v25, %v2205_v22  ;;  %v3895_v0 = vpack.c.bf16 %v2260_v6, %v2252_v5  ;;  %v2276_v19 = vld [vmem:[#allocation18 + $0xbd0] sm:$0xff]  ;;  %v2293_v22 = vld [vmem:[#allocation18 + $0xc58] sm:$0xff]  ;;  %v2363_v5 = vld [vmem:[#allocation18 + $0xe88] sm:$0xff] }
 0x219   :  { %3740 = vmatpush1.bf16.msra.mxu0 %v3739_v32  ;;  %3864 = vmatpush1.bf16.msra.mxu1 %v3863_v2  ;;  %v2235_v32 = vld [vmem:[#allocation18 + $0xa88] sm:$0xff] }
 0x21a   :  { %3742 = vmatprep.subr.bf16.mxu0 %v3741_v56  ;;  %3866 = vmatprep.subr.bf16.mxu1 %v3865_v63  ;;  %v2243_v2 = vld [vmem:[#allocation18 + $0xac8] sm:$0xff]  ;;  %v3759_v56 = vpack.c.bf16 %v2226_v26, %v2218_v24  ;;  %v3883_v63 = vpack.c.bf16 %v2212_v31, %v2204_v29  ;;  %v3901_v26 = vpack.c.bf16 %v2293_v22, %v2285_v42  ;;  %v2373_v42 = vld [vmem:[#allocation18 + $0xed8] sm:$0xff] }
 0x21b   :  { %v3761_v38 = vpack.c.bf16 %v2243_v2, %v2235_v32  ;;  %v2315_v29 = vld [vmem:[#allocation18 + $0xd08] sm:$0xff]  ;;  %v2301_v32 = vld [vmem:[#allocation18 + $0xc98] sm:$0xff] }
 0x21c   :  { %2475 = vmatmul.mubr.f32.vlgmr.msra.gmra.mrb[22].mxu0 %v1886_v43  ;;  %v2323_v31 = vld [vmem:[#allocation18 + $0xd48] sm:$0xff]  ;;  %v2309_v2 = vld [vmem:[#allocation18 + $0xcd8] sm:$0xff] }
 0x21d   :  { %3744 = vmatpush1.bf16.msra.mxu0 %v3743_v44  ;;  %3868 = vmatpush1.bf16.msra.mxu1 %v3867_v53  ;;  %v2259_v44 = vld [vmem:[#allocation18 + $0xb48] sm:$0xff]  ;;  %v2237_v53 = vld [vmem:[#allocation18 + $0xa98] sm:$0xff]  ;;  %v3781_v35 = vpack.c.bf16 %v2323_v31, %v2315_v29  ;;  %v3905_v36 = vpack.c.bf16 %v2309_v2, %v2301_v32 }
 0x21e   :  { %3746 = vmatprep.subr.bf16.mxu0 %v3745_v47  ;;  %3870 = vmatprep.subr.bf16.mxu1 %v3869_v10  ;;  %v3887_v47 = vpack.c.bf16 %v2228_v41, %v2220_v40  ;;  %v2250_v10 = vld [vmem:[#allocation18 + $0xb00] sm:$0xff]  ;;  %v3889_v51 = vpack.c.bf16 %v2245_v45, %v2237_v53  ;;  %v2331_v40 = vld [vmem:[#allocation18 + $0xd88] sm:$0xff]  ;;  %v2381_v2 = vld [vmem:[#allocation18 + $0xf18] sm:$0xff] }
 0x21f   :  { %2480 = vmatprep.mubr.f32.mxu0 %v1891_v55  ;;  %v3767_v59 = vpack.c.bf16 %v2258_v49, %v2250_v10  ;;  %v2339_v41 = vld [vmem:[#allocation18 + $0xdc8] sm:$0xff] }
 0x220   :  { %2641 = vmatmul.mubr.f32.vlgmr.msra.gmra.mrb[16].mxu1 %v1886_v43  ;;  %2481 = vmatmul.mubr.f32.gmra.mrb[24].mxu0 %v1890_v61  ;;  %v2251_v43 = vld [vmem:[#allocation18 + $0xb08] sm:$0xff]  ;;  %v3785_v10 = vpack.c.bf16 %v2339_v41, %v2331_v40  ;;  %v2380_v40 = vld [vmem:[#allocation18 + $0xf10] sm:$0xff] }
 0x221   :  { %3748 = vmatpush1.bf16.msra.mxu0 %v3747_v57  ;;  %3872 = vmatpush1.bf16.msra.mxu1 %v3871_v58  ;;  %v3765_v50 = vpack.c.bf16 %v2259_v44, %v2251_v43  ;;  %v2253_v57 = vld [vmem:[#allocation18 + $0xb18] sm:$0xff]  ;;  %v2395_v29 = vld [vmem:[#allocation18 + $0xf88] sm:$0xff]  ;;  %v2388_v41 = vld [vmem:[#allocation18 + $0xf50] sm:$0xff] }
 0x222   :  { %v617_v15 = vpop.f32.mrb[2].mxu0  ;;  %3750 = vmatprep.subr.bf16.mxu0 %v3749_v62  ;;  %3874 = vmatprep.subr.bf16.mxu1 %v3873_v14  ;;  %v2261_v58 = vld [vmem:[#allocation18 + $0xb58] sm:$0xff]  ;;  %v2274_v62 = vld [vmem:[#allocation18 + $0xbc0] sm:$0xff]  ;;  %v2403_v32 = vld [vmem:[#allocation18 + $0xfc8] sm:$0xff] }
 0x223   :  { %637 = vst [vmem:[#allocation20 + $0x8] sm:$0xff] %v617_v15  ;;  %v3303_v21 = vpop.f32.mrb[3].mxu0  ;;  %2486 = vmatprep.mubr.f32.mxu0 %v1895_v9  ;;  %2646 = vmatprep.mubr.f32.mxu1 %v1891_v55  ;;  %v2275_v55 = vld [vmem:[#allocation18 + $0xbc8] sm:$0xff]  ;;  %v3893_v4 = vpack.c.bf16 %v2261_v58, %v2253_v57  ;;  %v2290_v15 = vld [vmem:[#allocation18 + $0xc40] sm:$0xff]  ;;  %v2317_v43 = vld [vmem:[#allocation18 + $0xd18] sm:$0xff] }
 0x224   :  { %2487 = vmatmul.mubr.f32.gmra.mrb[26].mxu0 %v1894_v33  ;;  %2647 = vmatmul.mubr.f32.gmra.mrb[18].mxu1 %v1890_v61  ;;  %v2266_v61 = vld [vmem:[#allocation18 + $0xb80] sm:$0xff]  ;;  %v3769_v1 = vpack.c.bf16 %v2275_v55, %v2267_v54  ;;  %v2307_v21 = vld [vmem:[#allocation18 + $0xcc8] sm:$0xff]  ;;  %v2325_v44 = vld [vmem:[#allocation18 + $0xd58] sm:$0xff] }
 0x225   :  { %3752 = vmatpush1.bf16.msra.mxu0 %v3751_v12  ;;  %3876 = vmatpush1.bf16.msra.mxu1 %v3875_v13  ;;  %v2269_v12 = vld [vmem:[#allocation18 + $0xb98] sm:$0xff]  ;;  %v3771_v11 = vpack.c.bf16 %v2274_v62, %v2266_v61  ;;  %v3777_v24 = vpack.c.bf16 %v2307_v21, %v2299_v20  ;;  %v3909_v49 = vpack.c.bf16 %v2325_v44, %v2317_v43  ;;  %v2387_v20 = vld [vmem:[#allocation18 + $0xf48] sm:$0xff] }
 0x226   :  { %3754 = vmatprep.subr.bf16.mxu0 %v3753_v16  ;;  %3878 = vmatprep.subr.bf16.mxu1 %v3877_v17  ;;  %v2277_v13 = vld [vmem:[#allocation18 + $0xbd8] sm:$0xff]  ;;  %v3789_v62 = vpack.c.bf16 %v2355_v37, %v2347_v52  ;;  %v1902_v52 = vld [vmem:[#allocation18 + $0x20] sm:$0xff] }
 0x227   :  { %2557 = vmatprep.mubr.f32.mxu0 %v1889_v23  ;;  %2652 = vmatprep.mubr.f32.mxu1 %v1895_v9  ;;  %v2291_v9 = vld [vmem:[#allocation18 + $0xc48] sm:$0xff]  ;;  %v3897_v17 = vpack.c.bf16 %v2277_v13, %v2269_v12  ;;  %v2333_v54 = vld [vmem:[#allocation18 + $0xd98] sm:$0xff]  ;;  %v1910_v37 = vld [vmem:[#allocation18 + $0x60] sm:$0xff] }
 0x228   :  { %2653 = vmatmul.mubr.f32.gmra.mrb[20].mxu1 %v1894_v33  ;;  %v2282_v33 = vld [vmem:[#allocation18 + $0xc00] sm:$0xff]  ;;  %v3773_v16 = vpack.c.bf16 %v2291_v9, %v2283_v7  ;;  %v2341_v55 = vld [vmem:[#allocation18 + $0xdd8] sm:$0xff]  ;;  %v2371_v7 = vld [vmem:[#allocation18 + $0xec8] sm:$0xff] }
 0x229   :  { %3756 = vmatpush1.bf16.msra.mxu0 %v3755_v30  ;;  %3880 = vmatpush1.bf16.msra.mxu1 %v3879_v48  ;;  %v3775_v25 = vpack.c.bf16 %v2290_v15, %v2282_v33  ;;  %v2298_v30 = vld [vmem:[#allocation18 + $0xc80] sm:$0xff]  ;;  %v2357_v9 = vld [vmem:[#allocation18 + $0xe58] sm:$0xff]  ;;  %v3793_v33 = vpack.c.bf16 %v2371_v7, %v2363_v5  ;;  %v1912_v5 = vld [vmem:[#allocation18 + $0x70] sm:$0xff] }
 0x22a   :  { %3758 = vmatprep.subr.bf16.mxu0 %v3757_v27  ;;  %3882 = vmatprep.subr.bf16.mxu1 %v3881_v28  ;;  %v2306_v48 = vld [vmem:[#allocation18 + $0xcc0] sm:$0xff]  ;;  %v2284_v27 = vld [vmem:[#allocation18 + $0xc10] sm:$0xff]  ;;  %v2365_v21 = vld [vmem:[#allocation18 + $0xe98] sm:$0xff] }
 0x22b   :  { %2723 = vmatprep.mubr.f32.mxu1 %v1889_v23  ;;  %v3899_v23 = vpack.c.bf16 %v2276_v19, %v2268_v18  ;;  %v2292_v28 = vld [vmem:[#allocation18 + $0xc50] sm:$0xff]  ;;  %v3779_v3 = vpack.c.bf16 %v2306_v48, %v2298_v30  ;;  %v2379_v18 = vld [vmem:[#allocation18 + $0xf08] sm:$0xff]  ;;  %v2378_v30 = vld [vmem:[#allocation18 + $0xf00] sm:$0xff] }
 0x22c   :  { %v3903_v34 = vpack.c.bf16 %v2292_v28, %v2284_v27  ;;  %v2386_v48 = vld [vmem:[#allocation18 + $0xf40] sm:$0xff]  ;;  %v2364_v27 = vld [vmem:[#allocation18 + $0xe90] sm:$0xff]  ;;  %v2397_v43 = vld [vmem:[#allocation18 + $0xf98] sm:$0xff] }
 0x22d   :  { %3760 = vmatpush1.bf16.msra.mxu0 %v3759_v56  ;;  %3884 = vmatpush1.bf16.msra.mxu1 %v3883_v63  ;;  %v2314_v56 = vld [vmem:[#allocation18 + $0xd00] sm:$0xff]  ;;  %v2372_v28 = vld [vmem:[#allocation18 + $0xed0] sm:$0xff]  ;;  %v2405_v44 = vld [vmem:[#allocation18 + $0xfd8] sm:$0xff] }
 0x22e   :  { %3762 = vmatprep.subr.bf16.mxu0 %v3761_v38  ;;  %3886 = vmatprep.subr.bf16.mxu1 %v3885_v39  ;;  %v2322_v63 = vld [vmem:[#allocation18 + $0xd40] sm:$0xff]  ;;  %v2300_v38 = vld [vmem:[#allocation18 + $0xc90] sm:$0xff] }
 0x22f   :  { %v2308_v39 = vld [vmem:[#allocation18 + $0xcd0] sm:$0xff]  ;;  %v3783_v53 = vpack.c.bf16 %v2322_v63, %v2314_v56  ;;  %v3799_v56 = vpack.c.bf16 %v2386_v48, %v2378_v30  ;;  %v3923_v63 = vpack.c.bf16 %v2372_v28, %v2364_v27  ;;  %v1958_v27 = vld [vmem:[#allocation18 + $0x1e0] sm:$0xff] }
 0x230   :  { %v3907_v45 = vpack.c.bf16 %v2308_v39, %v2300_v38  ;;  %v3801_v38 = vpack.c.bf16 %v2403_v32, %v2395_v29  ;;  %v1896_v30 = vld [vmem:[#allocation5 + $0x50] sm:$0x3]  ;;  %v1967_v32 = vld [vmem:[#allocation18 + $0x228] sm:$0xff] }
 0x231   :  { %3764 = vmatpush1.bf16.msra.mxu0 %v3763_v46  ;;  %3888 = vmatpush1.bf16.msra.mxu1 %v3887_v47  ;;  %v2330_v46 = vld [vmem:[#allocation18 + $0xd80] sm:$0xff]  ;;  %v1936_v29 = vld [vmem:[#allocation18 + $0x130] sm:$0xff] }
 0x232   :  { %v622_v14 = vpop.f32.mrb[4].mxu0  ;;  %3766 = vmatprep.subr.bf16.mxu0 %v3765_v50  ;;  %3890 = vmatprep.subr.bf16.mxu1 %v3889_v51  ;;  %v2338_v47 = vld [vmem:[#allocation18 + $0xdc0] sm:$0xff]  ;;  %v2316_v50 = vld [vmem:[#allocation18 + $0xd10] sm:$0xff] }
 0x233   :  { %638 = vst [vmem:[#allocation20 + $0x10] sm:$0xff] %v622_v14  ;;  %v3306_v8 = vpop.f32.mrb[5].mxu0  ;;  %v2324_v51 = vld [vmem:[#allocation18 + $0xd50] sm:$0xff]  ;;  %v3787_v57 = vpack.c.bf16 %v2338_v47, %v2330_v46  ;;  %v3913_v14 = vpack.c.bf16 %v2341_v55, %v2333_v54  ;;  %v3927_v47 = vpack.c.bf16 %v2388_v41, %v2380_v40  ;;  %v1919_v54 = vld [vmem:[#allocation18 + $0xa8] sm:$0xff] }
 0x234   :  { %v3911_v58 = vpack.c.bf16 %v2324_v51, %v2316_v50  ;;  %v2349_v8 = vld [vmem:[#allocation18 + $0xe18] sm:$0xff]  ;;  %v2404_v51 = vld [vmem:[#allocation18 + $0xfd0] sm:$0xff]  ;;  %v1927_v55 = vld [vmem:[#allocation18 + $0xe8] sm:$0xff] }
 0x235   :  { %3768 = vmatpush1.bf16.msra.mxu0 %v3767_v59  ;;  %3892 = vmatpush1.bf16.msra.mxu1 %v3891_v60  ;;  %v2346_v59 = vld [vmem:[#allocation18 + $0xe00] sm:$0xff]  ;;  %v3917_v15 = vpack.c.bf16 %v2357_v9, %v2349_v8  ;;  %v1935_v8 = vld [vmem:[#allocation18 + $0x128] sm:$0xff]  ;;  %v1952_v41 = vld [vmem:[#allocation18 + $0x1b0] sm:$0xff] }
 0x236   :  { %3770 = vmatprep.subr.bf16.mxu0 %v3769_v1  ;;  %3894 = vmatprep.subr.bf16.mxu1 %v3893_v4  ;;  %v2354_v60 = vld [vmem:[#allocation18 + $0xe40] sm:$0xff]  ;;  %v2332_v1 = vld [vmem:[#allocation18 + $0xd90] sm:$0xff]  ;;  %v1943_v9 = vld [vmem:[#allocation18 + $0x168] sm:$0xff] }
 0x237   :  { %v2340_v4 = vld [vmem:[#allocation18 + $0xdd0] sm:$0xff]  ;;  %v3791_v12 = vpack.c.bf16 %v2354_v60, %v2346_v59 }
 0x238   :  { %v3915_v13 = vpack.c.bf16 %v2340_v4, %v2332_v1  ;;  %v1888_v59 = vld [vmem:[#allocation5 + $0x10] sm:$0xff]  ;;  %v1926_v1 = vld [vmem:[#allocation18 + $0xe0] sm:$0xff] }
 0x239   :  { %3772 = vmatpush1.bf16.msra.mxu0 %v3771_v11  ;;  %3896 = vmatpush1.bf16.msra.mxu1 %v3895_v0  ;;  %v2362_v11 = vld [vmem:[#allocation18 + $0xe80] sm:$0xff]  ;;  %v1904_v4 = vld [vmem:[#allocation18 + $0x30] sm:$0xff] }
 0x23a   :  { %3774 = vmatprep.subr.bf16.mxu0 %v3773_v16  ;;  %3898 = vmatprep.subr.bf16.mxu1 %v3897_v17  ;;  %v2370_v0 = vld [vmem:[#allocation18 + $0xec0] sm:$0xff]  ;;  %v2348_v16 = vld [vmem:[#allocation18 + $0xe10] sm:$0xff] }
 0x23b   :  { %v2356_v17 = vld [vmem:[#allocation18 + $0xe50] sm:$0xff] }
 0x23d   :  { %3776 = vmatpush1.bf16.msra.mxu0 %v3775_v25  ;;  %3900 = vmatpush1.bf16.msra.mxu1 %v3899_v23  ;;  %v3795_v25 = vpack.c.bf16 %v2370_v0, %v2362_v11  ;;  %v3919_v23 = vpack.c.bf16 %v2356_v17, %v2348_v16  ;;  %v1892_v11 = vld [vmem:[#allocation5 + $0x30] sm:$0xff]  ;;  %v1942_v16 = vld [vmem:[#allocation18 + $0x160] sm:$0xff] }
 0x23e   :  { %3778 = vmatprep.subr.bf16.mxu0 %v3777_v24  ;;  %3902 = vmatprep.subr.bf16.mxu1 %v3901_v26  ;;  %v3797_v24 = vpack.c.bf16 %v2387_v20, %v2379_v18  ;;  %v3921_v26 = vpack.c.bf16 %v2373_v42, %v2365_v21  ;;  %v1920_v17 = vld [vmem:[#allocation18 + $0xb0] sm:$0xff]  ;;  %v3941_v20 = vpack.c.bf16 %v1943_v9, %v1935_v8  ;;  %v1951_v42 = vld [vmem:[#allocation18 + $0x1a8] sm:$0xff] }
 0x23f   :  { %v1928_v18 = vld [vmem:[#allocation18 + $0xf0] sm:$0xff]  ;;  %v2015_v8 = vld [vmem:[#allocation18 + $0x3a8] sm:$0xff] }
 0x240   :  { %v2023_v9 = vld [vmem:[#allocation18 + $0x3e8] sm:$0xff] }
 0x241   :  { %3780 = vmatpush1.bf16.msra.mxu0 %v3779_v3  ;;  %3904 = vmatpush1.bf16.msra.mxu1 %v3903_v34  ;;  %v2389_v3 = vld [vmem:[#allocation18 + $0xf58] sm:$0xff] }
 0x242   :  { %3782 = vmatprep.subr.bf16.mxu0 %v3781_v35  ;;  %3906 = vmatprep.subr.bf16.mxu1 %v3905_v36  ;;  %v2394_v35 = vld [vmem:[#allocation18 + $0xf80] sm:$0xff]  ;;  %v3925_v39 = vpack.c.bf16 %v2389_v3, %v2381_v2  ;;  %v1975_v3 = vld [vmem:[#allocation18 + $0x268] sm:$0xff] }
 0x243   :  { %v2402_v36 = vld [vmem:[#allocation18 + $0xfc0] sm:$0xff] }
 0x244   :  { %v3803_v46 = vpack.c.bf16 %v2402_v36, %v2394_v35  ;;  %v1966_v36 = vld [vmem:[#allocation18 + $0x220] sm:$0xff] }
 0x245   :  { %3784 = vmatpush1.bf16.msra.mxu0 %v3783_v53  ;;  %3908 = vmatpush1.bf16.msra.mxu1 %v3907_v45  ;;  %v1903_v53 = vld [vmem:[#allocation18 + $0x28] sm:$0xff] }
 0x246   :  { %v627_v61 = vpop.f32.mrb[6].mxu0  ;;  %3786 = vmatprep.subr.bf16.mxu0 %v3785_v10  ;;  %3910 = vmatprep.subr.bf16.mxu1 %v3909_v49  ;;  %v1911_v45 = vld [vmem:[#allocation18 + $0x68] sm:$0xff]  ;;  %v2396_v10 = vld [vmem:[#allocation18 + $0xf90] sm:$0xff]  ;;  %v3929_v49 = vpack.c.bf16 %v2405_v44, %v2397_v43 }
 0x247   :  { %639 = vst [vmem:[#allocation20 + $0x18] sm:$0xff] %v627_v61  ;;  %v3309_v6 = vpop.f32.mrb[7].mxu0  ;;  %v3933_v50 = vpack.c.bf16 %v1911_v45, %v1903_v53  ;;  %v3931_v60 = vpack.c.bf16 %v2404_v51, %v2396_v10  ;;  %v3935_v61 = vpack.c.bf16 %v1910_v37, %v1902_v52  ;;  %v1960_v43 = vld [vmem:[#allocation18 + $0x1f0] sm:$0xff]  ;;  %v1983_v44 = vld [vmem:[#allocation18 + $0x2a8] sm:$0xff]  ;;  %v1969_v45 = vld [vmem:[#allocation18 + $0x238] sm:$0xff] }
 0x248   :  { %v1893_v6 = vld [vmem:[#allocation5 + $0x38] sm:$0xff]  ;;  %v1991_v53 = vld [vmem:[#allocation18 + $0x2e8] sm:$0xff] }
 0x249   :  { %3788 = vmatpush1.bf16.msra.mxu0 %v3787_v57  ;;  %3912 = vmatpush1.bf16.msra.mxu1 %v3911_v58  ;;  %v1905_v57 = vld [vmem:[#allocation18 + $0x38] sm:$0xff]  ;;  %v1990_v51 = vld [vmem:[#allocation18 + $0x2e0] sm:$0xff]  ;;  %v3953_v52 = vpack.c.bf16 %v1991_v53, %v1983_v44 }
 0x24a   :  { %3790 = vmatprep.subr.bf16.mxu0 %v3789_v62  ;;  %3914 = vmatprep.subr.bf16.mxu1 %v3913_v14  ;;  %v1913_v58 = vld [vmem:[#allocation18 + $0x78] sm:$0xff]  ;;  %v1918_v62 = vld [vmem:[#allocation18 + $0xa0] sm:$0xff]  ;;  %v3937_v14 = vpack.c.bf16 %v1927_v55, %v1919_v54  ;;  %v1968_v54 = vld [vmem:[#allocation18 + $0x230] sm:$0xff] }
 0x24b   :  { %v632_v19 = vpop.f32.mrb[8].mxu0  ;;  %v4061_v7 = vpack.c.bf16 %v1913_v58, %v1905_v57  ;;  %v3939_v0 = vpack.c.bf16 %v1926_v1, %v1918_v62  ;;  %v1976_v55 = vld [vmem:[#allocation18 + $0x270] sm:$0xff]  ;;  %v1999_v57 = vld [vmem:[#allocation18 + $0x328] sm:$0xff]  ;;  %v2006_v1 = vld [vmem:[#allocation18 + $0x360] sm:$0xff] }
 0x24c   :  { %640 = vst [vmem:[#allocation20 + $0x20] sm:$0x3] %v632_v19  ;;  %v3312_v22 = vpop.f32.mrb[9].mxu0  ;;  %v1897_v19 = vld [vmem:[#allocation5 + $0x58] sm:$0x3]  ;;  %v2007_v58 = vld [vmem:[#allocation18 + $0x368] sm:$0xff]  ;;  %v4079_v62 = vpack.c.bf16 %v1976_v55, %v1968_v54 }
 0x24d   :  { %3792 = vmatpush1.bf16.msra.mxu0 %v3791_v12  ;;  %3916 = vmatpush1.bf16.msra.mxu1 %v3915_v13  ;;  %v1921_v12 = vld [vmem:[#allocation18 + $0xb8] sm:$0xff]  ;;  %v1959_v22 = vld [vmem:[#allocation18 + $0x1e8] sm:$0xff] }
 0x24e   :  { %3794 = vmatprep.subr.bf16.mxu0 %v3793_v33  ;;  %3918 = vmatprep.subr.bf16.mxu1 %v3917_v15  ;;  %v1929_v13 = vld [vmem:[#allocation18 + $0xf8] sm:$0xff]  ;;  %v4063_v33 = vpack.c.bf16 %v1912_v5, %v1904_v4  ;;  %v1934_v15 = vld [vmem:[#allocation18 + $0x120] sm:$0xff]  ;;  %v3945_v28 = vpack.c.bf16 %v1959_v22, %v1951_v42  ;;  %v3957_v4 = vpack.c.bf16 %v2007_v58, %v1999_v57 }
 0x24f   :  { %v858_v31 = vpop.f32.mrb[2].mxu1  ;;  %v4065_v21 = vpack.c.bf16 %v1929_v13, %v1921_v12  ;;  %v3943_v48 = vpack.c.bf16 %v1942_v16, %v1934_v15  ;;  %v2001_v12 = vld [vmem:[#allocation18 + $0x338] sm:$0xff]  ;;  %v2022_v15 = vld [vmem:[#allocation18 + $0x3e0] sm:$0xff]  ;;  %v3961_v16 = vpack.c.bf16 %v2023_v9, %v2015_v8 }
 0x250   :  { %865 = vst [vmem:[#allocation21 + $0x10] sm:$0x3] %v858_v31  ;;  %v860_v34 = vpop.f32.mrb[3].mxu1  ;;  %v1944_v31 = vld [vmem:[#allocation18 + $0x170] sm:$0xff]  ;;  %v2009_v13 = vld [vmem:[#allocation18 + $0x378] sm:$0xff] }
 0x251   :  { %866 = vst [vmem:[#allocation21 + $0x18] sm:$0x3] %v860_v34  ;;  %3796 = vmatpush1.bf16.msra.mxu0 %v3795_v25  ;;  %3920 = vmatpush1.bf16.msra.mxu1 %v3919_v23  ;;  %v1937_v25 = vld [vmem:[#allocation18 + $0x138] sm:$0xff]  ;;  %v4071_v35 = vpack.c.bf16 %v1944_v31, %v1936_v29  ;;  %v2047_v29 = vld [vmem:[#allocation18 + $0x4a8] sm:$0xff] }
 0x252   :  { %3798 = vmatprep.subr.bf16.mxu0 %v3797_v24  ;;  %3922 = vmatprep.subr.bf16.mxu1 %v3921_v26  ;;  %v1945_v23 = vld [vmem:[#allocation18 + $0x178] sm:$0xff]  ;;  %v4067_v24 = vpack.c.bf16 %v1928_v18, %v1920_v17  ;;  %v1950_v26 = vld [vmem:[#allocation18 + $0x1a0] sm:$0xff]  ;;  %v4085_v17 = vpack.c.bf16 %v2009_v13, %v2001_v12  ;;  %v2000_v18 = vld [vmem:[#allocation18 + $0x330] sm:$0xff] }
 0x253   :  { %v4069_v2 = vpack.c.bf16 %v1945_v23, %v1937_v25  ;;  %v1953_v34 = vld [vmem:[#allocation18 + $0x1b8] sm:$0xff]  ;;  %v2055_v31 = vld [vmem:[#allocation18 + $0x4e8] sm:$0xff]  ;;  %v2094_v12 = vld [vmem:[#allocation18 + $0x620] sm:$0xff] }
 0x254   :  { %v2017_v42 = vld [vmem:[#allocation18 + $0x3b8] sm:$0xff]  ;;  %v2102_v13 = vld [vmem:[#allocation18 + $0x660] sm:$0xff] }
 0x255   :  { %3800 = vmatpush1.bf16.msra.mxu0 %v3799_v56  ;;  %3924 = vmatpush1.bf16.msra.mxu1 %v3923_v63  ;;  %v1961_v56 = vld [vmem:[#allocation18 + $0x1f8] sm:$0xff]  ;;  %v3947_v63 = vpack.c.bf16 %v1958_v27, %v1950_v26  ;;  %v2016_v27 = vld [vmem:[#allocation18 + $0x3b0] sm:$0xff] }
 0x256   :  { %3802 = vmatprep.subr.bf16.mxu0 %v3801_v38  ;;  %3926 = vmatprep.subr.bf16.mxu1 %v3925_v39  ;;  %v1974_v38 = vld [vmem:[#allocation18 + $0x260] sm:$0xff]  ;;  %v3949_v39 = vpack.c.bf16 %v1975_v3, %v1967_v32  ;;  %v4073_v40 = vpack.c.bf16 %v1961_v56, %v1953_v34  ;;  %v2025_v22 = vld [vmem:[#allocation18 + $0x3f8] sm:$0xff] }
 0x257   :  { %v3951_v10 = vpack.c.bf16 %v1974_v38, %v1966_v36  ;;  %v4089_v26 = vpack.c.bf16 %v2025_v22, %v2017_v42  ;;  %v2033_v32 = vld [vmem:[#allocation18 + $0x438] sm:$0xff]  ;;  %v2046_v56 = vld [vmem:[#allocation18 + $0x4a0] sm:$0xff]  ;;  %v2032_v38 = vld [vmem:[#allocation18 + $0x430] sm:$0xff] }
 0x258   :  { %v2057_v44 = vld [vmem:[#allocation18 + $0x4f8] sm:$0xff]  ;;  %v2110_v42 = vld [vmem:[#allocation18 + $0x6a0] sm:$0xff] }
 0x259   :  { %3804 = vmatpush1.bf16.msra.mxu0 %v3803_v46  ;;  %3928 = vmatpush1.bf16.msra.mxu1 %v3927_v47  ;;  %v1977_v46 = vld [vmem:[#allocation18 + $0x278] sm:$0xff]  ;;  %v4253_v47 = vld [vmem:[#allocation5 + $0x8] sm:$0xff]  ;;  %v2118_v22 = vld [vmem:[#allocation18 + $0x6e0] sm:$0xff] }
 0x25a   :  { %3930 = vmatprep.subr.bf16.mxu1 %v3929_v49  ;;  %3934 = vmatprep.subr.bf16.mxu0 %v3933_v50  ;;  %v4075_v49 = vpack.c.bf16 %v1960_v43, %v1952_v41  ;;  %v1982_v50 = vld [vmem:[#allocation18 + $0x2a0] sm:$0xff]  ;;  %v4077_v37 = vpack.c.bf16 %v1977_v46, %v1969_v45  ;;  %v2071_v41 = vld [vmem:[#allocation18 + $0x568] sm:$0xff]  ;;  %v2049_v43 = vld [vmem:[#allocation18 + $0x4b8] sm:$0xff] }
 0x25b   :  { %v2062_v46 = vld [vmem:[#allocation18 + $0x520] sm:$0xff]  ;;  %v2065_v54 = vld [vmem:[#allocation18 + $0x538] sm:$0xff] }
 0x25c   :  { %2558 = vmatmul.mubr.f32.vlgmr.msra.gmra.mrb[22].mxu0 %v1888_v59  ;;  %v2073_v55 = vld [vmem:[#allocation18 + $0x578] sm:$0xff] }
 0x25d   :  { %3932 = vmatpush1.bf16.msra.mxu1 %v3931_v60  ;;  %3936 = vmatpush1.bf16.msra.mxu0 %v3935_v61  ;;  %v1993_v60 = vld [vmem:[#allocation18 + $0x2f8] sm:$0xff]  ;;  %v3955_v61 = vpack.c.bf16 %v1990_v51, %v1982_v50  ;;  %v2048_v50 = vld [vmem:[#allocation18 + $0x4b0] sm:$0xff] }
 0x25e   :  { %2563 = vmatprep.mubr.f32.mxu0 %v1893_v6  ;;  %3938 = vmatprep.subr.bf16.mxu0 %v3937_v14  ;;  %v1998_v14 = vld [vmem:[#allocation18 + $0x320] sm:$0xff]  ;;  %v2056_v51 = vld [vmem:[#allocation18 + $0x4f0] sm:$0xff] }
 0x25f   :  { %4062 = vmatprep.subr.bf16.mxu1 %v4061_v7  ;;  %v1992_v7 = vld [vmem:[#allocation18 + $0x2f0] sm:$0xff]  ;;  %v4099_v58 = vpack.c.bf16 %v2056_v51, %v2048_v50  ;;  %v2159_v50 = vld [vmem:[#allocation18 + $0x828] sm:$0xff] }
 0x260   :  { %2564 = vmatmul.mubr.f32.gmra.mrb[24].mxu0 %v1892_v11  ;;  %2724 = vmatmul.mubr.f32.vlgmr.msra.gmra.mrb[16].mxu1 %v1888_v59  ;;  %v1985_v59 = vld [vmem:[#allocation18 + $0x2b8] sm:$0xff] }
 0x261   :  { %3940 = vmatpush1.bf16.msra.mxu0 %v3939_v0  ;;  %4064 = vmatpush1.bf16.msra.mxu1 %v4063_v33  ;;  %v4081_v5 = vpack.c.bf16 %v1993_v60, %v1985_v59  ;;  %v2014_v33 = vld [vmem:[#allocation18 + $0x3a0] sm:$0xff] }
 0x262   :  { %2569 = vmatprep.mubr.f32.mxu0 %v1897_v19  ;;  %2729 = vmatprep.mubr.f32.mxu1 %v1893_v6  ;;  %v1984_v6 = vld [vmem:[#allocation18 + $0x2b0] sm:$0xff]  ;;  %v3963_v25 = vpack.c.bf16 %v2022_v15, %v2014_v33  ;;  %v2078_v59 = vld [vmem:[#allocation18 + $0x5a0] sm:$0xff] }
 0x263   :  { %3942 = vmatprep.subr.bf16.mxu0 %v3941_v20  ;;  %4066 = vmatprep.subr.bf16.mxu1 %v4065_v21  ;;  %v4083_v0 = vpack.c.bf16 %v1992_v7, %v1984_v6  ;;  %v2031_v20 = vld [vmem:[#allocation18 + $0x428] sm:$0xff]  ;;  %v2086_v60 = vld [vmem:[#allocation18 + $0x5e0] sm:$0xff]  ;;  %v2081_v6 = vld [vmem:[#allocation18 + $0x5b8] sm:$0xff] }
 0x264   :  { %2570 = vmatmul.mubr.f32.gmra.mrb[26].mxu0 %v1896_v30  ;;  %2730 = vmatmul.mubr.f32.gmra.mrb[18].mxu1 %v1892_v11  ;;  %v3959_v11 = vpack.c.bf16 %v2006_v1, %v1998_v14  ;;  %v2039_v21 = vld [vmem:[#allocation18 + $0x468] sm:$0xff]  ;;  %v2064_v14 = vld [vmem:[#allocation18 + $0x530] sm:$0xff]  ;;  %v2089_v7 = vld [vmem:[#allocation18 + $0x5f8] sm:$0xff]  ;;  %v3979_v8 = vpack.c.bf16 %v2086_v60, %v2078_v59 }
 0x265   :  { %3944 = vmatpush1.bf16.msra.mxu0 %v3943_v48  ;;  %4068 = vmatpush1.bf16.msra.mxu1 %v4067_v24  ;;  %v2038_v48 = vld [vmem:[#allocation18 + $0x460] sm:$0xff]  ;;  %v3965_v24 = vpack.c.bf16 %v2039_v21, %v2031_v20  ;;  %v2072_v1 = vld [vmem:[#allocation18 + $0x570] sm:$0xff]  ;;  %v3983_v20 = vpack.c.bf16 %v2102_v13, %v2094_v12  ;;  %v2161_v12 = vld [vmem:[#allocation18 + $0x838] sm:$0xff] }
 0x266   :  { %2735 = vmatprep.mubr.f32.mxu1 %v1897_v19  ;;  %3946 = vmatprep.subr.bf16.mxu0 %v3945_v28  ;;  %v2008_v19 = vld [vmem:[#allocation18 + $0x370] sm:$0xff]  ;;  %v4103_v9 = vpack.c.bf16 %v2072_v1, %v2064_v14  ;;  %v2169_v13 = vld [vmem:[#allocation18 + $0x878] sm:$0xff] }
 0x267   :  { %4070 = vmatprep.subr.bf16.mxu1 %v4069_v2  ;;  %2806 = vmatprep.mubr.f32.mxu0 %v4253_v47  ;;  %v4087_v23 = vpack.c.bf16 %v2008_v19, %v2000_v18  ;;  %v2024_v28 = vld [vmem:[#allocation18 + $0x3f0] sm:$0xff]  ;;  %v2041_v2 = vld [vmem:[#allocation18 + $0x478] sm:$0xff] }
 0x268   :  { %2736 = vmatmul.mubr.f32.gmra.mrb[20].mxu1 %v1896_v30  ;;  %v2030_v30 = vld [vmem:[#allocation18 + $0x420] sm:$0xff]  ;;  %v4091_v34 = vpack.c.bf16 %v2024_v28, %v2016_v27  ;;  %v4093_v36 = vpack.c.bf16 %v2041_v2, %v2033_v32  ;;  %v2080_v33 = vld [vmem:[#allocation18 + $0x5b0] sm:$0xff]  ;;  %v2097_v18 = vld [vmem:[#allocation18 + $0x638] sm:$0xff] }
 0x269   :  { %3948 = vmatpush1.bf16.msra.mxu0 %v3947_v63  ;;  %4072 = vmatpush1.bf16.msra.mxu1 %v4071_v35  ;;  %v3967_v3 = vpack.c.bf16 %v2038_v48, %v2030_v30  ;;  %v2054_v63 = vld [vmem:[#allocation18 + $0x4e0] sm:$0xff]  ;;  %v3969_v35 = vpack.c.bf16 %v2055_v31, %v2047_v29  ;;  %v2088_v15 = vld [vmem:[#allocation18 + $0x5f0] sm:$0xff]  ;;  %v2105_v19 = vld [vmem:[#allocation18 + $0x678] sm:$0xff]  ;;  %v3987_v29 = vpack.c.bf16 %v2118_v22, %v2110_v42 }
 0x26a   :  { %3950 = vmatprep.subr.bf16.mxu0 %v3949_v39  ;;  %4074 = vmatprep.subr.bf16.mxu1 %v4073_v40  ;;  %v2040_v39 = vld [vmem:[#allocation18 + $0x470] sm:$0xff]  ;;  %v2063_v40 = vld [vmem:[#allocation18 + $0x528] sm:$0xff]  ;;  %v3971_v53 = vpack.c.bf16 %v2054_v63, %v2046_v56  ;;  %v4107_v21 = vpack.c.bf16 %v2088_v15, %v2080_v33  ;;  %v2113_v27 = vld [vmem:[#allocation18 + $0x6b8] sm:$0xff] }
 0x26b   :  { %2972 = vmatprep.mubr.f32.mxu1 %v4253_v47  ;;  %v4095_v45 = vpack.c.bf16 %v2040_v39, %v2032_v38  ;;  %v2070_v47 = vld [vmem:[#allocation18 + $0x560] sm:$0xff]  ;;  %v2096_v30 = vld [vmem:[#allocation18 + $0x630] sm:$0xff]  ;;  %v2121_v28 = vld [vmem:[#allocation18 + $0x6f8] sm:$0xff] }
 0x26c   :  { %v3975_v57 = vpack.c.bf16 %v2070_v47, %v2062_v46  ;;  %v2104_v48 = vld [vmem:[#allocation18 + $0x670] sm:$0xff]  ;;  %v2126_v32 = vld [vmem:[#allocation18 + $0x720] sm:$0xff]  ;;  %v2151_v38 = vld [vmem:[#allocation18 + $0x7e8] sm:$0xff] }
 0x26d   :  { %3952 = vmatpush1.bf16.msra.mxu0 %v3951_v10  ;;  %4076 = vmatpush1.bf16.msra.mxu1 %v4075_v49  ;;  %v3973_v10 = vpack.c.bf16 %v2071_v41, %v2063_v40  ;;  %v4097_v49 = vpack.c.bf16 %v2057_v44, %v2049_v43  ;;  %v4111_v31 = vpack.c.bf16 %v2104_v48, %v2096_v30  ;;  %v2134_v2 = vld [vmem:[#allocation18 + $0x760] sm:$0xff]  ;;  %v2112_v56 = vld [vmem:[#allocation18 + $0x6b0] sm:$0xff]  ;;  %v2129_v39 = vld [vmem:[#allocation18 + $0x738] sm:$0xff] }
 0x26e   :  { %3954 = vmatprep.subr.bf16.mxu0 %v3953_v52  ;;  %4078 = vmatprep.subr.bf16.mxu1 %v4077_v37  ;;  %v2079_v52 = vld [vmem:[#allocation18 + $0x5a8] sm:$0xff]  ;;  %v2120_v63 = vld [vmem:[#allocation18 + $0x6f0] sm:$0xff]  ;;  %v2137_v40 = vld [vmem:[#allocation18 + $0x778] sm:$0xff]  ;;  %v3991_v43 = vpack.c.bf16 %v2134_v2, %v2126_v32 }
 0x26f   :  { %v2087_v37 = vld [vmem:[#allocation18 + $0x5e8] sm:$0xff]  ;;  %v4115_v44 = vpack.c.bf16 %v2120_v63, %v2112_v56  ;;  %v4117_v47 = vpack.c.bf16 %v2137_v40, %v2129_v39  ;;  %v2185_v30 = vld [vmem:[#allocation18 + $0x8f8] sm:$0xff]  ;;  %v2176_v2 = vld [vmem:[#allocation18 + $0x8b0] sm:$0xff] }
 0x270   :  { %v2191_v42 = vld [vmem:[#allocation18 + $0x928] sm:$0xff]  ;;  %v2193_v63 = vld [vmem:[#allocation18 + $0x938] sm:$0xff] }
 0x271   :  { %3956 = vmatpush1.bf16.msra.mxu0 %v3955_v61  ;;  %4080 = vmatpush1.bf16.msra.mxu1 %v4079_v62  ;;  %v3977_v61 = vpack.c.bf16 %v2087_v37, %v2079_v52  ;;  %v4101_v62 = vpack.c.bf16 %v2073_v55, %v2065_v54  ;;  %v2167_v37 = vld [vmem:[#allocation18 + $0x868] sm:$0xff]  ;;  %v2145_v54 = vld [vmem:[#allocation18 + $0x7b8] sm:$0xff] }
 0x272   :  { %3958 = vmatprep.subr.bf16.mxu0 %v3957_v4  ;;  %4082 = vmatprep.subr.bf16.mxu1 %v4081_v5  ;;  %v2095_v4 = vld [vmem:[#allocation18 + $0x628] sm:$0xff]  ;;  %v2153_v55 = vld [vmem:[#allocation18 + $0x7f8] sm:$0xff]  ;;  %v3997_v14 = vpack.c.bf16 %v2167_v37, %v2159_v50 }
 0x273   :  { %v2103_v5 = vld [vmem:[#allocation18 + $0x668] sm:$0xff]  ;;  %v4121_v1 = vpack.c.bf16 %v2153_v55, %v2145_v54  ;;  %v2217_v50 = vld [vmem:[#allocation18 + $0x9f8] sm:$0xff]  ;;  %v2222_v55 = vld [vmem:[#allocation18 + $0xa20] sm:$0xff] }
 0x274   :  { %v2215_v56 = vld [vmem:[#allocation18 + $0x9e8] sm:$0xff] }
 0x275   :  { %3960 = vmatpush1.bf16.msra.mxu0 %v3959_v11  ;;  %4084 = vmatpush1.bf16.msra.mxu1 %v4083_v0  ;;  %v3981_v11 = vpack.c.bf16 %v2103_v5, %v2095_v4  ;;  %v4105_v0 = vpack.c.bf16 %v2089_v7, %v2081_v6  ;;  %v2144_v4 = vld [vmem:[#allocation18 + $0x7b0] sm:$0xff]  ;;  %v2175_v6 = vld [vmem:[#allocation18 + $0x8a8] sm:$0xff] }
 0x276   :  { %3962 = vmatprep.subr.bf16.mxu0 %v3961_v16  ;;  %4086 = vmatprep.subr.bf16.mxu1 %v4085_v17  ;;  %v2111_v16 = vld [vmem:[#allocation18 + $0x6a8] sm:$0xff]  ;;  %v2152_v5 = vld [vmem:[#allocation18 + $0x7f0] sm:$0xff] }
 0x277   :  { %v2119_v17 = vld [vmem:[#allocation18 + $0x6e8] sm:$0xff]  ;;  %v4123_v15 = vpack.c.bf16 %v2152_v5, %v2144_v4  ;;  %v2233_v4 = vld [vmem:[#allocation18 + $0xa78] sm:$0xff] }
 0x278   :  { %v4259_v5 = vld [vmem:[#allocation5 + $0x18] sm:$0xff] }
 0x279   :  { %3964 = vmatpush1.bf16.msra.mxu0 %v3963_v25  ;;  %4088 = vmatpush1.bf16.msra.mxu1 %v4087_v23  ;;  %v3985_v25 = vpack.c.bf16 %v2119_v17, %v2111_v16  ;;  %v4109_v23 = vpack.c.bf16 %v2105_v19, %v2097_v18  ;;  %v2174_v16 = vld [vmem:[#allocation18 + $0x8a0] sm:$0xff]  ;;  %v4125_v19 = vpack.c.bf16 %v2169_v13, %v2161_v12 }
 0x27a   :  { %3966 = vmatprep.subr.bf16.mxu0 %v3965_v24  ;;  %4090 = vmatprep.subr.bf16.mxu1 %v4089_v26  ;;  %v2127_v24 = vld [vmem:[#allocation18 + $0x728] sm:$0xff]  ;;  %v2182_v17 = vld [vmem:[#allocation18 + $0x8e0] sm:$0xff] }
 0x27b   :  { %v2135_v26 = vld [vmem:[#allocation18 + $0x768] sm:$0xff] }
 0x27d   :  { %3968 = vmatpush1.bf16.msra.mxu0 %v3967_v3  ;;  %4092 = vmatpush1.bf16.msra.mxu1 %v4091_v34  ;;  %v3989_v3 = vpack.c.bf16 %v2135_v26, %v2127_v24  ;;  %v4113_v34 = vpack.c.bf16 %v2121_v28, %v2113_v27  ;;  %v4254_v24 = vld [vmem:[#allocation5] sm:$0xff]  ;;  %v4003_v26 = vpack.c.bf16 %v2182_v17, %v2174_v16  ;;  %v2241_v16 = vld [vmem:[#allocation18 + $0xab8] sm:$0xff] }
 0x27e   :  { %3970 = vmatprep.subr.bf16.mxu0 %v3969_v35  ;;  %4094 = vmatprep.subr.bf16.mxu1 %v4093_v36  ;;  %v2143_v35 = vld [vmem:[#allocation18 + $0x7a8] sm:$0xff]  ;;  %v2190_v28 = vld [vmem:[#allocation18 + $0x920] sm:$0xff]  ;;  %v2249_v17 = vld [vmem:[#allocation18 + $0xaf8] sm:$0xff] }
 0x27f   :  { %v3993_v46 = vpack.c.bf16 %v2151_v38, %v2143_v35  ;;  %v2201_v35 = vld [vmem:[#allocation18 + $0x978] sm:$0xff]  ;;  %v4256_v38 = vld [vmem:[#allocation5 + $0x20] sm:$0xff] }
 0x281   :  { %3972 = vmatpush1.bf16.msra.mxu0 %v3971_v53  ;;  %4096 = vmatpush1.bf16.msra.mxu1 %v4095_v45  ;;  %v2142_v53 = vld [vmem:[#allocation18 + $0x7a0] sm:$0xff] }
 0x282   :  { %3974 = vmatprep.subr.bf16.mxu0 %v3973_v10  ;;  %4098 = vmatprep.subr.bf16.mxu1 %v4097_v49  ;;  %v2150_v45 = vld [vmem:[#allocation18 + $0x7e0] sm:$0xff]  ;;  %v2128_v10 = vld [vmem:[#allocation18 + $0x730] sm:$0xff] }
 0x283   :  { %v2136_v49 = vld [vmem:[#allocation18 + $0x770] sm:$0xff]  ;;  %v3995_v59 = vpack.c.bf16 %v2150_v45, %v2142_v53  ;;  %v4133_v53 = vpack.c.bf16 %v2201_v35, %v2193_v63 }
 0x284   :  { %v4119_v60 = vpack.c.bf16 %v2136_v49, %v2128_v10  ;;  %v2192_v45 = vld [vmem:[#allocation18 + $0x930] sm:$0xff]  ;;  %v2231_v10 = vld [vmem:[#allocation18 + $0xa68] sm:$0xff]  ;;  %v2209_v49 = vld [vmem:[#allocation18 + $0x9b8] sm:$0xff] }
 0x285   :  { %3976 = vmatpush1.bf16.msra.mxu0 %v3975_v57  ;;  %4100 = vmatpush1.bf16.msra.mxu1 %v4099_v58  ;;  %v2256_v63 = vld [vmem:[#allocation18 + $0xb30] sm:$0xff] }
 0x286   :  { %3978 = vmatprep.subr.bf16.mxu0 %v3977_v61  ;;  %4102 = vmatprep.subr.bf16.mxu1 %v4101_v62  ;;  %v2158_v61 = vld [vmem:[#allocation18 + $0x820] sm:$0xff]  ;;  %v2264_v35 = vld [vmem:[#allocation18 + $0xb70] sm:$0xff] }
 0x287   :  { %v2166_v62 = vld [vmem:[#allocation18 + $0x860] sm:$0xff] }
 0x288   :  { %v3999_v33 = vpack.c.bf16 %v2166_v62, %v2158_v61  ;;  %v2216_v61 = vld [vmem:[#allocation18 + $0x9f0] sm:$0xff]  ;;  %v2239_v62 = vld [vmem:[#allocation18 + $0xaa8] sm:$0xff] }
 0x289   :  { %3980 = vmatpush1.bf16.msra.mxu0 %v3979_v8  ;;  %4104 = vmatpush1.bf16.msra.mxu1 %v4103_v9  ;;  %v2183_v9 = vld [vmem:[#allocation18 + $0x8e8] sm:$0xff] }
 0x28a   :  { %3982 = vmatprep.subr.bf16.mxu0 %v3981_v11  ;;  %4106 = vmatprep.subr.bf16.mxu1 %v4105_v0  ;;  %v4001_v18 = vpack.c.bf16 %v2183_v9, %v2175_v6  ;;  %v2246_v9 = vld [vmem:[#allocation18 + $0xae0] sm:$0xff] }
 0x28d   :  { %3984 = vmatpush1.bf16.msra.mxu0 %v3983_v20  ;;  %4108 = vmatpush1.bf16.msra.mxu1 %v4107_v21  ;;  %v2160_v20 = vld [vmem:[#allocation18 + $0x830] sm:$0xff] }
 0x28e   :  { %3986 = vmatprep.subr.bf16.mxu0 %v3985_v25  ;;  %4110 = vmatprep.subr.bf16.mxu1 %v4109_v23  ;;  %v2168_v21 = vld [vmem:[#allocation18 + $0x870] sm:$0xff]  ;;  %v2199_v25 = vld [vmem:[#allocation18 + $0x968] sm:$0xff]  ;;  %v2177_v23 = vld [vmem:[#allocation18 + $0x8b8] sm:$0xff] }
 0x28f   :  { %v1440_v36 = vpop.f32.mrb[10].mxu0  ;;  %v4127_v27 = vpack.c.bf16 %v2168_v21, %v2160_v20  ;;  %v4129_v32 = vpack.c.bf16 %v2185_v30, %v2177_v23  ;;  %v2254_v20 = vld [vmem:[#allocation18 + $0xb20] sm:$0xff]  ;;  %v2248_v23 = vld [vmem:[#allocation18 + $0xaf0] sm:$0xff]  ;;  %v2271_v30 = vld [vmem:[#allocation18 + $0xba8] sm:$0xff] }
 0x290   :  { %1783 = vst [vmem:[#allocation23] sm:$0xff] %v1440_v36  ;;  %v1442_v41 = vpop.f32.mrb[11].mxu0  ;;  %v4255_v36 = vld [vmem:[#allocation5 + $0x28] sm:$0xff]  ;;  %v2262_v21 = vld [vmem:[#allocation18 + $0xb60] sm:$0xff] }
 0x291   :  { %1784 = vst [vmem:[#allocation23 + $0x8] sm:$0xff] %v1442_v41  ;;  %3988 = vmatpush1.bf16.msra.mxu0 %v3987_v29  ;;  %4112 = vmatpush1.bf16.msra.mxu1 %v4111_v31  ;;  %v2198_v29 = vld [vmem:[#allocation18 + $0x960] sm:$0xff]  ;;  %v4005_v31 = vpack.c.bf16 %v2199_v25, %v2191_v42  ;;  %v2240_v25 = vld [vmem:[#allocation18 + $0xab0] sm:$0xff] }
 0x292   :  { %3990 = vmatprep.subr.bf16.mxu0 %v3989_v3  ;;  %4114 = vmatprep.subr.bf16.mxu1 %v4113_v34  ;;  %v2184_v3 = vld [vmem:[#allocation18 + $0x8f0] sm:$0xff]  ;;  %v2207_v34 = vld [vmem:[#allocation18 + $0x9a8] sm:$0xff]  ;;  %v4007_v39 = vpack.c.bf16 %v2198_v29, %v2190_v28  ;;  %v2206_v41 = vld [vmem:[#allocation18 + $0x9a0] sm:$0xff] }
 0x293   :  { %v1446_v51 = vpop.f32.mrb[12].mxu0  ;;  %v1606_v52 = vpop.f32.mrb[4].mxu1  ;;  %v4131_v40 = vpack.c.bf16 %v2184_v3, %v2176_v2  ;;  %v2270_v2 = vld [vmem:[#allocation18 + $0xba0] sm:$0xff] }
 0x294   :  { %1788 = vst [vmem:[#allocation23 + $0x28] sm:$0xff] %v1446_v51  ;;  %1785 = vst [vmem:[#allocation23 + $0x10] sm:$0xff] %v1606_v52  ;;  %v1448_v57 = vpop.f32.mrb[13].mxu0  ;;  %v1608_v58 = vpop.f32.mrb[5].mxu1  ;;  %v4257_v51 = vld [vmem:[#allocation5 + $0x48] sm:$0x3] }
 0x295   :  { %1789 = vst [vmem:[#allocation23 + $0x30] sm:$0xff] %v1448_v57  ;;  %1786 = vst [vmem:[#allocation23 + $0x18] sm:$0xff] %v1608_v58  ;;  %3992 = vmatpush1.bf16.msra.mxu0 %v3991_v43  ;;  %4116 = vmatpush1.bf16.msra.mxu1 %v4115_v44  ;;  %v2214_v43 = vld [vmem:[#allocation18 + $0x9e0] sm:$0xff]  ;;  %v4009_v44 = vpack.c.bf16 %v2215_v56, %v2207_v34 }
 0x296   :  { %3994 = vmatprep.subr.bf16.mxu0 %v3993_v46  ;;  %4118 = vmatprep.subr.bf16.mxu1 %v4117_v47  ;;  %v2200_v46 = vld [vmem:[#allocation18 + $0x970] sm:$0xff]  ;;  %v2223_v47 = vld [vmem:[#allocation18 + $0xa28] sm:$0xff]  ;;  %v4258_v52 = vld [vmem:[#allocation5 + $0x40] sm:$0x3]  ;;  %v4011_v37 = vpack.c.bf16 %v2214_v43, %v2206_v41 }
 0x297   :  { %v1452_v7 = vpop.f32.mrb[14].mxu0  ;;  %v1612_v8 = vpop.f32.mrb[6].mxu1  ;;  %v4135_v54 = vpack.c.bf16 %v2200_v46, %v2192_v45  ;;  %v2230_v57 = vld [vmem:[#allocation18 + $0xa60] sm:$0xff]  ;;  %v4013_v58 = vpack.c.bf16 %v2231_v10, %v2223_v47  ;;  %v2281_v41 = vld [vmem:[#allocation18 + $0xbf8] sm:$0xff]  ;;  %v4151_v47 = vpack.c.bf16 %v2264_v35, %v2256_v63 }
 0x298   :  { %1793 = vst [vmem:[#allocation23 + $0x50] sm:$0x3] %v1452_v7  ;;  %1790 = vst [vmem:[#allocation23 + $0x38] sm:$0xff] %v1612_v8  ;;  %v1454_v11 = vpop.f32.mrb[15].mxu0  ;;  %v1614_v0 = vpop.f32.mrb[7].mxu1  ;;  %v4015_v6 = vpack.c.bf16 %v2230_v57, %v2222_v55  ;;  %v2238_v8 = vld [vmem:[#allocation18 + $0xaa0] sm:$0xff] }
 0x299   :  { %1794 = vst [vmem:[#allocation23 + $0x58] sm:$0x3] %v1454_v11  ;;  %1791 = vst [vmem:[#allocation23 + $0x40] sm:$0xff] %v1614_v0  ;;  %3996 = vmatpush1.bf16.msra.mxu0 %v3995_v59  ;;  %4120 = vmatpush1.bf16.msra.mxu1 %v4119_v60  ;;  %v4137_v59 = vpack.c.bf16 %v2217_v50, %v2209_v49  ;;  %v2208_v60 = vld [vmem:[#allocation18 + $0x9b0] sm:$0xff]  ;;  %v2278_v3 = vld [vmem:[#allocation18 + $0xbe0] sm:$0xff] }
 0x29a   :  { %3998 = vmatprep.subr.bf16.mxu0 %v3997_v14  ;;  %4122 = vmatprep.subr.bf16.mxu1 %v4121_v1  ;;  %v2247_v14 = vld [vmem:[#allocation18 + $0xae8] sm:$0xff]  ;;  %v2225_v1 = vld [vmem:[#allocation18 + $0xa38] sm:$0xff]  ;;  %v4139_v7 = vpack.c.bf16 %v2216_v61, %v2208_v60  ;;  %v2224_v11 = vld [vmem:[#allocation18 + $0xa30] sm:$0xff] }
 0x29b   :  { %v1618_v22 = vpop.f32.mrb[8].mxu1  ;;  %v4017_v12 = vpack.c.bf16 %v2247_v14, %v2239_v62  ;;  %v4141_v13 = vpack.c.bf16 %v2233_v4, %v2225_v1  ;;  %v2232_v0 = vld [vmem:[#allocation18 + $0xa70] sm:$0xff]  ;;  %v2286_v10 = vld [vmem:[#allocation18 + $0xc20] sm:$0xff]  ;;  %v2303_v55 = vld [vmem:[#allocation18 + $0xca8] sm:$0xff] }
 0x29c   :  { %1795 = vst [vmem:[#allocation23 + $0x60] sm:$0x3] %v1618_v22  ;;  %v1620_v48 = vpop.f32.mrb[9].mxu1  ;;  %2807 = vmatmul.mubr.f32.vlgmr.msra.gmra.mrb[28].mxu0 %v4254_v24  ;;  %v4145_v22 = vpack.c.bf16 %v2249_v17, %v2241_v16  ;;  %v2294_v49 = vld [vmem:[#allocation18 + $0xc60] sm:$0xff]  ;;  %v2297_v60 = vld [vmem:[#allocation18 + $0xc78] sm:$0xff] }
 0x29d   :  { %1796 = vst [vmem:[#allocation23 + $0x68] sm:$0x3] %v1620_v48  ;;  %4000 = vmatpush1.bf16.msra.mxu0 %v3999_v33  ;;  %4124 = vmatpush1.bf16.msra.mxu1 %v4123_v15  ;;  %v2255_v33 = vld [vmem:[#allocation18 + $0xb28] sm:$0xff]  ;;  %v4031_v14 = vpack.c.bf16 %v2294_v49, %v2286_v10  ;;  %v2305_v16 = vld [vmem:[#allocation18 + $0xcb8] sm:$0xff]  ;;  %v2336_v49 = vld [vmem:[#allocation18 + $0xdb0] sm:$0xff] }
 0x29e   :  { %4002 = vmatprep.subr.bf16.mxu0 %v4001_v18  ;;  %4126 = vmatprep.subr.bf16.mxu1 %v4125_v19  ;;  %v2263_v15 = vld [vmem:[#allocation18 + $0xb68] sm:$0xff]  ;;  %v4019_v18 = vpack.c.bf16 %v2246_v9, %v2238_v8  ;;  %v4143_v19 = vpack.c.bf16 %v2232_v0, %v2224_v11  ;;  %v2288_v11 = vld [vmem:[#allocation18 + $0xc30] sm:$0xff]  ;;  %v2313_v17 = vld [vmem:[#allocation18 + $0xcf8] sm:$0xff] }
 0x29f   :  { %2812 = vmatprep.mubr.f32.mxu0 %v4255_v36  ;;  %v4021_v42 = vpack.c.bf16 %v2263_v15, %v2255_v33  ;;  %v2296_v0 = vld [vmem:[#allocation18 + $0xc70] sm:$0xff]  ;;  %v2319_v33 = vld [vmem:[#allocation18 + $0xd28] sm:$0xff] }
 0x2a0   :  { %2973 = vmatmul.mubr.f32.vlgmr.msra.gmra.mrb[22].mxu1 %v4254_v24  ;;  %2813 = vmatmul.mubr.f32.gmra.mrb[30].mxu0 %v4256_v38  ;;  %v2279_v24 = vld [vmem:[#allocation18 + $0xbe8] sm:$0xff] }
 0x2a1   :  { %4004 = vmatpush1.bf16.msra.mxu0 %v4003_v26  ;;  %4128 = vmatpush1.bf16.msra.mxu1 %v4127_v27  ;;  %v2257_v26 = vld [vmem:[#allocation18 + $0xb38] sm:$0xff]  ;;  %v4025_v34 = vpack.c.bf16 %v2279_v24, %v2271_v30  ;;  %v2327_v15 = vld [vmem:[#allocation18 + $0xd68] sm:$0xff]  ;;  %v2304_v24 = vld [vmem:[#allocation18 + $0xcb0] sm:$0xff] }
 0x2a2   :  { %4006 = vmatprep.subr.bf16.mxu0 %v4005_v31  ;;  %4130 = vmatprep.subr.bf16.mxu1 %v4129_v32  ;;  %v2265_v27 = vld [vmem:[#allocation18 + $0xb78] sm:$0xff]  ;;  %v4023_v31 = vpack.c.bf16 %v2262_v21, %v2254_v20  ;;  %v4147_v32 = vpack.c.bf16 %v2248_v23, %v2240_v25  ;;  %v2326_v25 = vld [vmem:[#allocation18 + $0xd60] sm:$0xff]  ;;  %v4037_v30 = vpack.c.bf16 %v2327_v15, %v2319_v33  ;;  %v2376_v33 = vld [vmem:[#allocation18 + $0xef0] sm:$0xff] }
 0x2a3   :  { %2818 = vmatprep.mubr.f32.mxu0 %v4257_v51  ;;  %2978 = vmatprep.mubr.f32.mxu1 %v4255_v36  ;;  %v4149_v56 = vpack.c.bf16 %v2265_v27, %v2257_v26  ;;  %v2287_v36 = vld [vmem:[#allocation18 + $0xc28] sm:$0xff]  ;;  %v2312_v26 = vld [vmem:[#allocation18 + $0xcf0] sm:$0xff] }
 0x2a4   :  { %2819 = vmatmul.mubr.f32.gmra.mrb[32].mxu0 %v4258_v52  ;;  %2979 = vmatmul.mubr.f32.gmra.mrb[24].mxu1 %v4256_v38  ;;  %v2335_v27 = vld [vmem:[#allocation18 + $0xda8] sm:$0xff] }
 0x2a5   :  { %4008 = vmatpush1.bf16.msra.mxu0 %v4007_v39  ;;  %4132 = vmatpush1.bf16.msra.mxu1 %v4131_v40  ;;  %v2295_v39 = vld [vmem:[#allocation18 + $0xc68] sm:$0xff]  ;;  %v2273_v40 = vld [vmem:[#allocation18 + $0xbb8] sm:$0xff] }
 0x2a6   :  { %4010 = vmatprep.subr.bf16.mxu0 %v4009_v44  ;;  %4134 = vmatprep.subr.bf16.mxu1 %v4133_v53  ;;  %v4027_v53 = vpack.c.bf16 %v2278_v3, %v2270_v2  ;;  %v4163_v3 = vpack.c.bf16 %v2312_v26, %v2304_v24  ;;  %v2399_v15 = vld [vmem:[#allocation18 + $0xfa8] sm:$0xff]  ;;  %v2409_v24 = vld [vmem:[#allocation18 + $0xff8] sm:$0xff] }
 0x2a7   :  { %2889 = vmatprep.mubr.f32.mxu0 %v4259_v5  ;;  %2984 = vmatprep.mubr.f32.mxu1 %v4257_v51  ;;  %v4029_v51 = vpack.c.bf16 %v2295_v39, %v2287_v36  ;;  %v2320_v36 = vld [vmem:[#allocation18 + $0xd30] sm:$0xff]  ;;  %v2351_v39 = vld [vmem:[#allocation18 + $0xe28] sm:$0xff] }
 0x2a8   :  { %2985 = vmatmul.mubr.f32.gmra.mrb[26].mxu1 %v4258_v52  ;;  %v4153_v52 = vpack.c.bf16 %v2281_v41, %v2273_v40  ;;  %v2359_v40 = vld [vmem:[#allocation18 + $0xe68] sm:$0xff]  ;;  %v2337_v41 = vld [vmem:[#allocation18 + $0xdb8] sm:$0xff] }
 0x2a9   :  { %4012 = vmatpush1.bf16.msra.mxu0 %v4011_v37  ;;  %4136 = vmatpush1.bf16.msra.mxu1 %v4135_v54  ;;  %v2272_v37 = vld [vmem:[#allocation18 + $0xbb0] sm:$0xff] }
 0x2aa   :  { %4014 = vmatprep.subr.bf16.mxu0 %v4013_v58  ;;  %4138 = vmatprep.subr.bf16.mxu1 %v4137_v59  ;;  %v2280_v54 = vld [vmem:[#allocation18 + $0xbf0] sm:$0xff]  ;;  %v2311_v58 = vld [vmem:[#allocation18 + $0xce8] sm:$0xff]  ;;  %v2289_v59 = vld [vmem:[#allocation18 + $0xc38] sm:$0xff] }
 0x2ab   :  { %3055 = vmatprep.mubr.f32.mxu1 %v4259_v5  ;;  %v4155_v5 = vpack.c.bf16 %v2280_v54, %v2272_v37  ;;  %v2353_v37 = vld [vmem:[#allocation18 + $0xe38] sm:$0xff] }
 0x2ac   :  { %v2361_v54 = vld [vmem:[#allocation18 + $0xe78] sm:$0xff] }
 0x2ad   :  { %4016 = vmatpush1.bf16.msra.mxu0 %v4015_v6  ;;  %4140 = vmatpush1.bf16.msra.mxu1 %v4139_v7  ;;  %v2302_v6 = vld [vmem:[#allocation18 + $0xca0] sm:$0xff] }
 0x2ae   :  { %4018 = vmatprep.subr.bf16.mxu0 %v4017_v12  ;;  %4142 = vmatprep.subr.bf16.mxu1 %v4141_v13  ;;  %v2310_v7 = vld [vmem:[#allocation18 + $0xce0] sm:$0xff]  ;;  %v4033_v12 = vpack.c.bf16 %v2311_v58, %v2303_v55  ;;  %v4157_v13 = vpack.c.bf16 %v2297_v60, %v2289_v59 }
 0x2af   :  { %v3232_v48 = vpop.f32.mrb[16].mxu0  ;;  %v4035_v21 = vpack.c.bf16 %v2310_v7, %v2302_v6  ;;  %v2366_v58 = vld [vmem:[#allocation18 + $0xea0] sm:$0xff]  ;;  %v2377_v6 = vld [vmem:[#allocation18 + $0xef8] sm:$0xff] }
 0x2b0   :  { %v3233_v28 = vpop.f32.mrb[17].mxu0  ;;  %v2374_v59 = vld [vmem:[#allocation18 + $0xee0] sm:$0xff] }
 0x2b1   :  { %4020 = vmatpush1.bf16.msra.mxu0 %v4019_v18  ;;  %4144 = vmatpush1.bf16.msra.mxu1 %v4143_v19  ;;  %v3234_v29 = vadd.f32 %v3233_v28, %v3232_v48  ;;  %v4161_v48 = vpack.c.bf16 %v2313_v17, %v2305_v16  ;;  %v2343_v28 = vld [vmem:[#allocation18 + $0xde8] sm:$0xff]  ;;  %v4051_v7 = vpack.c.bf16 %v2374_v59, %v2366_v58  ;;  %v2385_v17 = vld [vmem:[#allocation18 + $0xf38] sm:$0xff] }
 0x2b2   :  { %4022 = vmatprep.subr.bf16.mxu0 %v4021_v42  ;;  %4146 = vmatprep.subr.bf16.mxu1 %v4145_v22  ;;  %v4159_v42 = vpack.c.bf16 %v2296_v0, %v2288_v11  ;;  %v2318_v22 = vld [vmem:[#allocation18 + $0xd20] sm:$0xff]  ;;  %v4041_v63 = vpack.c.bf16 %v2343_v28, %v2335_v27  ;;  %v2368_v0 = vld [vmem:[#allocation18 + $0xeb0] sm:$0xff]  ;;  %v2407_v16 = vld [vmem:[#allocation18 + $0xfe8] sm:$0xff] }
 0x2b3   :  { %v3273_v38 = vpop.f32.mrb[10].mxu1  ;;  %v3235_v43 = vpop.f32.mrb[18].mxu0  ;;  %v4039_v2 = vpack.c.bf16 %v2326_v25, %v2318_v22  ;;  %v2406_v25 = vld [vmem:[#allocation18 + $0xfe0] sm:$0xff] }
 0x2b4   :  { %v3274_v44 = vpop.f32.mrb[11].mxu1  ;;  %v3236_v45 = vpop.f32.mrb[19].mxu0 }
 0x2b5   :  { %v3275_v46 = vadd.f32 %v3274_v44, %v3273_v38  ;;  %4024 = vmatpush1.bf16.msra.mxu0 %v4023_v31  ;;  %4148 = vmatpush1.bf16.msra.mxu1 %v4147_v32  ;;  %v3237_v50 = vadd.f32 %v3236_v45, %v3235_v43  ;;  %v2329_v31 = vld [vmem:[#allocation18 + $0xd78] sm:$0xff]  ;;  %v2328_v38 = vld [vmem:[#allocation18 + $0xd70] sm:$0xff]  ;;  %v2350_v45 = vld [vmem:[#allocation18 + $0xe20] sm:$0xff] }
 0x2b6   :  { %4026 = vmatprep.subr.bf16.mxu0 %v4025_v34  ;;  %4150 = vmatprep.subr.bf16.mxu1 %v4149_v56  ;;  %v2334_v34 = vld [vmem:[#allocation18 + $0xda0] sm:$0xff]  ;;  %v2345_v43 = vld [vmem:[#allocation18 + $0xdf8] sm:$0xff] }
 0x2b7   :  { %v1770_v57 = vadd.f32 %v3275_v46, %v3234_v29  ;;  %v3276_v61 = vpop.f32.mrb[12].mxu1  ;;  %v3238_v62 = vpop.f32.mrb[20].mxu0  ;;  %v2321_v29 = vld [vmem:[#allocation18 + $0xd38] sm:$0xff]  ;;  %v2342_v56 = vld [vmem:[#allocation18 + $0xde0] sm:$0xff]  ;;  %v4169_v10 = vpack.c.bf16 %v2345_v43, %v2337_v41 }
 0x2b8   :  { %v3277_v1 = vpop.f32.mrb[13].mxu1  ;;  %v3239_v4 = vpop.f32.mrb[21].mxu0  ;;  %v4165_v35 = vpack.c.bf16 %v2329_v31, %v2321_v29  ;;  %v4043_v44 = vpack.c.bf16 %v2342_v56, %v2334_v34  ;;  %v2358_v46 = vld [vmem:[#allocation18 + $0xe60] sm:$0xff]  ;;  %v2400_v29 = vld [vmem:[#allocation18 + $0xfb0] sm:$0xff]  ;;  %v4263_v56 = vld [vmem:[#allocation5 + $0x58] sm:$0x3] }
 0x2b9   :  { %1787 = vst [vmem:[#allocation23 + $0x20] sm:$0xff] %v1770_v57  ;;  %4028 = vmatpush1.bf16.msra.mxu0 %v4027_v53  ;;  %4152 = vmatpush1.bf16.msra.mxu1 %v4151_v47  ;;  %v3278_v8 = vadd.f32 %v3277_v1, %v3276_v61  ;;  %v3240_v9 = vadd.f32 %v3239_v4, %v3238_v62  ;;  %v2352_v62 = vld [vmem:[#allocation18 + $0xe30] sm:$0xff]  ;;  %v2383_v1 = vld [vmem:[#allocation18 + $0xf28] sm:$0xff] }
 0x2ba   :  { %4030 = vmatprep.subr.bf16.mxu0 %v4029_v51  ;;  %4154 = vmatprep.subr.bf16.mxu1 %v4153_v52  ;;  %v4167_v53 = vpack.c.bf16 %v2328_v38, %v2320_v36  ;;  %v4045_v47 = vpack.c.bf16 %v2359_v40, %v2351_v39  ;;  %v2367_v51 = vld [vmem:[#allocation18 + $0xea8] sm:$0xff]  ;;  %v4047_v55 = vpack.c.bf16 %v2358_v46, %v2350_v45  ;;  %v2408_v31 = vld [vmem:[#allocation18 + $0xff0] sm:$0xff] }
 0x2bb   :  { %v1775_v18 = vadd.f32 %v3278_v8, %v3237_v50  ;;  %v3279_v19 = vpop.f32.mrb[14].mxu1  ;;  %v2344_v50 = vld [vmem:[#allocation18 + $0xdf0] sm:$0xff]  ;;  %v2375_v52 = vld [vmem:[#allocation18 + $0xee8] sm:$0xff]  ;;  %v4173_v61 = vpack.c.bf16 %v2361_v54, %v2353_v37 }
 0x2bc   :  { %v3280_v20 = vpop.f32.mrb[15].mxu1  ;;  %v4171_v57 = vpack.c.bf16 %v2344_v50, %v2336_v49  ;;  %v4049_v60 = vpack.c.bf16 %v2375_v52, %v2367_v51  ;;  %v2391_v4 = vld [vmem:[#allocation18 + $0xf68] sm:$0xff]  ;;  %v4262_v34 = vld [vmem:[#allocation5 + $0x30] sm:$0xff] }
 0x2bd   :  { %4032 = vmatpush1.bf16.msra.mxu0 %v4031_v14  ;;  %4156 = vmatpush1.bf16.msra.mxu1 %v4155_v5  ;;  %1792 = vst [vmem:[#allocation23 + $0x48] sm:$0xff] %v1775_v18  ;;  %v3281_v23 = vadd.f32 %v3280_v20, %v3279_v19  ;;  %v2360_v14 = vld [vmem:[#allocation18 + $0xe70] sm:$0xff]  ;;  %v2369_v5 = vld [vmem:[#allocation18 + $0xeb8] sm:$0xff]  ;;  %v4179_v20 = vpack.c.bf16 %v2376_v33, %v2368_v0 }
 0x2be   :  { %4034 = vmatprep.subr.bf16.mxu0 %v4033_v12  ;;  %4158 = vmatprep.subr.bf16.mxu1 %v4157_v13  ;;  %v4175_v8 = vpack.c.bf16 %v2360_v14, %v2352_v62  ;;  %v2390_v12 = vld [vmem:[#allocation18 + $0xf60] sm:$0xff]  ;;  %v4053_v13 = vpack.c.bf16 %v2391_v4, %v2383_v1  ;;  %v4177_v11 = vpack.c.bf16 %v2377_v6, %v2369_v5  ;;  %v2393_v18 = vld [vmem:[#allocation18 + $0xf78] sm:$0xff] }
 0x2bf   :  { %v1780_v32 = vadd.f32 %v3281_v23, %v3240_v9  ;;  %v2382_v9 = vld [vmem:[#allocation18 + $0xf20] sm:$0xff]  ;;  %v4181_v22 = vpack.c.bf16 %v2393_v18, %v2385_v17  ;;  %v2384_v23 = vld [vmem:[#allocation18 + $0xf30] sm:$0xff] }
 0x2c0   :  { %v4055_v19 = vpack.c.bf16 %v2390_v12, %v2382_v9 }
 0x2c1   :  { %4036 = vmatpush1.bf16.msra.mxu0 %v4035_v21  ;;  %4160 = vmatpush1.bf16.msra.mxu1 %v4159_v42  ;;  %1797 = vst [vmem:[#allocation23 + $0x70] sm:$0x3] %v1780_v32  ;;  %v2398_v21 = vld [vmem:[#allocation18 + $0xfa0] sm:$0xff]  ;;  %v4057_v42 = vpack.c.bf16 %v2407_v16, %v2399_v15  ;;  %v4187_v32 = vpack.c.bf16 %v2408_v31, %v2400_v29 }
 0x2c2   :  { %4038 = vmatprep.subr.bf16.mxu0 %v4037_v30  ;;  %4162 = vmatprep.subr.bf16.mxu1 %v4161_v48  ;;  %v2392_v30 = vld [vmem:[#allocation18 + $0xf70] sm:$0xff]  ;;  %v2401_v48 = vld [vmem:[#allocation18 + $0xfb8] sm:$0xff]  ;;  %v4059_v26 = vpack.c.bf16 %v2406_v25, %v2398_v21 }
 0x2c3   :  { %v4183_v27 = vpack.c.bf16 %v2392_v30, %v2384_v23  ;;  %v4185_v28 = vpack.c.bf16 %v2409_v24, %v2401_v48 }
 0x2c5   :  { %4040 = vmatpush1.bf16.msra.mxu0 %v4039_v2  ;;  %4164 = vmatpush1.bf16.msra.mxu1 %v4163_v3  ;;  %v4260_v2 = vld [vmem:[#allocation5 + $0x10] sm:$0xff]  ;;  %v4261_v3 = vld [vmem:[#allocation5 + $0x38] sm:$0xff] }
 0x2c6   :  { %4042 = vmatprep.subr.bf16.mxu0 %v4041_v63  ;;  %4166 = vmatprep.subr.bf16.mxu1 %v4165_v35  ;;  %v4264_v63 = vld [vmem:[#allocation5 + $0x50] sm:$0x3] }
 0x2c9   :  { %4044 = vmatpush1.bf16.msra.mxu0 %v4043_v44  ;;  %4168 = vmatpush1.bf16.msra.mxu1 %v4167_v53 }
 0x2ca   :  { %4046 = vmatprep.subr.bf16.mxu0 %v4045_v47  ;;  %4170 = vmatprep.subr.bf16.mxu1 %v4169_v10 }
 0x2cd   :  { %4048 = vmatpush1.bf16.msra.mxu0 %v4047_v55  ;;  %4172 = vmatpush1.bf16.msra.mxu1 %v4171_v57 }
 0x2ce   :  { %4050 = vmatprep.subr.bf16.mxu0 %v4049_v60  ;;  %4174 = vmatprep.subr.bf16.mxu1 %v4173_v61 }
 0x2d1   :  { %4052 = vmatpush1.bf16.msra.mxu0 %v4051_v7  ;;  %4176 = vmatpush1.bf16.msra.mxu1 %v4175_v8 }
 0x2d2   :  { %4054 = vmatprep.subr.bf16.mxu0 %v4053_v13  ;;  %4178 = vmatprep.subr.bf16.mxu1 %v4177_v11 }
 0x2d5   :  { %4056 = vmatpush1.bf16.msra.mxu0 %v4055_v19  ;;  %4180 = vmatpush1.bf16.msra.mxu1 %v4179_v20 }
 0x2d6   :  { %4058 = vmatprep.subr.bf16.mxu0 %v4057_v42  ;;  %4182 = vmatprep.subr.bf16.mxu1 %v4181_v22 }
 0x2d9   :  { %4060 = vmatpush1.bf16.msra.mxu0 %v4059_v26  ;;  %4184 = vmatpush1.bf16.msra.mxu1 %v4183_v27 }
 0x2da   :  { %4186 = vmatprep.subr.bf16.mxu1 %v4185_v28 }
 0x2dc   :  { %2890 = vmatmul.mubr.f32.vlgmr.msra.gmra.mrb[28].mxu0 %v4260_v2 }
 0x2dd   :  { %4188 = vmatpush1.bf16.msra.mxu1 %v4187_v32  ;;  %2895 = vmatprep.mubr.f32.mxu0 %v4261_v3 }
 0x2e0   :  { %2896 = vmatmul.mubr.f32.gmra.mrb[30].mxu0 %v4262_v34  ;;  %3056 = vmatmul.mubr.f32.vlgmr.msra.gmra.mrb[22].mxu1 %v4260_v2 }
 0x2e1   :  { %2901 = vmatprep.mubr.f32.mxu0 %v4263_v56  ;;  %3061 = vmatprep.mubr.f32.mxu1 %v4261_v3 }
 0x2e4   :  { %2902 = vmatmul.mubr.f32.gmra.mrb[32].mxu0 %v4264_v63  ;;  %3062 = vmatmul.mubr.f32.gmra.mrb[24].mxu1 %v4262_v34 }
 0x2e5   :  { %3067 = vmatprep.mubr.f32.mxu1 %v4263_v56 }
 0x2e8   :  { %3068 = vmatmul.mubr.f32.gmra.mrb[26].mxu1 %v4264_v63 }
 0x32f   :  { %v2559_v35 = vpop.f32.mrb[22].mxu0 }
 0x330   :  { %3074 = vst [vmem:[#allocation24] sm:$0xff] %v2559_v35  ;;  %v2561_v36 = vpop.f32.mrb[23].mxu0 }
 0x331   :  { %3075 = vst [vmem:[#allocation24 + $0x8] sm:$0xff] %v2561_v36 }
 0x333   :  { %v2565_v38 = vpop.f32.mrb[24].mxu0  ;;  %v2725_v39 = vpop.f32.mrb[16].mxu1 }
 0x334   :  { %3082 = vst [vmem:[#allocation24 + $0x40] sm:$0xff] %v2565_v38  ;;  %3076 = vst [vmem:[#allocation24 + $0x10] sm:$0xff] %v2725_v39  ;;  %v2567_v40 = vpop.f32.mrb[25].mxu0  ;;  %v2727_v41 = vpop.f32.mrb[17].mxu1 }
 0x335   :  { %3083 = vst [vmem:[#allocation24 + $0x48] sm:$0xff] %v2567_v40  ;;  %3077 = vst [vmem:[#allocation24 + $0x18] sm:$0xff] %v2727_v41 }
 0x337   :  { %v2571_v43 = vpop.f32.mrb[26].mxu0  ;;  %v2731_v44 = vpop.f32.mrb[18].mxu1 }
 0x338   :  { %3090 = vst [vmem:[#allocation24 + $0x80] sm:$0x3] %v2571_v43  ;;  %3084 = vst [vmem:[#allocation24 + $0x50] sm:$0xff] %v2731_v44  ;;  %v2573_v53 = vpop.f32.mrb[27].mxu0  ;;  %v2733_v45 = vpop.f32.mrb[19].mxu1 }
 0x339   :  { %3091 = vst [vmem:[#allocation24 + $0x88] sm:$0x3] %v2573_v53  ;;  %3085 = vst [vmem:[#allocation24 + $0x58] sm:$0xff] %v2733_v45 }
 0x33b   :  { %v2737_v46 = vpop.f32.mrb[20].mxu1 }
 0x33c   :  { %3092 = vst [vmem:[#allocation24 + $0x90] sm:$0x3] %v2737_v46  ;;  %v2739_v47 = vpop.f32.mrb[21].mxu1 }
 0x33d   :  { %3093 = vst [vmem:[#allocation24 + $0x98] sm:$0x3] %v2739_v47 }
 0x33e   :  { %4452 = shalt.err (!%p4449_p12)
}
 0x33f   :  { %s4453_s28 = scalar_lea.hbm %s5109_s9, 512 }
 0x340   :  { %p4454_p13 = scmp.ne.s32.totalorder %s5109_s9, %s4453_s28  ;;  %p4457_p0 = scmp.lt.u32.totalorder %s4453_s28, %s5109_s9 }
 0x342   :  { %p4459_p1 = pnand %p4457_p0, %p4454_p13 }
 0x344   :  { %4462 = shalt.err (!%p4459_p1)
}
 0x345   :  { %3121 = dma.vmem_to_hbm [thread:$0]  %s3116_s24, 512, %s5109_s9, [#allocation22], %s4548_s3, %s4548_s3, %s4549_s20  }
 0x346   :  { %s4463_s7 = scalar_lea.vmem %s3104_s26, 640  ;;  %p4468_p3 = scmp.lt.s32.totalorder %s3104_s26, %s3104_s26 }
 0x347   :  { %p4464_p2 = scmp.ne.s32.totalorder %s3104_s26, %s4463_s7  ;;  %p4469_p4 = scmp.lt.s32.totalorder %s4463_s7, %s4463_s7 }
 0x349   :  { %p4470_p5 = por %p4469_p4, %p4468_p3 }
 0x34b   :  { %p4471_p6 = pnand %p4470_p5, %p4464_p2 }
 0x34d   :  { %4474 = shalt.err (!%p4471_p6)
}
 0x34e   :  { %s4475_s21 = scalar_lea.hbm %s5108_s8, 640 }
 0x34f   :  { %p4476_p7 = scmp.ne.s32.totalorder %s5108_s8, %s4475_s21  ;;  %p4479_p8 = scmp.lt.u32.totalorder %s4475_s21, %s5108_s8 }
 0x351   :  { %p4481_p9 = pnand %p4479_p8, %p4476_p7 }
 0x353   :  { %4484 = shalt.err (!%p4481_p9)
}
 0x354   :  { %3109 = dma.vmem_to_hbm [thread:$0]  %s3104_s26, 640, %s5108_s8, [#allocation8], %s4553_s2, %s4553_s2, %s4554_s19  }
 0x355   :  { %s4571_s20 = smov [#allocation23]  }
 0x356   :  { %s3127_s24 = sshll.u32 %s4571_s20, 4  ;;  %s3128_s24 = int_to_ptr.vmem [resolvable:$true] %s3127_s24 }
 0x357   :  { %s4485_s23 = scalar_lea.vmem %s3128_s24, 1920  ;;  %p4490_p11 = scmp.lt.s32.totalorder %s3128_s24, %s3128_s24 }
 0x358   :  { %p4486_p10 = scmp.ne.s32.totalorder %s3128_s24, %s4485_s23  ;;  %p4491_p12 = scmp.lt.s32.totalorder %s4485_s23, %s4485_s23 }
 0x35a   :  { %p4492_p13 = por %p4491_p12, %p4490_p11 }
 0x35c   :  { %p4493_p0 = pnand %p4492_p13, %p4486_p10 }
 0x35e   :  { %4496 = shalt.err (!%p4493_p0)
}
 0x35f   :  { %s4497_s29 = scalar_lea.hbm %s5110_s10, 1920 }
 0x360   :  { %p4498_p1 = scmp.ne.s32.totalorder %s5110_s10, %s4497_s29  ;;  %p4501_p2 = scmp.lt.u32.totalorder %s4497_s29, %s5110_s10 }
 0x362   :  { %p4503_p3 = pnand %p4501_p2, %p4498_p1 }
 0x364   :  { %4506 = shalt.err (!%p4503_p3)
}
 0x365   :  { %3133 = dma.vmem_to_hbm [thread:$0]  %s3128_s24, 1920, %s5110_s10, [#allocation22], %s4556_s4, %s4556_s4, %s4557_s1  }
 0x366   :  { %s4572_s26 = smov [#allocation24]  }
 0x367   :  { %s3139_s10 = sshll.u32 %s4572_s26, 4  ;;  %s3140_s10 = int_to_ptr.vmem [resolvable:$true] %s3139_s10 }
 0x368   :  { %s4507_s4 = scalar_lea.vmem %s3140_s10, 3072  ;;  %p4512_p5 = scmp.lt.s32.totalorder %s3140_s10, %s3140_s10 }
 0x369   :  { %p4508_p4 = scmp.ne.s32.totalorder %s3140_s10, %s4507_s4  ;;  %p4513_p6 = scmp.lt.s32.totalorder %s4507_s4, %s4507_s4 }
 0x36b   :  { %p4514_p7 = por %p4513_p6, %p4512_p5 }
 0x36d   :  { %p4515_p8 = pnand %p4514_p7, %p4508_p4 }
 0x3af   :  { %v2891_v10 = vpop.f32.mrb[28].mxu0 }
 0x3b0   :  { %3078 = vst [vmem:[#allocation24 + $0x20] sm:$0xff] %v2891_v10  ;;  %v2893_v49 = vpop.f32.mrb[29].mxu0 }
 0x3b1   :  { %3079 = vst [vmem:[#allocation24 + $0x28] sm:$0xff] %v2893_v49 }
 0x3b3   :  { %v2897_v50 = vpop.f32.mrb[30].mxu0  ;;  %v3057_v51 = vpop.f32.mrb[22].mxu1 }
 0x3b4   :  { %3086 = vst [vmem:[#allocation24 + $0x60] sm:$0xff] %v2897_v50  ;;  %3080 = vst [vmem:[#allocation24 + $0x30] sm:$0xff] %v3057_v51  ;;  %v2899_v52 = vpop.f32.mrb[31].mxu0  ;;  %v3059_v37 = vpop.f32.mrb[23].mxu1 }
 0x3b5   :  { %3087 = vst [vmem:[#allocation24 + $0x68] sm:$0xff] %v2899_v52  ;;  %3081 = vst [vmem:[#allocation24 + $0x38] sm:$0xff] %v3059_v37 }
 0x3b7   :  { %v2903_v54 = vpop.f32.mrb[32].mxu0  ;;  %v3063_v55 = vpop.f32.mrb[24].mxu1 }
 0x3b8   :  { %3094 = vst [vmem:[#allocation24 + $0xa0] sm:$0x3] %v2903_v54  ;;  %3088 = vst [vmem:[#allocation24 + $0x70] sm:$0xff] %v3063_v55  ;;  %v2905_v57 = vpop.f32.mrb[33].mxu0  ;;  %v3065_v58 = vpop.f32.mrb[25].mxu1 }
 0x3b9   :  { %3095 = vst [vmem:[#allocation24 + $0xa8] sm:$0x3] %v2905_v57  ;;  %3089 = vst [vmem:[#allocation24 + $0x78] sm:$0xff] %v3065_v58 }
 0x3bb   :  { %v3069_v59 = vpop.f32.mrb[26].mxu1 }
 0x3bc   :  { %3096 = vst [vmem:[#allocation24 + $0xb0] sm:$0x3] %v3069_v59  ;;  %v3071_v60 = vpop.f32.mrb[27].mxu1 }
 0x3bd   :  { %3097 = vst [vmem:[#allocation24 + $0xb8] sm:$0x3] %v3071_v60 }
 0x3be   :  { %4518 = shalt.err (!%p4515_p8)
}
 0x3bf   :  { %s4519_s17 = scalar_lea.hbm %s5111_s11, 3072 }
 0x3c0   :  { %p4520_p9 = scmp.ne.s32.totalorder %s5111_s11, %s4519_s17  ;;  %p4523_p10 = scmp.lt.u32.totalorder %s4519_s17, %s5111_s11 }
 0x3c2   :  { %p4525_p11 = pnand %p4523_p10, %p4520_p9 }
 0x3c4   :  { %4528 = shalt.err (!%p4525_p11)
}
 0x3c5   :  { %3145 = dma.vmem_to_hbm [thread:$0]  %s3140_s10, 3072, %s5111_s11, [#allocation25], %s4559_s6, %s4559_s6, %s4560_s12  }
 0x3c6   :  { %4539 = dma.done.wait [#allocation8], 640  }
 0x3c7   :  { %4540 = vsyncadd [#allocation8], 4294966656 }
 0x3c8   :  { %4541 = dma.done.wait [#allocation22], 2432  }
 0x3c9   :  { %4542 = vsyncadd [#allocation22], 4294964864 }
 0x3ca   :  { %4543 = dma.done.wait [#allocation25], 3072  }
 0x3cb   :  { %4544 = vsyncadd [#allocation25], 4294964224 }
 0x3cc   :  { %3158 = vsyncpa [#allocation7], 1 }
 0x3cd   :  { %3159 = vsyncpa [#allocation10], 1 }
 0x3ce   :  { %3160 = vsyncpa [#allocation13], 1 }
 0x3cf   :  { %3161 = vsyncpa [#allocation16], 1 }
 0x3d0   :  { %3162 = vsyncpa [#allocation19], 1 }
 0x3d1   :  { %3163 = vsyncpa [#allocation8], 1 }
 0x3d2   :  { %3164 = vsyncpa [#allocation22], 1 }
 0x3d3   :  { %3165 = vsyncpa [#allocation25], 1 }

</bundles_post_ra>
